<compile_context>
chip_gen: v7x
topology: tpu7x:2x2x1
jax: 0.10.0
libtpu: 0.0.40
codegen_flags: <defaults>
</compile_context>

<pallas_src>
import functools

import jax
import jax.numpy as jnp
from jax.experimental import pallas as pl
from jax.experimental.pallas import tpu as pltpu


def _round_up(x, m):
    return ((x + m - 1) // m) * m


def _tensorcores_per_chip():
    """Best-effort detection of dual-TensorCore parts (v7x)."""
    try:
        kind = jax.devices()[0].device_kind.lower()
    except Exception:
        return 1
    return 2 if ("v7" in kind or "7x" in kind) else 1


def encoder_kernel(xp_ref, w1_ref, b1_ref, w2_ref, b2_ref, w3_ref, b3_ref,
                   out_ref, *, L3, L2p, L3p, g2, g3, dot_dtype):
    """One batch block: conv1 as a single matmul on wrapper-built patches,
    conv2/conv3 as grouped-tap im2col matmuls, bias + ReLU, global max.

    xp_ref : (B, L1p, K1*C_in)  conv1 im2col patches (zero-padded rows >= L1)
    w1_ref : (K1*C_in, C1)      b1_ref : (1, C1)
    w2_ref : (K2*C1, C2)        b2_ref : (1, C2)
    w3_ref : (K3*C2, C3p)       b3_ref : (1, C3p)   (C3p = z_dim padded to 128)
    out_ref: (B, C3p)
    """
    B, L1p, KC1 = xp_ref.shape
    C1 = w1_ref.shape[1]
    C2 = w2_ref.shape[1]
    C3p = w3_ref.shape[1]
    k2 = w2_ref.shape[0] // C1
    k3 = w3_ref.shape[0] // C2

    def mm(lhs, rhs):
        return jnp.dot(lhs.astype(dot_dtype), rhs.astype(dot_dtype),
                       preferred_element_type=jnp.float32)

    # ---- conv1 + bias + ReLU: one matmul, M = B*L1p, K = K1*C_in ----
    xp2d = xp_ref[...].reshape(B * L1p, KC1)          # free: L1p % 8 == 0
    h1 = jnp.maximum(mm(xp2d, w1_ref[...]) + b1_ref[...], 0.0)
    h1 = h1.reshape(B, L1p, C1)                       # free

    # ---- conv2: grouped-tap im2col (128-lane patch pieces, K=128 dots) ----
    w2 = w2_ref[...]
    acc2 = None
    for g in range(k2 // g2):
        t0 = g * g2
        pg = jnp.concatenate(
            [h1[:, t0 + j: t0 + j + L2p, :] for j in range(g2)], axis=-1)
        pg = pg.reshape(B * L2p, g2 * C1)             # free: L2p % 8 == 0
        part = mm(pg, w2[t0 * C1:(t0 + g2) * C1, :])  # 8-aligned weight rows
        acc2 = part if acc2 is None else acc2 + part
    h2 = jnp.maximum(acc2 + b2_ref[...], 0.0).reshape(B, L2p, C2)

    # ---- conv3: grouped-tap im2col ----
    w3 = w3_ref[...]
    acc3 = None
    for g in range(k3 // g3):
        t0 = g * g3
        pg = jnp.concatenate(
            [h2[:, t0 + j: t0 + j + L3p, :] for j in range(g3)], axis=-1)
        pg = pg.reshape(B * L3p, g3 * C2)             # free: L3p % 8 == 0
        part = mm(pg, w3[t0 * C2:(t0 + g3) * C2, :])
        acc3 = part if acc3 is None else acc3 + part
    h3 = jnp.maximum(acc3 + b3_ref[...], 0.0).reshape(B, L3p, C3p)

    # AdaptiveMaxPool1d(1): global max over VALID length positions only
    # (length-padded tail rows carry junk and are excluded).  Dense 128-lane
    # output store; padded channels are discarded in the wrapper.
    out_ref[...] = jnp.max(h3[:, :L3, :], axis=1)


def encoder_forward(x_ncl, w1, b1, w2, b2, w3, b3, *,
                    batch_block=64, use_bf16_matmul=False):
    """x_ncl: (N, C_in, L) float32 (PyTorch NCW layout).

    Weights are PyTorch-layout: w_i (C_out, C_in, K), b_i (C_out,).
    Returns (N, z_dim) float32.
    """
    N, C_in, L = x_ncl.shape
    C1, k1 = w1.shape[0], w1.shape[2]
    C2, k2 = w2.shape[0], w2.shape[2]
    z_dim, k3 = w3.shape[0], w3.shape[2]
    assert w1.shape[1] == C_in and w2.shape[1] == C1 and w3.shape[1] == C2

    L1 = L - k1 + 1
    L2 = L1 - k2 + 1
    L3 = L2 - k3 + 1
    assert L3 >= 1, f"sequence length {L} too short for kernels {k1}+{k2}+{k3}"

    # Padded lengths (multiples of 8), derived back-to-front so every grouped
    # im2col slice stays inside the previous (padded) activation.
    L3p = _round_up(L3, 8)
    L2p = _round_up(max(L2, L3p + k3 - 1), 8)
    L1p = _round_up(max(L1, L2p + k2 - 1), 8)

    # Tap group sizes: aim for 128-lane (one vreg lane group) patch pieces.
    def _group(k, c):
        g = max(1, min(k, 128 // max(c, 1)))
        while k % g:
            g -= 1
        return g
    g2 = _group(k2, C1)   # 4 for C1=32, k2=16
    g3 = _group(k3, C2)   # 2 for C2=64, k3=8

    # Batch block: amortize per-grid-step overhead.  Only on dual-TC parts
    # (v7x) do we force >= 2 balanced grid steps; B is kept sublane-aligned.
    n_tc = _tensorcores_per_chip()
    batch_block = max(1, min(batch_block, 128))   # VMEM cap (v7x: 64 MiB)
    B = max(1, min(batch_block, N))
    if n_tc > 1 and N > 1:
        B = max(1, min(B, pl.cdiv(N, n_tc)))
    B = _round_up(B, 8)
    N_pad = _round_up(N, B * n_tc)

    # --- wrapper-side im2col for conv1: lane-dense (N_pad, L1p, k1*C_in) ---
    # TODO(synk): for production-scale N/L, build conv1 patches in-kernel to
    # avoid the ~(k1*C_in)/C_in HBM expansion of this wrapper pass.
    x_nlc = jnp.transpose(x_ncl, (0, 2, 1)).astype(jnp.float32)   # (N, L, C_in)
    xp = jnp.concatenate([x_nlc[:, t:t + L1, :] for t in range(k1)], axis=-1)
    xp = jnp.pad(xp, ((0, N_pad - N), (0, L1p - L1), (0, 0)))

    # --- 2-D weight layouts (tap outer, channel inner along K*C) ---
    w1_2d = jnp.transpose(w1, (2, 1, 0)).reshape(k1 * C_in, C1)   # (96, 32)
    w2_2d = jnp.transpose(w2, (2, 1, 0)).reshape(k2 * C1, C2)     # (512, 64)
    w3_2d = jnp.transpose(w3, (2, 1, 0)).reshape(k3 * C2, z_dim)  # (512, z)
    z_pad = _round_up(max(z_dim, 128), 128)   # dense 128-lane output store
    w3_2d = jnp.pad(w3_2d, ((0, 0), (0, z_pad - z_dim)))
    b1_2d = b1.reshape(1, C1).astype(jnp.float32)
    b2_2d = b2.reshape(1, C2).astype(jnp.float32)
    b3_2d = jnp.pad(b3, (0, z_pad - z_dim)).reshape(1, z_pad).astype(jnp.float32)

    dot_dtype = jnp.bfloat16 if use_bf16_matmul else jnp.float32
    kernel = functools.partial(
        encoder_kernel, L3=L3, L2p=L2p, L3p=L3p, g2=g2, g3=g3,
        dot_dtype=dot_dtype)

    # Advisory cost: true conv FLOPs (unpadded lengths, z_dim not z_pad).
    flops = 2 * N_pad * (L1 * k1 * C_in * C1
                         + L2 * k2 * C1 * C2
                         + L3 * k3 * C2 * z_dim)
    bytes_accessed = 4 * (xp.size + w1_2d.size + w2_2d.size + w3_2d.size
                          + b1_2d.size + b2_2d.size + b3_2d.size
                          + N_pad * z_pad)

    out = pl.pallas_call(
        kernel,
        out_shape=jax.ShapeDtypeStruct((N_pad, z_pad), jnp.float32),
        grid_spec=pltpu.PrefetchScalarGridSpec(
            num_scalar_prefetch=0,
            grid=(N_pad // B,),
            in_specs=[
                pl.BlockSpec((B, L1p, k1 * C_in), lambda b: (b, 0, 0)),
                pl.BlockSpec(w1_2d.shape, lambda b: (0, 0)),
                pl.BlockSpec(b1_2d.shape, lambda b: (0, 0)),
                pl.BlockSpec(w2_2d.shape, lambda b: (0, 0)),
                pl.BlockSpec(b2_2d.shape, lambda b: (0, 0)),
                pl.BlockSpec(w3_2d.shape, lambda b: (0, 0)),
                pl.BlockSpec(b3_2d.shape, lambda b: (0, 0)),
            ],
            out_specs=pl.BlockSpec((B, z_pad), lambda b: (b, 0)),
        ),
        compiler_params=pltpu.CompilerParams(
            dimension_semantics=("parallel",),
            vmem_limit_bytes=40 << 20,
        ),
        cost_estimate=pl.CostEstimate(
            flops=flops, transcendentals=0, bytes_accessed=bytes_accessed),
    )(xp, w1_2d, b1_2d, w2_2d, b2_2d, w3_2d, b3_2d)

    return out[:N, :z_dim]


def _reference_forward(x_ncl, w1, b1, w2, b2, w3, b3):
    """Pure-JAX reference using lax conv (PyTorch layouts)."""
    dn = ("NCH", "OIH", "NCH")

    def conv_relu(x, w, b):
        y = jax.lax.conv_general_dilated(
            x, w, window_strides=(1,), padding="VALID", dimension_numbers=dn
        )
        y = y + b[None, :, None]
        return jnp.maximum(y, 0.0)

    h = conv_relu(x_ncl, w1, b1)
    h = conv_relu(h, w2, b2)
    h = conv_relu(h, w3, b3)
    return jnp.max(h, axis=-1)  # global max pool + squeeze


if __name__ == "__main__":
    # Small shapes consistent with the module: batch=2, input_channels=4,
    # z_dim=32, sequence length 64 (> 24+16+8-2 so all convs are valid).
    key = jax.random.PRNGKey(0)
    N, C_in, L, z_dim = 2, 4, 64, 32

    ks = jax.random.split(key, 7)
    x = jax.random.normal(ks[0], (N, C_in, L), dtype=jnp.float32)
    # Deterministic synthetic parameters (PyTorch Conv1d weight layout (Cout, Cin, K)).
    w1 = 0.1 * jax.random.normal(ks[1], (32, C_in, 24), dtype=jnp.float32)
    b1 = 0.1 * jax.random.normal(ks[2], (32,), dtype=jnp.float32)
    w2 = 0.1 * jax.random.normal(ks[3], (64, 32, 16), dtype=jnp.float32)
    b2 = 0.1 * jax.random.normal(ks[4], (64,), dtype=jnp.float32)
    w3 = 0.1 * jax.random.normal(ks[5], (z_dim, 64, 8), dtype=jnp.float32)
    b3 = 0.1 * jax.random.normal(ks[6], (z_dim,), dtype=jnp.float32)

    out = encoder_forward(x, w1, b1, w2, b2, w3, b3)
    out = jax.block_until_ready(out)
    assert out.shape == (N, z_dim), out.shape

    ref = jax.block_until_ready(_reference_forward(x, w1, b1, w2, b2, w3, b3))
    assert jnp.allclose(out, ref, atol=1e-4, rtol=1e-4), (
        float(jnp.max(jnp.abs(out - ref)))
    )

    print("KERNEL_OK")
</pallas_src>

<mosaic_0001>
module attributes {stable_mosaic.version = 11 : i64} {
  func.func @encoder_kernel(%arg0: i32, %arg1: memref<8x48x96xf32, #tpu.memory_space<vmem>>, %arg2: memref<96x32xf32, #tpu.memory_space<vmem>>, %arg3: memref<1x32xf32, #tpu.memory_space<vmem>>, %arg4: memref<512x64xf32, #tpu.memory_space<vmem>>, %arg5: memref<1x64xf32, #tpu.memory_space<vmem>>, %arg6: memref<512x128xf32, #tpu.memory_space<vmem>>, %arg7: memref<1x128xf32, #tpu.memory_space<vmem>>, %arg8: memref<8x128xf32, #tpu.memory_space<vmem>>) attributes {dimension_semantics = [#tpu.dimension_semantics<parallel>], iteration_bounds = array<i64: 1>, scalar_prefetch = 0 : i64, scratch_operands = 0 : i64, tpu.core_type = #tpu.core_type<tc>, window_params = [{transform_indices = @transform_0, window_bounds = array<i64: 8, 48, 96>}, {pipeline_mode = #tpu.pipeline_mode<synchronous>, transform_indices = @transform_1, window_bounds = array<i64: 96, 32>}, {pipeline_mode = #tpu.pipeline_mode<synchronous>, transform_indices = @transform_2, window_bounds = array<i64: 1, 32>}, {pipeline_mode = #tpu.pipeline_mode<synchronous>, transform_indices = @transform_3, window_bounds = array<i64: 512, 64>}, {pipeline_mode = #tpu.pipeline_mode<synchronous>, transform_indices = @transform_4, window_bounds = array<i64: 1, 64>}, {pipeline_mode = #tpu.pipeline_mode<synchronous>, transform_indices = @transform_5, window_bounds = array<i64: 512, 128>}, {pipeline_mode = #tpu.pipeline_mode<synchronous>, transform_indices = @transform_6, window_bounds = array<i64: 1, 128>}, {transform_indices = @transform_7, window_bounds = array<i64: 8, 128>}]} {
    %c0 = arith.constant 0 : index
    %c0_0 = arith.constant 0 : index
    %c0_1 = arith.constant 0 : index
    %0 = vector.load %arg1[%c0, %c0_0, %c0_1] : memref<8x48x96xf32, #tpu.memory_space<vmem>>, vector<8x48x96xf32>
    %1 = vector.shape_cast %0 : vector<8x48x96xf32> to vector<384x96xf32>
    %c0_2 = arith.constant 0 : index
    %c0_3 = arith.constant 0 : index
    %2 = vector.load %arg2[%c0_2, %c0_3] : memref<96x32xf32, #tpu.memory_space<vmem>>, vector<96x32xf32>
    %cst = arith.constant dense<0.000000e+00> : vector<384x32xf32>
    %3 = tpu.matmul %1, %2, %cst {dimension_numbers = #tpu.dot_dimension_numbers<[1], [0], [0], [1], [0, 0, 1, 1], [], []>} : vector<384x96xf32>, vector<96x32xf32>, vector<384x32xf32> -> vector<384x32xf32>
    %c0_4 = arith.constant 0 : index
    %c0_5 = arith.constant 0 : index
    %4 = vector.load %arg3[%c0_4, %c0_5] : memref<1x32xf32, #tpu.memory_space<vmem>>, vector<1x32xf32>
    %5 = vector.broadcast %4 : vector<1x32xf32> to vector<384x32xf32>
    %6 = arith.addf %3, %5 : vector<384x32xf32>
    %cst_6 = arith.constant 0.000000e+00 : f32
    %7 = vector.broadcast %cst_6 : f32 to vector<384x32xf32>
    %8 = arith.maximumf %6, %7 : vector<384x32xf32>
    %9 = vector.shape_cast %8 : vector<384x32xf32> to vector<8x48x32xf32>
    %c0_7 = arith.constant 0 : index
    %c0_8 = arith.constant 0 : index
    %10 = vector.load %arg4[%c0_7, %c0_8] : memref<512x64xf32, #tpu.memory_space<vmem>>, vector<512x64xf32>
    %11 = vector.extract_strided_slice %9 {offsets = [0, 0, 0], sizes = [8, 32, 32], strides = [1, 1, 1]} : vector<8x48x32xf32> to vector<8x32x32xf32>
    %12 = vector.extract_strided_slice %9 {offsets = [0, 1, 0], sizes = [8, 32, 32], strides = [1, 1, 1]} : vector<8x48x32xf32> to vector<8x32x32xf32>
    %13 = vector.extract_strided_slice %9 {offsets = [0, 2, 0], sizes = [8, 32, 32], strides = [1, 1, 1]} : vector<8x48x32xf32> to vector<8x32x32xf32>
    %14 = vector.extract_strided_slice %9 {offsets = [0, 3, 0], sizes = [8, 32, 32], strides = [1, 1, 1]} : vector<8x48x32xf32> to vector<8x32x32xf32>
    %15 = tpu.concatenate %11, %12, %13, %14 in 2 : vector<8x32x32xf32>, vector<8x32x32xf32>, vector<8x32x32xf32>, vector<8x32x32xf32> -> vector<8x32x128xf32>
    %16 = vector.shape_cast %15 : vector<8x32x128xf32> to vector<256x128xf32>
    %17 = vector.extract_strided_slice %10 {offsets = [0, 0], sizes = [128, 64], strides = [1, 1]} : vector<512x64xf32> to vector<128x64xf32>
    %cst_9 = arith.constant dense<0.000000e+00> : vector<256x64xf32>
    %18 = tpu.matmul %16, %17, %cst_9 {dimension_numbers = #tpu.dot_dimension_numbers<[1], [0], [0], [1], [0, 0, 1, 1], [], []>} : vector<256x128xf32>, vector<128x64xf32>, vector<256x64xf32> -> vector<256x64xf32>
    %19 = vector.extract_strided_slice %9 {offsets = [0, 4, 0], sizes = [8, 32, 32], strides = [1, 1, 1]} : vector<8x48x32xf32> to vector<8x32x32xf32>
    %20 = vector.extract_strided_slice %9 {offsets = [0, 5, 0], sizes = [8, 32, 32], strides = [1, 1, 1]} : vector<8x48x32xf32> to vector<8x32x32xf32>
    %21 = vector.extract_strided_slice %9 {offsets = [0, 6, 0], sizes = [8, 32, 32], strides = [1, 1, 1]} : vector<8x48x32xf32> to vector<8x32x32xf32>
    %22 = vector.extract_strided_slice %9 {offsets = [0, 7, 0], sizes = [8, 32, 32], strides = [1, 1, 1]} : vector<8x48x32xf32> to vector<8x32x32xf32>
    %23 = tpu.concatenate %19, %20, %21, %22 in 2 : vector<8x32x32xf32>, vector<8x32x32xf32>, vector<8x32x32xf32>, vector<8x32x32xf32> -> vector<8x32x128xf32>
    %24 = vector.shape_cast %23 : vector<8x32x128xf32> to vector<256x128xf32>
    %25 = vector.extract_strided_slice %10 {offsets = [128, 0], sizes = [128, 64], strides = [1, 1]} : vector<512x64xf32> to vector<128x64xf32>
    %cst_10 = arith.constant dense<0.000000e+00> : vector<256x64xf32>
    %26 = tpu.matmul %24, %25, %cst_10 {dimension_numbers = #tpu.dot_dimension_numbers<[1], [0], [0], [1], [0, 0, 1, 1], [], []>} : vector<256x128xf32>, vector<128x64xf32>, vector<256x64xf32> -> vector<256x64xf32>
    %27 = arith.addf %18, %26 : vector<256x64xf32>
    %28 = vector.extract_strided_slice %9 {offsets = [0, 8, 0], sizes = [8, 32, 32], strides = [1, 1, 1]} : vector<8x48x32xf32> to vector<8x32x32xf32>
    %29 = vector.extract_strided_slice %9 {offsets = [0, 9, 0], sizes = [8, 32, 32], strides = [1, 1, 1]} : vector<8x48x32xf32> to vector<8x32x32xf32>
    %30 = vector.extract_strided_slice %9 {offsets = [0, 10, 0], sizes = [8, 32, 32], strides = [1, 1, 1]} : vector<8x48x32xf32> to vector<8x32x32xf32>
    %31 = vector.extract_strided_slice %9 {offsets = [0, 11, 0], sizes = [8, 32, 32], strides = [1, 1, 1]} : vector<8x48x32xf32> to vector<8x32x32xf32>
    %32 = tpu.concatenate %28, %29, %30, %31 in 2 : vector<8x32x32xf32>, vector<8x32x32xf32>, vector<8x32x32xf32>, vector<8x32x32xf32> -> vector<8x32x128xf32>
    %33 = vector.shape_cast %32 : vector<8x32x128xf32> to vector<256x128xf32>
    %34 = vector.extract_strided_slice %10 {offsets = [256, 0], sizes = [128, 64], strides = [1, 1]} : vector<512x64xf32> to vector<128x64xf32>
    %cst_11 = arith.constant dense<0.000000e+00> : vector<256x64xf32>
    %35 = tpu.matmul %33, %34, %cst_11 {dimension_numbers = #tpu.dot_dimension_numbers<[1], [0], [0], [1], [0, 0, 1, 1], [], []>} : vector<256x128xf32>, vector<128x64xf32>, vector<256x64xf32> -> vector<256x64xf32>
    %36 = arith.addf %27, %35 : vector<256x64xf32>
    %37 = vector.extract_strided_slice %9 {offsets = [0, 12, 0], sizes = [8, 32, 32], strides = [1, 1, 1]} : vector<8x48x32xf32> to vector<8x32x32xf32>
    %38 = vector.extract_strided_slice %9 {offsets = [0, 13, 0], sizes = [8, 32, 32], strides = [1, 1, 1]} : vector<8x48x32xf32> to vector<8x32x32xf32>
    %39 = vector.extract_strided_slice %9 {offsets = [0, 14, 0], sizes = [8, 32, 32], strides = [1, 1, 1]} : vector<8x48x32xf32> to vector<8x32x32xf32>
    %40 = vector.extract_strided_slice %9 {offsets = [0, 15, 0], sizes = [8, 32, 32], strides = [1, 1, 1]} : vector<8x48x32xf32> to vector<8x32x32xf32>
    %41 = tpu.concatenate %37, %38, %39, %40 in 2 : vector<8x32x32xf32>, vector<8x32x32xf32>, vector<8x32x32xf32>, vector<8x32x32xf32> -> vector<8x32x128xf32>
    %42 = vector.shape_cast %41 : vector<8x32x128xf32> to vector<256x128xf32>
    %43 = vector.extract_strided_slice %10 {offsets = [384, 0], sizes = [128, 64], strides = [1, 1]} : vector<512x64xf32> to vector<128x64xf32>
    %cst_12 = arith.constant dense<0.000000e+00> : vector<256x64xf32>
    %44 = tpu.matmul %42, %43, %cst_12 {dimension_numbers = #tpu.dot_dimension_numbers<[1], [0], [0], [1], [0, 0, 1, 1], [], []>} : vector<256x128xf32>, vector<128x64xf32>, vector<256x64xf32> -> vector<256x64xf32>
    %45 = arith.addf %36, %44 : vector<256x64xf32>
    %c0_13 = arith.constant 0 : index
    %c0_14 = arith.constant 0 : index
    %46 = vector.load %arg5[%c0_13, %c0_14] : memref<1x64xf32, #tpu.memory_space<vmem>>, vector<1x64xf32>
    %47 = vector.broadcast %46 : vector<1x64xf32> to vector<256x64xf32>
    %48 = arith.addf %45, %47 : vector<256x64xf32>
    %cst_15 = arith.constant 0.000000e+00 : f32
    %49 = vector.broadcast %cst_15 : f32 to vector<256x64xf32>
    %50 = arith.maximumf %48, %49 : vector<256x64xf32>
    %51 = vector.shape_cast %50 : vector<256x64xf32> to vector<8x32x64xf32>
    %c0_16 = arith.constant 0 : index
    %c0_17 = arith.constant 0 : index
    %52 = vector.load %arg6[%c0_16, %c0_17] : memref<512x128xf32, #tpu.memory_space<vmem>>, vector<512x128xf32>
    %53 = vector.extract_strided_slice %51 {offsets = [0, 0, 0], sizes = [8, 24, 64], strides = [1, 1, 1]} : vector<8x32x64xf32> to vector<8x24x64xf32>
    %54 = vector.extract_strided_slice %51 {offsets = [0, 1, 0], sizes = [8, 24, 64], strides = [1, 1, 1]} : vector<8x32x64xf32> to vector<8x24x64xf32>
    %55 = tpu.concatenate %53, %54 in 2 : vector<8x24x64xf32>, vector<8x24x64xf32> -> vector<8x24x128xf32>
    %56 = vector.shape_cast %55 : vector<8x24x128xf32> to vector<192x128xf32>
    %57 = vector.extract_strided_slice %52 {offsets = [0, 0], sizes = [128, 128], strides = [1, 1]} : vector<512x128xf32> to vector<128x128xf32>
    %cst_18 = arith.constant dense<0.000000e+00> : vector<192x128xf32>
    %58 = tpu.matmul %56, %57, %cst_18 {dimension_numbers = #tpu.dot_dimension_numbers<[1], [0], [0], [1], [0, 0, 1, 1], [], []>} : vector<192x128xf32>, vector<128x128xf32>, vector<192x128xf32> -> vector<192x128xf32>
    %59 = vector.extract_strided_slice %51 {offsets = [0, 2, 0], sizes = [8, 24, 64], strides = [1, 1, 1]} : vector<8x32x64xf32> to vector<8x24x64xf32>
    %60 = vector.extract_strided_slice %51 {offsets = [0, 3, 0], sizes = [8, 24, 64], strides = [1, 1, 1]} : vector<8x32x64xf32> to vector<8x24x64xf32>
    %61 = tpu.concatenate %59, %60 in 2 : vector<8x24x64xf32>, vector<8x24x64xf32> -> vector<8x24x128xf32>
    %62 = vector.shape_cast %61 : vector<8x24x128xf32> to vector<192x128xf32>
    %63 = vector.extract_strided_slice %52 {offsets = [128, 0], sizes = [128, 128], strides = [1, 1]} : vector<512x128xf32> to vector<128x128xf32>
    %cst_19 = arith.constant dense<0.000000e+00> : vector<192x128xf32>
    %64 = tpu.matmul %62, %63, %cst_19 {dimension_numbers = #tpu.dot_dimension_numbers<[1], [0], [0], [1], [0, 0, 1, 1], [], []>} : vector<192x128xf32>, vector<128x128xf32>, vector<192x128xf32> -> vector<192x128xf32>
    %65 = arith.addf %58, %64 : vector<192x128xf32>
    %66 = vector.extract_strided_slice %51 {offsets = [0, 4, 0], sizes = [8, 24, 64], strides = [1, 1, 1]} : vector<8x32x64xf32> to vector<8x24x64xf32>
    %67 = vector.extract_strided_slice %51 {offsets = [0, 5, 0], sizes = [8, 24, 64], strides = [1, 1, 1]} : vector<8x32x64xf32> to vector<8x24x64xf32>
    %68 = tpu.concatenate %66, %67 in 2 : vector<8x24x64xf32>, vector<8x24x64xf32> -> vector<8x24x128xf32>
    %69 = vector.shape_cast %68 : vector<8x24x128xf32> to vector<192x128xf32>
    %70 = vector.extract_strided_slice %52 {offsets = [256, 0], sizes = [128, 128], strides = [1, 1]} : vector<512x128xf32> to vector<128x128xf32>
    %cst_20 = arith.constant dense<0.000000e+00> : vector<192x128xf32>
    %71 = tpu.matmul %69, %70, %cst_20 {dimension_numbers = #tpu.dot_dimension_numbers<[1], [0], [0], [1], [0, 0, 1, 1], [], []>} : vector<192x128xf32>, vector<128x128xf32>, vector<192x128xf32> -> vector<192x128xf32>
    %72 = arith.addf %65, %71 : vector<192x128xf32>
    %73 = vector.extract_strided_slice %51 {offsets = [0, 6, 0], sizes = [8, 24, 64], strides = [1, 1, 1]} : vector<8x32x64xf32> to vector<8x24x64xf32>
    %74 = vector.extract_strided_slice %51 {offsets = [0, 7, 0], sizes = [8, 24, 64], strides = [1, 1, 1]} : vector<8x32x64xf32> to vector<8x24x64xf32>
    %75 = tpu.concatenate %73, %74 in 2 : vector<8x24x64xf32>, vector<8x24x64xf32> -> vector<8x24x128xf32>
    %76 = vector.shape_cast %75 : vector<8x24x128xf32> to vector<192x128xf32>
    %77 = vector.extract_strided_slice %52 {offsets = [384, 0], sizes = [128, 128], strides = [1, 1]} : vector<512x128xf32> to vector<128x128xf32>
    %cst_21 = arith.constant dense<0.000000e+00> : vector<192x128xf32>
    %78 = tpu.matmul %76, %77, %cst_21 {dimension_numbers = #tpu.dot_dimension_numbers<[1], [0], [0], [1], [0, 0, 1, 1], [], []>} : vector<192x128xf32>, vector<128x128xf32>, vector<192x128xf32> -> vector<192x128xf32>
    %79 = arith.addf %72, %78 : vector<192x128xf32>
    %c0_22 = arith.constant 0 : index
    %c0_23 = arith.constant 0 : index
    %80 = vector.load %arg7[%c0_22, %c0_23] : memref<1x128xf32, #tpu.memory_space<vmem>>, vector<1x128xf32>
    %81 = vector.broadcast %80 : vector<1x128xf32> to vector<192x128xf32>
    %82 = arith.addf %79, %81 : vector<192x128xf32>
    %cst_24 = arith.constant 0.000000e+00 : f32
    %83 = vector.broadcast %cst_24 : f32 to vector<192x128xf32>
    %84 = arith.maximumf %82, %83 : vector<192x128xf32>
    %85 = vector.shape_cast %84 : vector<192x128xf32> to vector<8x24x128xf32>
    %86 = vector.extract_strided_slice %85 {offsets = [0, 0, 0], sizes = [8, 19, 128], strides = [1, 1, 1]} : vector<8x24x128xf32> to vector<8x19x128xf32>
    %cst_25 = arith.constant dense<0xFF800000> : vector<8x128xf32>
    %87 = vector.multi_reduction <maximumf>, %86, %cst_25 [1] : vector<8x19x128xf32> to vector<8x128xf32>
    %c0_26 = arith.constant 0 : index
    %c0_27 = arith.constant 0 : index
    %88 = vector.load %arg8[%c0_26, %c0_27] : memref<8x128xf32, #tpu.memory_space<vmem>>, vector<8x128xf32>
    tpu.vector_store %arg8[%c0_26, %c0_27], %87 {strides = array<i32>} : memref<8x128xf32, #tpu.memory_space<vmem>>, vector<8x128xf32>,
    return
  }
  func.func @transform_0(%arg0: i32) -> (i32, i32, i32) {
    %c0_i32 = arith.constant 0 : i32
    %c0_i32_0 = arith.constant 0 : i32
    %c0_i32_1 = arith.constant 0 : i32
    return %arg0, %c0_i32, %c0_i32_0 : i32, i32, i32
  }
  func.func @transform_1(%arg0: i32) -> (i32, i32) {
    %c0_i32 = arith.constant 0 : i32
    %c0_i32_0 = arith.constant 0 : i32
    %c0_i32_1 = arith.constant 0 : i32
    return %c0_i32, %c0_i32_0 : i32, i32
  }
  func.func @transform_2(%arg0: i32) -> (i32, i32) {
    %c0_i32 = arith.constant 0 : i32
    %c0_i32_0 = arith.constant 0 : i32
    %c0_i32_1 = arith.constant 0 : i32
    return %c0_i32, %c0_i32_0 : i32, i32
  }
  func.func @transform_3(%arg0: i32) -> (i32, i32) {
    %c0_i32 = arith.constant 0 : i32
    %c0_i32_0 = arith.constant 0 : i32
    %c0_i32_1 = arith.constant 0 : i32
    return %c0_i32, %c0_i32_0 : i32, i32
  }
  func.func @transform_4(%arg0: i32) -> (i32, i32) {
    %c0_i32 = arith.constant 0 : i32
    %c0_i32_0 = arith.constant 0 : i32
    %c0_i32_1 = arith.constant 0 : i32
    return %c0_i32, %c0_i32_0 : i32, i32
  }
  func.func @transform_5(%arg0: i32) -> (i32, i32) {
    %c0_i32 = arith.constant 0 : i32
    %c0_i32_0 = arith.constant 0 : i32
    %c0_i32_1 = arith.constant 0 : i32
    return %c0_i32, %c0_i32_0 : i32, i32
  }
  func.func @transform_6(%arg0: i32) -> (i32, i32) {
    %c0_i32 = arith.constant 0 : i32
    %c0_i32_0 = arith.constant 0 : i32
    %c0_i32_1 = arith.constant 0 : i32
    return %c0_i32, %c0_i32_0 : i32, i32
  }
  func.func @transform_7(%arg0: i32) -> (i32, i32) {
    %c0_i32 = arith.constant 0 : i32
    %c0_i32_0 = arith.constant 0 : i32
    return %arg0, %c0_i32 : i32, i32
  }
}

</mosaic_0001>

<bundles_post_ra>
// kernel: tpu_custom_call.1
= control target key start
LH: loop header
LB: loop body
LE: loop exit
PB: predicated region body
PF: predicated region fallthrough
CT: control target
= control target key end

     0   :  { %vm94_vm0 = vcmask 785408   ;;  %s9190_s0 = inlined_call_operand.vmem [shape: f32[8,48,96], index: 0, kind: input, shape index: {}]   ;;  %s9191_s1 = inlined_call_operand.vmem [shape: f32[96,32], index: 1, kind: input, shape index: {}]   ;;  %s9192_s2 = inlined_call_operand.vmem [shape: f32[1,32], index: 2, kind: input, shape index: {}]   ;;  %s9193_s3 = inlined_call_operand.vmem [shape: f32[512,64], index: 3, kind: input, shape index: {}]   ;;  %s9194_s4 = inlined_call_operand.vmem [shape: f32[1,64], index: 4, kind: input, shape index: {}]   ;;  %s9195_s5 = inlined_call_operand.vmem [shape: f32[512,128], index: 5, kind: input, shape index: {}]   ;;  %s9196_s6 = inlined_call_operand.vmem [shape: f32[1,128], index: 6, kind: input, shape index: {}]   ;;  %s9197_s7 = inlined_call_operand.hbm [shape: f32[8,128], index: 7, kind: output, shape index: {}]  }
   0x1   :  { %v75_v0 = vld [vmem:[%s9191_s1] sm:$0xff]  ;;  %v76_v1 = vld [vmem:[%s9191_s1 + $0x8] sm:$0xff]  ;;  %v77_v2 = vld [vmem:[%s9191_s1 + $0x10] sm:$0xff] }
   0x2   :  { %v5547_v3 = vpack.c.bf16 %v76_v1, %v75_v0  ;;  %v78_v4 = vld [vmem:[%s9191_s1 + $0x18] sm:$0xff]  ;;  %v79_v6 = vld [vmem:[%s9191_s1 + $0x20] sm:$0xff]  ;;  %v80_v7 = vld [vmem:[%s9191_s1 + $0x28] sm:$0xff] }
   0x3   :  { %v5551_v5 = vpack.c.bf16 %v78_v4, %v77_v2  ;;  %v27_v8 = vld [vmem:[%s9190_s0] sm:$0xff]  ;;  %v5555_v9 = vpack.c.bf16 %v80_v7, %v79_v6  ;;  %v81_v10 = vld [vmem:[%s9191_s1 + $0x30] sm:$0xff]  ;;  %v82_v11 = vld [vmem:[%s9191_s1 + $0x38] sm:$0xff] }
   0x4   :  { %5548 = vmatprep.subr.bf16.mxu0 %v5547_v3  ;;  %4883 = vmatprep.mubr.msk.f32.mxu0 %vm94_vm0, %v27_v8  ;;  %v5559_v12 = vpack.c.bf16 %v82_v11, %v81_v10  ;;  %v83_v13 = vld [vmem:[%s9191_s1 + $0x40] sm:$0xff]  ;;  %v84_v14 = vld [vmem:[%s9191_s1 + $0x48] sm:$0xff]  ;;  %v85_v16 = vld [vmem:[%s9191_s1 + $0x50] sm:$0xff] }
   0x5   :  { %5550 = vmatpush3.bf16.msra.mxu0 %v5547_v3  ;;  %v5563_v15 = vpack.c.bf16 %v84_v14, %v83_v13  ;;  %v86_v17 = vld [vmem:[%s9191_s1 + $0x58] sm:$0xff] }
   0x6   :  { %5552 = vmatprep.subr.bf16.mxu0 %v5551_v5  ;;  %v5567_v18 = vpack.c.bf16 %v86_v17, %v85_v16 }
   0x9   :  { %5554 = vmatpush3.bf16.msra.mxu0 %v5551_v5 }
   0xa   :  { %5556 = vmatprep.subr.bf16.mxu0 %v5555_v9 }
   0xd   :  { %5558 = vmatpush3.bf16.msra.mxu0 %v5555_v9 }
   0xe   :  { %5560 = vmatprep.subr.bf16.mxu0 %v5559_v12 }
  0x11   :  { %5562 = vmatpush3.bf16.msra.mxu0 %v5559_v12 }
  0x12   :  { %5564 = vmatprep.subr.bf16.mxu0 %v5563_v15 }
  0x15   :  { %5566 = vmatpush3.bf16.msra.mxu0 %v5563_v15 }
  0x16   :  { %12 = vsyncpa [#allocation3], 0  ;;  %5568 = vmatprep.subr.bf16.mxu0 %v5567_v18  ;;  %v28_v19 = vld [vmem:[%s9190_s0 + $0x8] sm:$0xff]  ;;  %v29_v20 = vld [vmem:[%s9190_s0 + $0x10] sm:$0xff]  ;;  %vm865_vm1 = vcmask 1045504   ;;  %vm696_vm2 = vcmask 1046528  }
  0x17   :  { %v30_v21 = vld [vmem:[%s9190_s0 + $0x18] sm:$0xff]  ;;  %v31_v22 = vld [vmem:[%s9190_s0 + $0x20] sm:$0xff]  ;;  %v32_v23 = vld [vmem:[%s9190_s0 + $0x28] sm:$0xff]  ;;  %vm1034_vm3 = vcmask 1044480   ;;  %s6415_s26 = smov 64   ;;  %s6416_s27 = smov 32  }
  0x18   :  { %v33_v24 = vld [vmem:[%s9190_s0 + $0x30] sm:$0xff]  ;;  %v34_v25 = vld [vmem:[%s9190_s0 + $0x38] sm:$0xff]  ;;  %v35_v26 = vld [vmem:[%s9190_s0 + $0x40] sm:$0xff]  ;;  %s6417_s28 = smov 96   ;;  %vm1203_vm4 = vcmask 261120   ;;  %vm1236_vm5 = vcmask 523264  }
  0x19   :  { %5570 = vmatpush3.bf16.msra.mxu0 %v5567_v18  ;;  %v36_v27 = vld [vmem:[%s9190_s0 + $0x48] sm:$0xff]  ;;  %v37_v28 = vld [vmem:[%s9190_s0 + $0x50] sm:$0xff]  ;;  %v38_v29 = vld [vmem:[%s9190_s0 + $0x58] sm:$0xff]  ;;  %vm1437_vm6 = vcmask 1043456   ;;  %vm3940_vm7 = vcmask 1041408   ;;  %vm4286_vm8 = vcmask 1042432  }
  0x1a   :  { %v39_v30 = vld [vmem:[%s9190_s0 + $0x60] sm:$0xff]  ;;  %v40_v31 = vld [vmem:[%s9190_s0 + $0x68] sm:$0xff]  ;;  %v41_v32 = vld [vmem:[%s9190_s0 + $0x70] sm:$0xff]  ;;  %vm4366_vm9 = vcmask 1041409   ;;  %vm4368_vm10 = vcmask 1042434   ;;  %vm4370_vm11 = vcmask 1043459  }
  0x1b   :  { %v42_v33 = vld [vmem:[%s9190_s0 + $0x78] sm:$0xff]  ;;  %v43_v34 = vld [vmem:[%s9190_s0 + $0x80] sm:$0xff]  ;;  %v44_v35 = vld [vmem:[%s9190_s0 + $0x88] sm:$0xff]  ;;  %vm4372_vm12 = vcmask 1044484   ;;  %vm4374_vm13 = vcmask 1045509   ;;  %vm4376_vm14 = vcmask 1046534  }
  0x1c   :  { %4884 = vmatmul.mubr.msk.f32.vlgmr.msra.gmra.mrb[0].mxu0 %vm94_vm0, %v28_v19  ;;  %v45_v36 = vld [vmem:[%s9190_s0 + $0x90] sm:$0xff]  ;;  %v46_v37 = vld [vmem:[%s9190_s0 + $0x98] sm:$0xff]  ;;  %v47_v38 = vld [vmem:[%s9190_s0 + $0xa0] sm:$0xff]  ;;  %vm4378_vm15 = vcmask 1047559  }
  0x1d   :  { %4886 = vmatprep.mubr.msk.f32.mxu0 %vm94_vm0, %v29_v20  ;;  %v48_v39 = vld [vmem:[%s9190_s0 + $0xa8] sm:$0xff]  ;;  %v49_v40 = vld [vmem:[%s9190_s0 + $0xb0] sm:$0xff]  ;;  %v50_v41 = vld [vmem:[%s9190_s0 + $0xb8] sm:$0xff] }
  0x1e   :  { %v51_v42 = vld [vmem:[%s9190_s0 + $0xc0] sm:$0xff]  ;;  %v52_v43 = vld [vmem:[%s9190_s0 + $0xc8] sm:$0xff]  ;;  %v53_v44 = vld [vmem:[%s9190_s0 + $0xd0] sm:$0xff] }
  0x1f   :  { %v54_v45 = vld [vmem:[%s9190_s0 + $0xd8] sm:$0xff]  ;;  %v55_v46 = vld [vmem:[%s9190_s0 + $0xe0] sm:$0xff]  ;;  %v56_v47 = vld [vmem:[%s9190_s0 + $0xe8] sm:$0xff] }
  0x20   :  { %4887 = vmatmul.mubr.msk.f32.gmra.mrb[2].mxu0 %vm94_vm0, %v30_v21  ;;  %v57_v48 = vld [vmem:[%s9190_s0 + $0xf0] sm:$0xff]  ;;  %v58_v49 = vld [vmem:[%s9190_s0 + $0xf8] sm:$0xff]  ;;  %v59_v50 = vld [vmem:[%s9190_s0 + $0x100] sm:$0xff] }
  0x21   :  { %4889 = vmatprep.mubr.msk.f32.mxu0 %vm94_vm0, %v31_v22  ;;  %v60_v51 = vld [vmem:[%s9190_s0 + $0x108] sm:$0xff]  ;;  %v61_v52 = vld [vmem:[%s9190_s0 + $0x110] sm:$0xff]  ;;  %v62_v53 = vld [vmem:[%s9190_s0 + $0x118] sm:$0xff] }
  0x22   :  { %v63_v54 = vld [vmem:[%s9190_s0 + $0x120] sm:$0xff]  ;;  %v64_v55 = vld [vmem:[%s9190_s0 + $0x128] sm:$0xff]  ;;  %v65_v56 = vld [vmem:[%s9190_s0 + $0x130] sm:$0xff] }
  0x23   :  { %v66_v57 = vld [vmem:[%s9190_s0 + $0x138] sm:$0xff]  ;;  %v67_v58 = vld [vmem:[%s9190_s0 + $0x140] sm:$0xff]  ;;  %v68_v59 = vld [vmem:[%s9190_s0 + $0x148] sm:$0xff] }
  0x24   :  { %4890 = vmatmul.mubr.msk.f32.gmra.mrb[4].mxu0 %vm94_vm0, %v32_v23  ;;  %v69_v60 = vld [vmem:[%s9190_s0 + $0x150] sm:$0xff]  ;;  %v70_v61 = vld [vmem:[%s9190_s0 + $0x158] sm:$0xff]  ;;  %v71_v62 = vld [vmem:[%s9190_s0 + $0x160] sm:$0xff] }
  0x25   :  { %4892 = vmatprep.mubr.msk.f32.mxu0 %vm94_vm0, %v33_v24  ;;  %v72_v63 = vld [vmem:[%s9190_s0 + $0x168] sm:$0xff]  ;;  %v73_v0 = vld [vmem:[%s9190_s0 + $0x170] sm:$0xff]  ;;  %v74_v1 = vld [vmem:[%s9190_s0 + $0x178] sm:$0xff] }
  0x26   :  { %v608_v2 = vld [vmem:[%s9193_s3 + $0x80] sm:$0xff]  ;;  %v609_v3 = vld [vmem:[%s9193_s3 + $0x88] sm:$0xff]  ;;  %v610_v5 = vld [vmem:[%s9193_s3 + $0x90] sm:$0xff] }
  0x27   :  { %v5571_v4 = vpack.c.bf16 %v609_v3, %v608_v2  ;;  %v611_v6 = vld [vmem:[%s9193_s3 + $0x98] sm:$0xff]  ;;  %v612_v8 = vld [vmem:[%s9193_s3 + $0xa0] sm:$0xff]  ;;  %v613_v9 = vld [vmem:[%s9193_s3 + $0xa8] sm:$0xff] }
  0x28   :  { %4893 = vmatmul.mubr.msk.f32.gmra.mrb[6].mxu0 %vm94_vm0, %v34_v25  ;;  %v5575_v7 = vpack.c.bf16 %v611_v6, %v610_v5  ;;  %v5579_v10 = vpack.c.bf16 %v613_v9, %v612_v8  ;;  %v614_v11 = vld [vmem:[%s9193_s3 + $0xb0] sm:$0xff]  ;;  %v615_v12 = vld [vmem:[%s9193_s3 + $0xb8] sm:$0xff]  ;;  %v6714_v13 = vld [vmem:[%s9192_s2] ss:$0 sm:$0xff] }
  0x29   :  { %4895 = vmatprep.mubr.msk.f32.mxu0 %vm94_vm0, %v35_v26  ;;  %5572 = vmatprep.subr.bf16.mxu1 %v5571_v4  ;;  %v5583_v14 = vpack.c.bf16 %v615_v12, %v614_v11  ;;  %v616_v22 = vld [vmem:[%s9193_s3 + $0xc0] sm:$0xff]  ;;  %v617_v23 = vld [vmem:[%s9193_s3 + $0xc8] sm:$0xff] }
  0x2a   :  { %5574 = vmatpush3.bf16.msra.mxu1 %v5571_v4 }
  0x2b   :  { %5576 = vmatprep.subr.bf16.mxu1 %v5575_v7 }
  0x2c   :  { %4896 = vmatmul.mubr.msk.f32.gmra.mrb[8].mxu0 %vm94_vm0, %v36_v27 }
  0x2d   :  { %4898 = vmatprep.mubr.msk.f32.mxu0 %vm94_vm0, %v37_v28 }
  0x2e   :  { %5578 = vmatpush3.bf16.msra.mxu1 %v5575_v7 }
  0x2f   :  { %5580 = vmatprep.subr.bf16.mxu1 %v5579_v10 }
  0x30   :  { %4899 = vmatmul.mubr.msk.f32.gmra.mrb[10].mxu0 %vm94_vm0, %v38_v29  ;;  %v5587_v29 = vpack.c.bf16 %v617_v23, %v616_v22 }
  0x31   :  { %4901 = vmatprep.mubr.msk.f32.mxu0 %vm94_vm0, %v39_v30 }
  0x32   :  { %5582 = vmatpush3.bf16.msra.mxu1 %v5579_v10 }
  0x33   :  { %5584 = vmatprep.subr.bf16.mxu1 %v5583_v14 }
  0x34   :  { %4902 = vmatmul.mubr.msk.f32.gmra.mrb[12].mxu0 %vm94_vm0, %v40_v31 }
  0x35   :  { %4904 = vmatprep.mubr.msk.f32.mxu0 %vm94_vm0, %v41_v32 }
  0x36   :  { %5586 = vmatpush3.bf16.msra.mxu1 %v5583_v14 }
  0x37   :  { %5588 = vmatprep.subr.bf16.mxu1 %v5587_v29 }
  0x38   :  { %4905 = vmatmul.mubr.msk.f32.gmra.mrb[14].mxu0 %vm94_vm0, %v42_v33 }
  0x39   :  { %4907 = vmatprep.mubr.msk.f32.mxu0 %vm94_vm0, %v43_v34  ;;  %v618_v34 = vld [vmem:[%s9193_s3 + $0xd0] sm:$0xff] }
  0x3a   :  { %5590 = vmatpush3.bf16.msra.mxu1 %v5587_v29 }
  0x3c   :  { %4908 = vmatmul.mubr.msk.f32.gmra.mrb[16].mxu0 %vm94_vm0, %v44_v35  ;;  %v619_v35 = vld [vmem:[%s9193_s3 + $0xd8] sm:$0xff] }
  0x3d   :  { %4910 = vmatprep.mubr.msk.f32.mxu0 %vm94_vm0, %v45_v36 }
  0x40   :  { %4911 = vmatmul.mubr.msk.f32.gmra.mrb[18].mxu0 %vm94_vm0, %v46_v37 }
  0x41   :  { %4913 = vmatprep.mubr.msk.f32.mxu0 %vm94_vm0, %v47_v38 }
  0x44   :  { %4914 = vmatmul.mubr.msk.f32.gmra.mrb[20].mxu0 %vm94_vm0, %v48_v39 }
  0x45   :  { %4916 = vmatprep.mubr.msk.f32.mxu0 %vm94_vm0, %v49_v40 }
  0x48   :  { %4917 = vmatmul.mubr.msk.f32.gmra.mrb[22].mxu0 %vm94_vm0, %v50_v41 }
  0x49   :  { %4919 = vmatprep.mubr.msk.f32.mxu0 %vm94_vm0, %v51_v42 }
  0x4c   :  { %4920 = vmatmul.mubr.msk.f32.gmra.mrb[24].mxu0 %vm94_vm0, %v52_v43 }
  0x4d   :  { %4922 = vmatprep.mubr.msk.f32.mxu0 %vm94_vm0, %v53_v44 }
  0x50   :  { %4923 = vmatmul.mubr.msk.f32.gmra.mrb[26].mxu0 %vm94_vm0, %v54_v45  ;;  %v5591_v45 = vpack.c.bf16 %v619_v35, %v618_v34 }
  0x51   :  { %4925 = vmatprep.mubr.msk.f32.mxu0 %vm94_vm0, %v55_v46 }
  0x52   :  { %5592 = vmatprep.subr.bf16.mxu1 %v5591_v45 }
  0x53   :  { %5594 = vmatpush3.bf16.msra.mxu1 %v5591_v45 }
  0x54   :  { %4926 = vmatmul.mubr.msk.f32.gmra.mrb[28].mxu0 %vm94_vm0, %v56_v47 }
  0x55   :  { %4928 = vmatprep.mubr.msk.f32.mxu0 %vm94_vm0, %v57_v48 }
  0x58   :  { %4929 = vmatmul.mubr.msk.f32.gmra.mrb[30].mxu0 %vm94_vm0, %v58_v49 }
  0x59   :  { %4931 = vmatprep.mubr.msk.f32.mxu0 %vm94_vm0, %v59_v50 }
  0x5c   :  { %4932 = vmatmul.mubr.msk.f32.gmra.mrb[32].mxu0 %vm94_vm0, %v60_v51 }
  0x5d   :  { %4934 = vmatprep.mubr.msk.f32.mxu0 %vm94_vm0, %v61_v52 }
  0x60   :  { %4935 = vmatmul.mubr.msk.f32.gmra.mrb[34].mxu0 %vm94_vm0, %v62_v53 }
  0x61   :  { %4937 = vmatprep.mubr.msk.f32.mxu0 %vm94_vm0, %v63_v54 }
  0x64   :  { %4938 = vmatmul.mubr.msk.f32.gmra.mrb[36].mxu0 %vm94_vm0, %v64_v55 }
  0x65   :  { %4940 = vmatprep.mubr.msk.f32.mxu0 %vm94_vm0, %v65_v56 }
  0x68   :  { %4941 = vmatmul.mubr.msk.f32.gmra.mrb[38].mxu0 %vm94_vm0, %v66_v57 }
  0x69   :  { %4943 = vmatprep.mubr.msk.f32.mxu0 %vm94_vm0, %v67_v58 }
  0x6c   :  { %4944 = vmatmul.mubr.msk.f32.gmra.mrb[40].mxu0 %vm94_vm0, %v68_v59 }
  0x6d   :  { %4946 = vmatprep.mubr.msk.f32.mxu0 %vm94_vm0, %v69_v60 }
  0x70   :  { %4947 = vmatmul.mubr.msk.f32.gmra.mrb[42].mxu0 %vm94_vm0, %v70_v61 }
  0x71   :  { %4949 = vmatprep.mubr.msk.f32.mxu0 %vm94_vm0, %v71_v62 }
  0x74   :  { %4950 = vmatmul.mubr.msk.f32.gmra.mrb[44].mxu0 %vm94_vm0, %v72_v63 }
  0x75   :  { %4952 = vmatprep.mubr.msk.f32.mxu0 %vm94_vm0, %v73_v0 }
  0x78   :  { %4953 = vmatmul.mubr.msk.f32.gmra.mrb[46].mxu0 %vm94_vm0, %v74_v1 }
  0xef   :  { %v4885_v15 = vpop.f32.mrb[0].mxu0 }
  0xf0   :  { %v311_v16 = vadd.f32 %v4885_v15, %v6714_v13  ;;  %v305_v17 = vpop.f32.mrb[1].mxu0 }
  0xf1   :  { %v306_v18 = vadd.f32 %v6714_v13, %v305_v17 }
  0xf2   :  { %v6718_v19 = vmax.f32 %v311_v16, 0.0 }
  0xf3   :  { %v6720_v20 = vmax.f32 %v306_v18, 0.0  ;;  %v4888_v21 = vpop.f32.mrb[2].mxu0 }
  0xf4   :  { %v321_v24 = vadd.f32 %v4888_v21, %v6714_v13  ;;  %v315_v25 = vpop.f32.mrb[3].mxu0  ;;  %v867_v28 = vrot.slane %v6718_v19, 2  ;;  %v698_v33 = vrot.slane %v6718_v19, 1  ;;  %v1036_v42 = vrot.slane %v6718_v19, 3 }
  0xf5   :  { %v316_v26 = vadd.f32 %v6714_v13, %v315_v25  ;;  %v866_v27 = vrot.slane %v6720_v20, 2  ;;  %v697_v32 = vrot.slane %v6720_v20, 1  ;;  %v1035_v43 = vrot.slane %v6720_v20, 3 }
  0xf6   :  { %v6744_v36 = vmax.f32 %v321_v24, 0.0 }
  0xf7   :  { %v6732_v30 = vmax.f32 %v316_v26, 0.0  ;;  %v6734_v31 = vpop.f32.mrb[4].mxu0  ;;  %v868_v44 = vsel %vm865_vm1, %v866_v27, %v867_v28  ;;  %v699_v49 = vsel %vm696_vm2, %v697_v32, %v698_v33  ;;  %v1037_v1 = vsel %vm1034_vm3, %v1035_v43, %v1036_v42 }
  0xf8   :  { %v325_v37 = vpop.f32.mrb[5].mxu0  ;;  %v702_v51 = vrot.slane %v6744_v36, 1  ;;  %v871_v56 = vrot.slane %v6744_v36, 2  ;;  %v1040_v3 = vrot.slane %v6744_v36, 3 }
  0xf9   :  { %v1038_v38 = vrot.slane %v6732_v30, 3  ;;  %v326_v39 = vadd.f32 %v6714_v13, %v325_v37  ;;  %v869_v40 = vrot.slane %v6732_v30, 2  ;;  %v700_v41 = vrot.slane %v6732_v30, 1 }
  0xfb   :  { %v6753_v46 = vmax.f32 %v326_v39, 0.0  ;;  %v4894_v47 = vpop.f32.mrb[6].mxu0  ;;  %v870_v48 = vsel %vm865_vm1, %v867_v28, %v869_v40  ;;  %v701_v50 = vsel %vm696_vm2, %v698_v33, %v700_v41  ;;  %v1039_v59 = vsel %vm1034_vm3, %v1036_v42, %v1038_v38 }
  0xfc   :  { %v341_v52 = vadd.f32 %v4894_v47, %v6714_v13  ;;  %v335_v53 = vpop.f32.mrb[7].mxu0  ;;  %v6020_v54 = vpack.i.bf16 %v870_v48, %v868_v44  ;;  %v6015_v55 = vpack.i.bf16 %v701_v50, %v699_v49  ;;  %v6025_v6 = vpack.i.bf16 %v1039_v59, %v1037_v1 }
  0xfd   :  { %v336_v57 = vadd.f32 %v6714_v13, %v335_v53  ;;  %v6763_v58 = vrot.slane %v6753_v46, 2  ;;  %v6771_v61 = vrot.slane %v6753_v46, 1  ;;  %v6779_v2 = vrot.slane %v6753_v46, 3 }
  0xfe   :  { %v6766_v60 = vmax.f32 %v341_v52, 0.0  ;;  %6021 = vrot.lane.b32.xlu1 %v6020_v54, %s6415_s26  ;;  %6016 = vrot.lane.b32.xlu0 %v6015_v55, %s6416_s27  ;;  %v872_v9 = vsel %vm865_vm1, %v869_v40, %v871_v56  ;;  %v703_v10 = vsel %vm696_vm2, %v700_v41, %v702_v51  ;;  %v1041_v28 = vsel %vm1034_vm3, %v1038_v38, %v1040_v3 }
  0xff   :  { %v6773_v62 = vmax.f32 %v336_v57, 0.0  ;;  %v4897_v63 = vpop.f32.mrb[8].mxu0  ;;  %v874_v0 = vsel %vm865_vm1, %v871_v56, %v6763_v58  ;;  %v705_v15 = vsel %vm696_vm2, %v702_v51, %v6771_v61  ;;  %v1043_v22 = vsel %vm1034_vm3, %v1040_v3, %v6779_v2 }
 0x100   :  { %v351_v4 = vadd.f32 %v4897_v63, %v6714_v13  ;;  %v345_v5 = vpop.f32.mrb[9].mxu0  ;;  %v707_v7 = vrot.slane %v6766_v60, 1  ;;  %v876_v11 = vrot.slane %v6766_v60, 2  ;;  %v6035_v14 = vpack.i.bf16 %v874_v0, %v872_v9 }
 0x101   :  { %v346_v8 = vadd.f32 %v6714_v13, %v345_v5  ;;  %v706_v12 = vrot.slane %v6773_v62, 1  ;;  %v875_v16 = vrot.slane %v6773_v62, 2  ;;  %v6030_v24 = vpack.i.bf16 %v705_v15, %v703_v10 }
 0x102   :  { %6026 = vrot.lane.b32.xlu0 %v6025_v6, %s6417_s28  ;;  %v6793_v17 = vmax.f32 %v351_v4, 0.0  ;;  %6036 = vrot.lane.b32.xlu1 %v6035_v14, %s6415_s26  ;;  %v1045_v25 = vrot.slane %v6766_v60, 3  ;;  %v1044_v26 = vrot.slane %v6773_v62, 3  ;;  %v6040_v29 = vpack.i.bf16 %v1043_v22, %v1041_v28 }
 0x103   :  { %v6795_v18 = vmax.f32 %v346_v8, 0.0  ;;  %v6797_v21 = vpop.f32.mrb[10].mxu0  ;;  %v708_v32 = vsel %vm696_vm2, %v706_v12, %v707_v7  ;;  %v877_v37 = vsel %vm865_vm1, %v875_v16, %v876_v11 }
 0x104   :  { %v355_v23 = vpop.f32.mrb[11].mxu0  ;;  %v711_v33 = vrot.slane %v6793_v17, 1  ;;  %v6045_v41 = vpack.i.bf16 %v708_v32, %v6771_v61  ;;  %v880_v38 = vrot.slane %v6793_v17, 2  ;;  %v1046_v43 = vsel %vm1034_vm3, %v1044_v26, %v1045_v25 }
 0x105   :  { %v356_v27 = vadd.f32 %v6714_v13, %v355_v23  ;;  %v709_v34 = vrot.slane %v6795_v18, 1  ;;  %v878_v39 = vrot.slane %v6795_v18, 2  ;;  %v6050_v47 = vpack.i.bf16 %v877_v37, %v6763_v58 }
 0x106   :  { %6031 = vrot.lane.b32.xlu0 %v6030_v24, %s6416_s27  ;;  %6041 = vrot.lane.b32.xlu1 %v6040_v29, %s6417_s28  ;;  %v1049_v48 = vrot.slane %v6793_v17, 3  ;;  %v1047_v49 = vrot.slane %v6795_v18, 3  ;;  %v6055_v54 = vpack.i.bf16 %v1046_v43, %v6779_v2 }
 0x107   :  { %v4903_v35 = vpop.f32.mrb[12].mxu0  ;;  %v6815_v42 = vmax.f32 %v356_v27, 0.0  ;;  %v710_v51 = vsel %vm696_vm2, %v707_v7, %v709_v34  ;;  %v712_v52 = vsel %vm696_vm2, %v709_v34, %v711_v33  ;;  %v879_v55 = vsel %vm865_vm1, %v876_v11, %v878_v39 }
 0x108   :  { %v365_v40 = vpop.f32.mrb[13].mxu0  ;;  %v371_v44 = vadd.f32 %v4903_v35, %v6714_v13  ;;  %v881_v59 = vsel %vm865_vm1, %v878_v39, %v880_v38  ;;  %v6060_v3 = vpack.i.bf16 %v712_v52, %v710_v51  ;;  %v1048_v6 = vsel %vm1034_vm3, %v1045_v25, %v1047_v49 }
 0x109   :  { %v366_v45 = vadd.f32 %v6714_v13, %v365_v40  ;;  %v6833_v63 = vrot.slane %v6815_v42, 1  ;;  %v1050_v7 = vsel %vm1034_vm3, %v1047_v49, %v1049_v48  ;;  %v6847_v8 = vrot.slane %v6815_v42, 2 }
 0x10a   :  { %6046 = vrot.lane.b32.xlu0 %v6045_v41, %s6416_s27  ;;  %6051 = vrot.lane.b32.xlu1 %v6050_v47, %s6415_s26  ;;  %v6835_v0 = vmax.f32 %v371_v44, 0.0  ;;  %v6065_v10 = vpack.i.bf16 %v881_v59, %v879_v55  ;;  %v6856_v15 = vrot.slane %v6815_v42, 3  ;;  %v6070_v23 = vpack.i.bf16 %v1050_v7, %v1048_v6 }
 0x10b   :  { %v4906_v50 = vpop.f32.mrb[14].mxu0  ;;  %v6837_v1 = vmax.f32 %v366_v45, 0.0  ;;  %v714_v14 = vsel %vm696_vm2, %v711_v33, %v6833_v63  ;;  %v883_v27 = vsel %vm865_vm1, %v880_v38, %v6847_v8 }
 0x10c   :  { %v375_v53 = vpop.f32.mrb[15].mxu0  ;;  %v381_v56 = vadd.f32 %v4906_v50, %v6714_v13  ;;  %9295 = vst [vmem:[#allocation5_spill] sm:$0xff] %v6835_v0  ;;  %v716_v16 = vrot.slane %v6835_v0, 1  ;;  %v6075_v29 = vpack.i.bf16 %v6833_v63, %v714_v14  ;;  %v1052_v33 = vsel %vm1034_vm3, %v1049_v48, %v6856_v15 }
 0x10d   :  { %v376_v57 = vadd.f32 %v6714_v13, %v375_v53  ;;  %9296 = vst [vmem:[#allocation6_spill] sm:$0xff] %v6837_v1  ;;  %v715_v22 = vrot.slane %v6837_v1, 1  ;;  %v885_v35 = vrot.slane %v6835_v0, 2  ;;  %v884_v37 = vrot.slane %v6837_v1, 2 }
 0x10e   :  { %6056 = vrot.lane.b32.xlu0 %v6055_v54, %s6417_s28  ;;  %6061 = vrot.lane.b32.xlu1 %v6060_v3, %s6416_s27  ;;  %v6850_v11 = vmax.f32 %v381_v56, 0.0  ;;  %v6080_v39 = vpack.i.bf16 %v6847_v8, %v883_v27  ;;  %v6085_v48 = vpack.i.bf16 %v6856_v15, %v1052_v33  ;;  %v1054_v53 = vrot.slane %v6835_v0, 3 }
 0x10f   :  { %v6840_v4 = vmax.f32 %v376_v57, 0.0  ;;  %v6842_v5 = vpop.f32.mrb[16].mxu0  ;;  %v717_v40 = vsel %vm696_vm2, %v715_v22, %v716_v16  ;;  %v1053_v54 = vrot.slane %v6837_v1, 3  ;;  %v886_v3 = vsel %vm865_vm1, %v884_v37, %v885_v35 }
 0x110   :  { %v385_v9 = vpop.f32.mrb[17].mxu0  ;;  %9298 = vst [vmem:[#allocation8_spill] sm:$0xff] %v6850_v11  ;;  %v720_v32 = vrot.slane %v6850_v11, 1  ;;  %v889_v47 = vrot.slane %v6850_v11, 2 }
 0x111   :  { %9297 = vst [vmem:[#allocation7_spill] sm:$0xff] %v6840_v4  ;;  %v386_v12 = vadd.f32 %v6714_v13, %v385_v9  ;;  %v718_v24 = vrot.slane %v6840_v4, 1  ;;  %v887_v41 = vrot.slane %v6840_v4, 2  ;;  %v1056_v55 = vrot.slane %v6840_v4, 3 }
 0x112   :  { %6066 = vrot.lane.b32.xlu0 %v6065_v10, %s6415_s26  ;;  %6071 = vrot.lane.b32.xlu1 %v6070_v23, %s6417_s28  ;;  %v1058_v9 = vrot.slane %v6850_v11, 3 }
 0x113   :  { %v6862_v25 = vmax.f32 %v386_v12, 0.0  ;;  %v4912_v26 = vpop.f32.mrb[18].mxu0  ;;  %v719_v44 = vsel %vm696_vm2, %v716_v16, %v718_v24  ;;  %v721_v50 = vsel %vm696_vm2, %v718_v24, %v720_v32  ;;  %v888_v6 = vsel %vm865_vm1, %v885_v35, %v887_v41 }
 0x114   :  { %v395_v28 = vpop.f32.mrb[19].mxu0  ;;  %v401_v38 = vadd.f32 %v4912_v26, %v6714_v13  ;;  %v6090_v56 = vpack.i.bf16 %v719_v44, %v717_v40  ;;  %v890_v14 = vsel %vm865_vm1, %v887_v41, %v889_v47  ;;  %v6095_v26 = vpack.i.bf16 %v888_v6, %v886_v3 }
 0x115   :  { %9299 = vst [vmem:[#allocation9_spill] sm:$0xff] %v6862_v25  ;;  %v6872_v34 = vrot.slane %v6862_v25, 1  ;;  %v396_v43 = vadd.f32 %v6714_v13, %v395_v28  ;;  %v6890_v52 = vrot.slane %v6862_v25, 2  ;;  %v6912_v24 = vrot.slane %v6862_v25, 3 }
 0x116   :  { %6076 = vrot.lane.b32.xlu0 %v6075_v29, %s6416_s27  ;;  %6081 = vrot.lane.b32.xlu1 %v6080_v39, %s6415_s26  ;;  %v6896_v57 = vmax.f32 %v401_v38, 0.0  ;;  %v1055_v29 = vsel %vm1034_vm3, %v1053_v54, %v1054_v53  ;;  %v1059_v40 = vsel %vm1034_vm3, %v1056_v55, %v1058_v9 }
 0x117   :  { %v4915_v45 = vpop.f32.mrb[20].mxu0  ;;  %v723_v51 = vsel %vm696_vm2, %v720_v32, %v6872_v34  ;;  %v6898_v59 = vmax.f32 %v396_v43, 0.0  ;;  %v892_v23 = vsel %vm865_vm1, %v889_v47, %v6890_v52  ;;  %v1057_v32 = vsel %vm1034_vm3, %v1054_v53, %v1056_v55 }
 0x118   :  { %v405_v49 = vpop.f32.mrb[21].mxu0  ;;  %9300 = vst [vmem:[#allocation10_spill] sm:$0xff] %v6896_v57  ;;  %v6105_v10 = vpack.i.bf16 %v723_v51, %v721_v50  ;;  %v411_v16 = vadd.f32 %v4915_v45, %v6714_v13  ;;  %v725_v27 = vrot.slane %v6896_v57, 1  ;;  %v894_v35 = vrot.slane %v6896_v57, 2 }
 0x119   :  { %9301 = vst [vmem:[#allocation11_spill] sm:$0xff] %v6898_v59  ;;  %v406_v22 = vadd.f32 %v6714_v13, %v405_v49  ;;  %v724_v28 = vrot.slane %v6898_v59, 1  ;;  %v6110_v37 = vpack.i.bf16 %v892_v23, %v890_v14  ;;  %v893_v41 = vrot.slane %v6898_v59, 2  ;;  %v621_v23 = vld [vmem:[%s9193_s3 + $0xe8] sm:$0xff] }
 0x11a   :  { %6086 = vrot.lane.b32.xlu0 %v6085_v48, %s6417_s28  ;;  %6091 = vrot.lane.b32.xlu1 %v6090_v56, %s6416_s27  ;;  %v6923_v38 = vmax.f32 %v411_v16, 0.0  ;;  %v1061_v44 = vsel %vm1034_vm3, %v1058_v9, %v6912_v24  ;;  %v6100_v45 = vpack.i.bf16 %v1057_v32, %v1055_v29  ;;  %v1063_v47 = vrot.slane %v6896_v57, 3 }
 0x11b   :  { %v6902_v7 = vpop.f32.mrb[22].mxu0  ;;  %v6925_v43 = vmax.f32 %v406_v22, 0.0  ;;  %v1062_v48 = vrot.slane %v6898_v59, 3  ;;  %v726_v50 = vsel %vm696_vm2, %v724_v28, %v725_v27  ;;  %v6115_v53 = vpack.i.bf16 %v1061_v44, %v1059_v40  ;;  %v620_v22 = vld [vmem:[%s9193_s3 + $0xe0] sm:$0xff] }
 0x11c   :  { %v415_v12 = vpop.f32.mrb[23].mxu0  ;;  %9302 = vst [vmem:[#allocation12_spill] sm:$0xff] %v6923_v38  ;;  %v729_v55 = vrot.slane %v6923_v38, 1  ;;  %v895_v3 = vsel %vm865_vm1, %v893_v41, %v894_v35  ;;  %v6120_v9 = vpack.i.bf16 %v726_v50, %v6872_v34 }
 0x11d   :  { %9303 = vst [vmem:[#allocation13_spill] sm:$0xff] %v6925_v43  ;;  %v416_v49 = vadd.f32 %v6714_v13, %v415_v12  ;;  %v727_v56 = vrot.slane %v6925_v43, 1  ;;  %v896_v6 = vrot.slane %v6925_v43, 2  ;;  %v1064_v14 = vsel %vm1034_vm3, %v1062_v48, %v1063_v47 }
 0x11e   :  { %6106 = vrot.lane.b32.xlu0 %v6105_v10, %s6416_s27  ;;  %6096 = vrot.lane.b32.xlu1 %v6095_v26, %s6415_s26  ;;  %v898_v10 = vrot.slane %v6923_v38, 2  ;;  %v1067_v26 = vrot.slane %v6923_v38, 3  ;;  %v6125_v32 = vpack.i.bf16 %v895_v3, %v6890_v52  ;;  %v1065_v40 = vrot.slane %v6925_v43, 3 }
 0x11f   :  { %v4921_v33 = vpop.f32.mrb[24].mxu0  ;;  %v6942_v12 = vmax.f32 %v416_v49, 0.0  ;;  %v728_v44 = vsel %vm696_vm2, %v725_v27, %v727_v56  ;;  %v6130_v48 = vpack.i.bf16 %v1064_v14, %v6912_v24 }
 0x120   :  { %v425_v39 = vpop.f32.mrb[25].mxu0  ;;  %v431_v28 = vadd.f32 %v4921_v33, %v6714_v13  ;;  %v897_v33 = vsel %vm865_vm1, %v894_v35, %v896_v6  ;;  %v899_v3 = vsel %vm865_vm1, %v896_v6, %v898_v10 }
 0x121   :  { %9304 = vst [vmem:[#allocation14_spill] sm:$0xff] %v6942_v12  ;;  %v426_v29 = vadd.f32 %v6714_v13, %v425_v39  ;;  %v5595_v39 = vpack.c.bf16 %v621_v23, %v620_v22  ;;  %v1068_v22 = vsel %vm1034_vm3, %v1065_v40, %v1067_v26  ;;  %v6981_v23 = vrot.slane %v6942_v12, 2 }
 0x122   :  { %6111 = vrot.lane.b32.xlu0 %v6110_v37, %s6415_s26  ;;  %6101 = vrot.lane.b32.xlu1 %v6100_v45, %s6417_s28  ;;  %v730_v45 = vsel %vm696_vm2, %v727_v56, %v729_v55  ;;  %v6971_v27 = vmax.f32 %v431_v28, 0.0  ;;  %v6140_v6 = vpack.i.bf16 %v899_v3, %v897_v33 }
 0x123   :  { %v4924_v51 = vpop.f32.mrb[26].mxu0  ;;  %v6973_v56 = vmax.f32 %v426_v29, 0.0  ;;  %5596 = vmatprep.subr.bf16.mxu1 %v5595_v39  ;;  %v901_v33 = vsel %vm865_vm1, %v898_v10, %v6981_v23 }
 0x124   :  { %v435_v54 = vpop.f32.mrb[27].mxu0  ;;  %v441_v49 = vadd.f32 %v4924_v51, %v6714_v13  ;;  %9305 = vst [vmem:[#allocation15_spill] sm:$0xff] %v6971_v27  ;;  %v1066_v51 = vsel %vm1034_vm3, %v1063_v47, %v1065_v40  ;;  %5598 = vmatpush3.bf16.msra.mxu1 %v5595_v39  ;;  %v734_v40 = vrot.slane %v6971_v27, 1  ;;  %v6155_v10 = vpack.i.bf16 %v6981_v23, %v901_v33 }
 0x125   :  { %v436_v41 = vadd.f32 %v6714_v13, %v435_v54  ;;  %v6969_v54 = vrot.slane %v6942_v12, 1  ;;  %9306 = vst [vmem:[#allocation16_spill] sm:$0xff] %v6973_v56 }
 0x126   :  { %6116 = vrot.lane.b32.xlu0 %v6115_v53, %s6417_s28  ;;  %6121 = vrot.lane.b32.xlu1 %v6120_v9, %s6416_s27  ;;  %v6135_v9 = vpack.i.bf16 %v730_v45, %v728_v44  ;;  %v6984_v28 = vmax.f32 %v441_v49, 0.0  ;;  %v6145_v44 = vpack.i.bf16 %v1068_v22, %v1066_v51  ;;  %v902_v51 = vrot.slane %v6973_v56, 2 }
 0x127   :  { %v6945_v16 = vpop.f32.mrb[28].mxu0  ;;  %v6976_v35 = vmax.f32 %v436_v41, 0.0  ;;  %v733_v41 = vrot.slane %v6973_v56, 1 }
 0x128   :  { %v445_v37 = vpop.f32.mrb[29].mxu0  ;;  %9308 = vst [vmem:[#allocation18_spill] sm:$0xff] %v6984_v28  ;;  %v1076_v4 = vrot.slane %v6984_v28, 3 }
 0x129   :  { %v446_v50 = vadd.f32 %v6714_v13, %v445_v37  ;;  %9307 = vst [vmem:[#allocation17_spill] sm:$0xff] %v6976_v35  ;;  %v6991_v37 = vrot.slane %v6942_v12, 3  ;;  %v735_v22 = vsel %vm696_vm2, %v733_v41, %v734_v40  ;;  %v907_v12 = vrot.slane %v6984_v28, 2 }
 0x12a   :  { %6126 = vrot.lane.b32.xlu0 %v6125_v32, %s6415_s26  ;;  %6131 = vrot.lane.b32.xlu1 %v6130_v48, %s6417_s28  ;;  %v732_v32 = vsel %vm696_vm2, %v729_v55, %v6969_v54  ;;  %v736_v48 = vrot.slane %v6976_v35, 1  ;;  %v738_v55 = vrot.slane %v6984_v28, 1 }
 0x12b   :  { %v4930_v53 = vpop.f32.mrb[30].mxu0  ;;  %v6986_v29 = vmax.f32 %v446_v50, 0.0  ;;  %v6150_v39 = vpack.i.bf16 %v6969_v54, %v732_v32  ;;  %v1070_v49 = vsel %vm1034_vm3, %v1067_v26, %v6991_v37  ;;  %v905_v32 = vrot.slane %v6976_v35, 2 }
 0x12c   :  { %v455_v14 = vpop.f32.mrb[31].mxu0  ;;  %v461_v26 = vadd.f32 %v4930_v53, %v6714_v13  ;;  %v737_v38 = vsel %vm696_vm2, %v734_v40, %v736_v48  ;;  %v6160_v57 = vpack.i.bf16 %v6991_v37, %v1070_v49  ;;  %v1072_v53 = vrot.slane %v6971_v27, 3 }
 0x12d   :  { %9309 = vst [vmem:[#allocation19_spill] sm:$0xff] %v6986_v29  ;;  %v7005_v50 = vrot.slane %v6986_v29, 1  ;;  %v7025_v33 = vrot.slane %v6986_v29, 2  ;;  %v1074_v40 = vrot.slane %v6976_v35, 3  ;;  %v6165_v49 = vpack.i.bf16 %v737_v38, %v735_v22 }
 0x12e   :  { %6136 = vrot.lane.b32.xlu0 %v6135_v9, %s6416_s27  ;;  %6141 = vrot.lane.b32.xlu1 %v6140_v6, %s6415_s26  ;;  %v903_v9 = vrot.slane %v6971_v27, 2  ;;  %v7045_v22 = vrot.slane %v6986_v29, 3 }
 0x12f   :  { %v4933_v47 = vpop.f32.mrb[32].mxu0  ;;  %9310 = vst [vmem:[#allocation20_spill] sm:$0xff] %v7005_v50  ;;  %v741_v41 = vsel %vm696_vm2, %v738_v55, %v7005_v50  ;;  %9311 = vst [vmem:[#allocation21_spill] sm:$0xff] %v7025_v33  ;;  %v910_v38 = vsel %vm865_vm1, %v907_v12, %v7025_v33 }
 0x130   :  { %v465_v45 = vpop.f32.mrb[33].mxu0  ;;  %v906_v25 = vsel %vm865_vm1, %v903_v9, %v905_v32  ;;  %v471_v35 = vadd.f32 %v4933_v47, %v6714_v13  ;;  %9314 = vst [vmem:[#allocation24_spill] sm:$0xff] %v7045_v22  ;;  %v1075_v47 = vsel %vm1034_vm3, %v1072_v53, %v1074_v40 }
 0x132   :  { %6146 = vrot.lane.b32.xlu0 %v6145_v44, %s6417_s28  ;;  %6151 = vrot.lane.b32.xlu1 %v6150_v39, %s6416_s27  ;;  %v456_v44 = vadd.f32 %v6714_v13, %v455_v14  ;;  %v739_v39 = vsel %vm696_vm2, %v736_v48, %v738_v55  ;;  %v1071_v14 = vrot.slane %v6973_v56, 3  ;;  %v904_v55 = vsel %vm865_vm1, %v902_v51, %v903_v9 }
 0x133   :  { %v7007_v3 = vpop.f32.mrb[34].mxu0  ;;  %v6180_v11 = vpack.i.bf16 %v741_v41, %v739_v39  ;;  %v908_v56 = vsel %vm865_vm1, %v905_v32, %v907_v12  ;;  %v6170_v9 = vpack.i.bf16 %v906_v25, %v904_v55  ;;  %v1077_v12 = vsel %vm1034_vm3, %v1074_v40, %v1076_v4 }
 0x134   :  { %v475_v6 = vpop.f32.mrb[35].mxu0  ;;  %v7033_v48 = vmax.f32 %v456_v44, 0.0  ;;  %v1073_v32 = vsel %vm1034_vm3, %v1071_v14, %v1072_v53  ;;  %v6185_v41 = vpack.i.bf16 %v910_v38, %v908_v56  ;;  %v1079_v55 = vsel %vm1034_vm3, %v1076_v4, %v7045_v22 }
 0x135   :  { %v6175_v53 = vpack.i.bf16 %v1075_v47, %v1073_v32  ;;  %v476_v40 = vadd.f32 %v6714_v13, %v475_v6 }
 0x136   :  { %6156 = vrot.lane.b32.xlu0 %v6155_v10, %s6415_s26  ;;  %6161 = vrot.lane.b32.xlu1 %v6160_v57, %s6417_s28  ;;  %v7031_v10 = vmax.f32 %v461_v26, 0.0  ;;  %9313 = vst [vmem:[#allocation23_spill] sm:$0xff] %v7033_v48  ;;  %v466_v57 = vadd.f32 %v6714_v13, %v465_v45  ;;  %v742_v39 = vrot.slane %v7033_v48, 1  ;;  %v1080_v38 = vrot.slane %v7033_v48, 3 }
 0x137   :  { %v4939_v43 = vpop.f32.mrb[36].mxu0 }
 0x138   :  { %v485_v59 = vpop.f32.mrb[37].mxu0  ;;  %9312 = vst [vmem:[#allocation22_spill] sm:$0xff] %v7031_v10  ;;  %v743_v44 = vrot.slane %v7031_v10, 1  ;;  %v912_v45 = vrot.slane %v7031_v10, 2  ;;  %v7058_v25 = vmax.f32 %v466_v57, 0.0  ;;  %v1081_v56 = vrot.slane %v7031_v10, 3 }
 0x13a   :  { %6166 = vrot.lane.b32.xlu0 %v6165_v49, %s6416_s27  ;;  %6181 = vrot.lane.b32.xlu1 %v6180_v11, %s6416_s27  ;;  %v911_v49 = vrot.slane %v7033_v48, 2  ;;  %v7056_v11 = vmax.f32 %v471_v35, 0.0  ;;  %9316 = vst [vmem:[#allocation26_spill] sm:$0xff] %v7058_v25  ;;  %v744_v35 = vsel %vm696_vm2, %v742_v39, %v743_v44  ;;  %v745_v4 = vrot.slane %v7058_v25, 1 }
 0x13b   :  { %v4942_v51 = vpop.f32.mrb[38].mxu0  ;;  %v914_v32 = vrot.slane %v7058_v25, 2  ;;  %v6195_v47 = vpack.i.bf16 %v744_v35, %v7005_v50  ;;  %v7077_v39 = vmax.f32 %v476_v40, 0.0 }
 0x13c   :  { %v495_v26 = vpop.f32.mrb[39].mxu0  ;;  %9315 = vst [vmem:[#allocation25_spill] sm:$0xff] %v7056_v11  ;;  %v747_v57 = vrot.slane %v7056_v11, 1  ;;  %v913_v28 = vsel %vm865_vm1, %v911_v49, %v912_v45  ;;  %v916_v6 = vrot.slane %v7056_v11, 2  ;;  %v486_v49 = vadd.f32 %v6714_v13, %v485_v59 }
 0x13d   :  { %9317 = vst [vmem:[#allocation27_spill] sm:$0xff] %v7077_v39  ;;  %v6200_v48 = vpack.i.bf16 %v913_v28, %v7025_v33  ;;  %v496_v35 = vadd.f32 %v6714_v13, %v495_v26  ;;  %v746_v27 = vsel %vm696_vm2, %v743_v44, %v745_v4  ;;  %v915_v59 = vsel %vm865_vm1, %v912_v45, %v914_v32 }
 0x13e   :  { %6171 = vrot.lane.b32.xlu0 %v6170_v9, %s6415_s26  ;;  %6186 = vrot.lane.b32.xlu1 %v6185_v41, %s6415_s26  ;;  %v6190_v9 = vpack.i.bf16 %v1079_v55, %v1077_v12  ;;  %v1082_v12 = vsel %vm1034_vm3, %v1080_v38, %v1081_v56  ;;  %v1085_v55 = vrot.slane %v7056_v11, 3  ;;  %v748_v40 = vsel %vm696_vm2, %v745_v4, %v747_v57 }
 0x13f   :  { %v7062_v29 = vpop.f32.mrb[40].mxu0  ;;  %v501_v28 = vadd.f32 %v4942_v51, %v6714_v13  ;;  %v917_v26 = vsel %vm865_vm1, %v914_v32, %v916_v6  ;;  %v7100_v44 = vrot.slane %v7077_v39, 1  ;;  %v7104_v11 = vmax.f32 %v486_v49, 0.0 }
 0x140   :  { %v505_v14 = vpop.f32.mrb[41].mxu0 }
 0x141   :  { %9318 = vst [vmem:[#allocation28_spill] sm:$0xff] %v7100_v44  ;;  %9319 = vst [vmem:[#allocation29_spill] sm:$0xff] %v7104_v11  ;;  %v7119_v49 = vmax.f32 %v501_v28, 0.0 }
 0x142   :  { %6176 = vrot.lane.b32.xlu0 %v6175_v53, %s6417_s28  ;;  %6191 = vrot.lane.b32.xlu1 %v6190_v9, %s6417_s28  ;;  %v491_v53 = vadd.f32 %v4939_v43, %v6714_v13  ;;  %v1083_v9 = vrot.slane %v7058_v25, 3  ;;  %v6205_v43 = vpack.i.bf16 %v1082_v12, %v7045_v22  ;;  %v7107_v12 = vmax.f32 %v496_v35, 0.0 }
 0x143   :  { %v4948_v41 = vpop.f32.mrb[42].mxu0  ;;  %v750_v35 = vsel %vm696_vm2, %v747_v57, %v7100_v44  ;;  %v623_v57 = vld [vmem:[%s9193_s3 + $0xf8] sm:$0xff]  ;;  %v925_v33 = vrot.slane %v7119_v49, 2 }
 0x144   :  { %v515_v10 = vpop.f32.mrb[43].mxu0  ;;  %v7102_v4 = vmax.f32 %v491_v53, 0.0  ;;  %9320 = vst [vmem:[#allocation30_spill] sm:$0xff] %v7107_v12  ;;  %v1084_v45 = vsel %vm1034_vm3, %v1081_v56, %v1083_v9  ;;  %v1086_v51 = vsel %vm1034_vm3, %v1083_v9, %v1085_v55  ;;  %v6215_v53 = vpack.i.bf16 %v917_v26, %v915_v59 }
 0x145   :  { %v7126_v56 = vrot.slane %v7077_v39, 3  ;;  %v754_v59 = vrot.slane %v7107_v12, 1  ;;  %v6225_v26 = vpack.i.bf16 %v7100_v44, %v750_v35  ;;  %v923_v35 = vrot.slane %v7107_v12, 2 }
 0x146   :  { %6196 = vrot.lane.b32.xlu0 %v6195_v47, %s6416_s27  ;;  %6201 = vrot.lane.b32.xlu1 %v6200_v48, %s6415_s26  ;;  %v506_v47 = vadd.f32 %v6714_v13, %v505_v14  ;;  %v6210_v48 = vpack.i.bf16 %v748_v40, %v746_v27  ;;  %v7112_v14 = vrot.slane %v7077_v39, 2  ;;  %v752_v9 = vrot.slane %v7102_v4, 1 }
 0x147   :  { %v7089_v1 = vpop.f32.mrb[44].mxu0  ;;  %v751_v40 = vrot.slane %v7104_v11, 1  ;;  %v521_v22 = vadd.f32 %v4948_v41, %v6714_v13  ;;  %v516_v44 = vadd.f32 %v6714_v13, %v515_v10  ;;  %v1090_v10 = vrot.slane %v7102_v4, 3 }
 0x148   :  { %v7094_v38 = vpop.f32.mrb[45].mxu0  ;;  %v7121_v27 = vmax.f32 %v506_v47, 0.0  ;;  %v919_v28 = vsel %vm865_vm1, %v916_v6, %v7112_v14  ;;  %v622_v47 = vld [vmem:[%s9193_s3 + $0xf0] sm:$0xff]  ;;  %v1089_v41 = vrot.slane %v7104_v11, 3 }
 0x149   :  { %v6230_v39 = vpack.i.bf16 %v7112_v14, %v919_v28  ;;  %v5599_v0 = vpack.c.bf16 %v623_v57, %v622_v47 }
 0x14a   :  { %6206 = vrot.lane.b32.xlu0 %v6205_v43, %s6417_s28  ;;  %6211 = vrot.lane.b32.xlu1 %v6210_v48, %s6416_s27  ;;  %9321 = vst [vmem:[#allocation31_spill] sm:$0xff] %v7121_v27  ;;  %v6220_v43 = vpack.i.bf16 %v1086_v51, %v1084_v45  ;;  %v921_v48 = vrot.slane %v7102_v4, 2  ;;  %v756_v45 = vrot.slane %v7119_v49, 1  ;;  %v1088_v51 = vsel %vm1034_vm3, %v1085_v55, %v7126_v56 }
 0x14b   :  { %v7114_v32 = vpop.f32.mrb[46].mxu0  ;;  %v7147_v6 = vrot.slane %v7121_v27, 1  ;;  %v755_v55 = vsel %vm696_vm2, %v752_v9, %v754_v59  ;;  %v6235_v50 = vpack.i.bf16 %v7126_v56, %v1088_v51  ;;  %5600 = vmatprep.subr.bf16.mxu1 %v5599_v0  ;;  %v7164_v47 = vrot.slane %v7121_v27, 2 }
 0x14c   :  { %v7117_v25 = vpop.f32.mrb[47].mxu0  ;;  %v757_v28 = vsel %vm696_vm2, %v754_v59, %v756_v45  ;;  %5602 = vmatpush3.bf16.msra.mxu1 %v5599_v0  ;;  %v1094_v51 = vrot.slane %v7119_v49, 3 }
 0x14e   :  { %6216 = vrot.lane.b32.xlu0 %v6215_v53, %s6415_s26  ;;  %6221 = vrot.lane.b32.xlu1 %v6220_v43, %s6417_s28  ;;  %v920_v53 = vrot.slane %v7104_v11, 2  ;;  %v753_v43 = vsel %vm696_vm2, %v751_v40, %v752_v9  ;;  %v759_v40 = vsel %vm696_vm2, %v756_v45, %v7147_v6  ;;  %v1092_v9 = vrot.slane %v7107_v12, 3 }
 0x14f   :  { %v6240_v57 = vpack.i.bf16 %v755_v55, %v753_v43  ;;  %v924_v45 = vsel %vm865_vm1, %v921_v48, %v923_v35  ;;  %v6255_v0 = vpack.i.bf16 %v759_v40, %v757_v28  ;;  %v926_v11 = vsel %vm865_vm1, %v923_v35, %v925_v33 }
 0x150   :  { %v922_v59 = vsel %vm865_vm1, %v920_v53, %v921_v48  ;;  %v531_v43 = vadd.f32 %v7089_v1, %v6714_v13  ;;  %v1091_v35 = vsel %vm1034_vm3, %v1089_v41, %v1090_v10  ;;  %v1093_v1 = vsel %vm1034_vm3, %v1090_v10, %v1092_v9 }
 0x151   :  { %v6245_v48 = vpack.i.bf16 %v924_v45, %v922_v59 }
 0x152   :  { %6226 = vrot.lane.b32.xlu0 %v6225_v26, %s6416_s27  ;;  %6231 = vrot.lane.b32.xlu1 %v6230_v39, %s6415_s26  ;;  %v7170_v39 = vmax.f32 %v521_v22, 0.0  ;;  %v7172_v26 = vmax.f32 %v516_v44, 0.0  ;;  %v928_v22 = vsel %vm865_vm1, %v925_v33, %v7164_v47  ;;  %v7186_v44 = vrot.slane %v7121_v27, 3  ;;  %v593_v33 = vld [vmem:[%s9193_s3 + $0x8] sm:$0xff] }
 0x153   :  { %v6260_v40 = vpack.i.bf16 %v928_v22, %v926_v11  ;;  %v7203_v41 = vmax.f32 %v531_v43, 0.0 }
 0x154   :  { %v761_v53 = vrot.slane %v7170_v39, 1  ;;  %v760_v55 = vrot.slane %v7172_v26, 1  ;;  %v930_v28 = vrot.slane %v7170_v39, 2  ;;  %v929_v59 = vrot.slane %v7172_v26, 2 }
 0x155   :  { %v1097_v45 = vsel %vm1034_vm3, %v1094_v51, %v7186_v44  ;;  %v1099_v12 = vrot.slane %v7170_v39, 3  ;;  %v1098_v11 = vrot.slane %v7172_v26, 3 }
 0x156   :  { %6236 = vrot.lane.b32.xlu0 %v6235_v50, %s6417_s28  ;;  %6241 = vrot.lane.b32.xlu1 %v6240_v57, %s6416_s27  ;;  %v526_v50 = vadd.f32 %v6714_v13, %v7094_v38  ;;  %v592_v38 = vld [vmem:[%s9193_s3] sm:$0xff]  ;;  %v1095_v57 = vsel %vm1034_vm3, %v1092_v9, %v1094_v51  ;;  %v536_v9 = vadd.f32 %v6714_v13, %v7117_v25  ;;  %v765_v51 = vrot.slane %v7203_v41, 1 }
 0x157   :  { %v7210_v27 = vpack.c.bf16 %v593_v33, %v592_v38  ;;  %v762_v43 = vsel %vm696_vm2, %v760_v55, %v761_v53  ;;  %v1100_v38 = vsel %vm1034_vm3, %v1098_v11, %v1099_v12 }
 0x158   :  { %v7205_v10 = vmax.f32 %v526_v50, 0.0  ;;  %v6265_v50 = vpack.i.bf16 %v1097_v45, %v1095_v57  ;;  %v7226_v55 = vmax.f32 %v536_v9, 0.0 }
 0x159   :  { %5604 = vmatprep.subr.bf16.mxu1 %v7210_v27 }
 0x15a   :  { %6256 = vrot.lane.b32.xlu0 %v6255_v0, %s6416_s27  ;;  %6246 = vrot.lane.b32.xlu1 %v6245_v48, %s6415_s26  ;;  %v6250_v0 = vpack.i.bf16 %v1093_v1, %v1091_v35  ;;  %v763_v22 = vrot.slane %v7205_v10, 1  ;;  %v931_v48 = vsel %vm865_vm1, %v929_v59, %v930_v28  ;;  %v6270_v35 = vpack.i.bf16 %v762_v43, %v7147_v6 }
 0x15b   :  { %v934_v1 = vrot.slane %v7203_v41, 2  ;;  %v932_v25 = vrot.slane %v7205_v10, 2  ;;  %v6275_v33 = vpack.i.bf16 %v931_v48, %v7164_v47  ;;  %v1101_v57 = vrot.slane %v7205_v10, 3 }
 0x15c   :  { %v764_v59 = vsel %vm696_vm2, %v761_v53, %v763_v22  ;;  %v766_v45 = vsel %vm696_vm2, %v763_v22, %v765_v51  ;;  %v7240_v43 = vrot.slane %v7226_v55, 1 }
 0x15d   :  { %v933_v9 = vsel %vm865_vm1, %v930_v28, %v932_v25  ;;  %v935_v11 = vsel %vm865_vm1, %v932_v25, %v934_v1  ;;  %v6285_v48 = vpack.i.bf16 %v766_v45, %v764_v59  ;;  %v1102_v53 = vsel %vm1034_vm3, %v1099_v12, %v1101_v57 }
 0x15e   :  { %6261 = vrot.lane.b32.xlu0 %v6260_v40, %s6415_s26  ;;  %6251 = vrot.lane.b32.xlu1 %v6250_v0, %s6417_s28  ;;  %v1103_v40 = vrot.slane %v7203_v41, 3  ;;  %v6280_v0 = vpack.i.bf16 %v1100_v38, %v7186_v44  ;;  %v6290_v38 = vpack.i.bf16 %v935_v11, %v933_v9  ;;  %v768_v28 = vsel %vm696_vm2, %v765_v51, %v7240_v43 }
 0x15f   :  { %v7254_v25 = vrot.slane %v7226_v55, 3  ;;  %v6300_v59 = vpack.i.bf16 %v7240_v43, %v768_v28 }
 0x160   :  { %v1104_v22 = vsel %vm1034_vm3, %v1101_v57, %v1103_v40 }
 0x161   :  { %v6295_v12 = vpack.i.bf16 %v1104_v22, %v1102_v53  ;;  %v1106_v51 = vsel %vm1034_vm3, %v1103_v40, %v7254_v25  ;;  %v451_v22 = vadd.f32 %v6945_v16, %v6714_v13 }
 0x162   :  { %6266 = vrot.lane.b32.xlu0 %v6265_v50, %s6417_s28  ;;  %6271 = vrot.lane.b32.xlu1 %v6270_v35, %s6416_s27  ;;  %v331_v50 = vadd.f32 %v6734_v31, %v6714_v13  ;;  %v7248_v35 = vrot.slane %v7226_v55, 2  ;;  %v6310_v28 = vpack.i.bf16 %v7254_v25, %v1106_v51 }
 0x164   :  { %v7256_v31 = vmax.f32 %v331_v50, 0.0  ;;  %v937_v57 = vsel %vm865_vm1, %v934_v1, %v7248_v35  ;;  %v421_v50 = vadd.f32 %v6902_v7, %v6714_v13 }
 0x165   :  { %v6305_v11 = vpack.i.bf16 %v7248_v35, %v937_v57 }
 0x166   :  { %6276 = vrot.lane.b32.xlu0 %v6275_v33, %s6415_s26  ;;  %6281 = vrot.lane.b32.xlu1 %v6280_v0, %s6417_s28  ;;  %v361_v33 = vadd.f32 %v6797_v21, %v6714_v13  ;;  %v391_v0 = vadd.f32 %v6842_v5, %v6714_v13  ;;  %v9232_v1 = vrot.slane %v7256_v31, 2  ;;  %v9245_v40 = vrot.slane %v7256_v31, 1 }
 0x168   :  { %v7267_v45 = vmax.f32 %v361_v33, 0.0  ;;  %v7284_v33 = vld [vmem:[%s9192_s2] ss:$0 sm:$0xff]  ;;  %v7292_v16 = vmax.f32 %v391_v0, 0.0  ;;  %v7305_v0 = vmax.f32 %v421_v50, 0.0 }
 0x169   :  { %v481_v7 = vadd.f32 %v7284_v33, %v7007_v3  ;;  %v511_v50 = vadd.f32 %v7284_v33, %v7062_v29 }
 0x16a   :  { %6286 = vrot.lane.b32.xlu0 %v6285_v48, %s6416_s27  ;;  %6291 = vrot.lane.b32.xlu1 %v6290_v38, %s6415_s26  ;;  %9322 = vst [vmem:[#allocation32_spill] sm:$0xff] %v7267_v45  ;;  %9323 = vst [vmem:[#allocation33_spill] sm:$0xff] %v7292_v16  ;;  %v9230_v51 = vrot.slane %v7267_v45, 1  ;;  %v9234_v29 = vrot.slane %v7267_v45, 2 }
 0x16b   :  { %9324 = vst [vmem:[#allocation34_spill] sm:$0xff] %v7305_v0 }
 0x16e   :  { %6296 = vrot.lane.b32.xlu0 %v6295_v12, %s6417_s28  ;;  %6301 = vrot.lane.b32.xlu1 %v6300_v59, %s6416_s27  ;;  %v2041_v59 = vsel %vm865_vm1, %v6763_v58, %v9232_v1 }
 0x170   :  { %v6022_v21 = vpop.permute.xlu1 %6021  ;;  %v6017_v9 = vpop.permute.xlu0 %6016 }
 0x171   :  { %v6019_v48 = vunpack.i.h.bf16 %v6017_v9  ;;  %v6018_v53 = vunpack.i.l.bf16 %v6017_v9  ;;  %v6024_v38 = vunpack.i.h.bf16 %v6022_v21  ;;  %v6023_v5 = vunpack.i.l.bf16 %v6022_v21 }
 0x172   :  { %6306 = vrot.lane.b32.xlu0 %v6305_v11, %s6415_s26  ;;  %6311 = vrot.lane.b32.xlu1 %v6310_v28, %s6417_s28  ;;  %v7307_v9 = vmax.f32 %v451_v22, 0.0 }
 0x173   :  { %v1205_v12 = vsel %vm1203_vm4, %v6718_v19, %v6019_v48  ;;  %v1204_v13 = vsel %vm1203_vm4, %v6720_v20, %v6018_v53  ;;  %v2001_v19 = vsel %vm696_vm2, %v6771_v61, %v9245_v40  ;;  %v9231_v20 = vrot.slane %v7256_v31, 3 }
 0x174   :  { %v6027_v57 = vpop.permute.xlu0 %6026  ;;  %9325 = vst [vmem:[#allocation35_spill] sm:$0xff] %v7307_v9  ;;  %v6037_v11 = vpop.permute.xlu1 %6036  ;;  %v1237_v58 = vsel %vm1236_vm5, %v1204_v13, %v6023_v5  ;;  %v1238_v48 = vsel %vm1236_vm5, %v1205_v12, %v6024_v38  ;;  %v7312_v53 = vmax.f32 %v481_v7, 0.0  ;;  %v2003_v38 = vsel %vm696_vm2, %v6833_v63, %v9230_v51 }
 0x175   :  { %v6029_v3 = vunpack.i.h.bf16 %v6027_v57  ;;  %v6028_v21 = vunpack.i.l.bf16 %v6027_v57  ;;  %v2081_v57 = vsel %vm1034_vm3, %v6779_v2, %v9231_v20  ;;  %v7341_v2 = vmax.f32 %v511_v50, 0.0 }
 0x176   :  { %2016 = vrot.lane.b32.xlu0 %v2001_v19, %s6416_s27  ;;  %9326 = vst [vmem:[#allocation36_spill] sm:$0xff] %v7312_v53  ;;  %2056 = vrot.lane.b32.xlu1 %v2041_v59, %s6415_s26  ;;  %v6039_v59 = vunpack.i.h.bf16 %v6037_v11  ;;  %v9233_v19 = vrot.slane %v7267_v45, 3 }
 0x177   :  { %v7315_v28 = vsel %vm94_vm0, %v1237_v58, %v6028_v21  ;;  %v7318_v61 = vsel %vm94_vm0, %v1238_v48, %v6029_v3  ;;  %v6038_v3 = vunpack.i.l.bf16 %v6037_v11  ;;  %9327 = vst [vmem:[#allocation37_spill] sm:$0xff] %v7341_v2 }
 0x178   :  { %v6032_v22 = vpop.permute.xlu0 %6031  ;;  %v1438_v5 = vrot.slane %v7315_v28, 4  ;;  %v1439_v7 = vrot.slane %v7318_v61, 4  ;;  %v6042_v21 = vpop.permute.xlu1 %6041 }
 0x179   :  { %v6034_v12 = vunpack.i.h.bf16 %v6032_v22  ;;  %v6033_v13 = vunpack.i.l.bf16 %v6032_v22  ;;  %v6044_v58 = vunpack.i.h.bf16 %v6042_v21  ;;  %v6043_v48 = vunpack.i.l.bf16 %v6042_v21 }
 0x17a   :  { %2096 = vrot.lane.b32.xlu0 %v2081_v57, %s6417_s28  ;;  %v1440_v63 = vsel %vm1437_vm6, %v1438_v5, %v1439_v7  ;;  %2018 = vrot.lane.b32.xlu1 %v2003_v38, %s6416_s27  ;;  %v9244_v57 = vrot.slane %v7292_v16, 1  ;;  %v595_v38 = vld [vmem:[%s9193_s3 + $0x18] sm:$0xff] }
 0x17b   :  { %v1207_v22 = vsel %vm1203_vm4, %v6744_v36, %v6034_v12  ;;  %v1206_v51 = vsel %vm1203_vm4, %v6732_v30, %v6033_v13  ;;  %4987 = vmatprep.mubr.f32.mxu1 %v1440_v63  ;;  %v2043_v36 = vsel %vm865_vm1, %v6847_v8, %v9234_v29  ;;  %v2083_v63 = vsel %vm1034_vm3, %v6856_v15, %v9233_v19 }
 0x17c   :  { %v1240_v11 = vsel %vm1236_vm5, %v1207_v22, %v6039_v59  ;;  %v1239_v20 = vsel %vm1236_vm5, %v1206_v51, %v6038_v3  ;;  %v6047_v5 = vpop.permute.xlu0 %6046  ;;  %v594_v51 = vld [vmem:[%s9193_s3 + $0x10] sm:$0xff]  ;;  %v6052_v12 = vpop.permute.xlu1 %6051 }
 0x17d   :  { %v6048_v1 = vunpack.i.l.bf16 %v6047_v5  ;;  %v7352_v30 = vsel %vm94_vm0, %v1239_v20, %v6043_v48  ;;  %v7355_v50 = vsel %vm94_vm0, %v1240_v11, %v6044_v58  ;;  %v6049_v13 = vunpack.i.h.bf16 %v6047_v5 }
 0x17e   :  { %2058 = vrot.lane.b32.xlu0 %v2043_v36, %s6415_s26  ;;  %v1441_v8 = vrot.slane %v7352_v30, 4  ;;  %v9243_v20 = vrot.slane %v7292_v16, 2  ;;  %v7367_v59 = vrot.slane %v7355_v50, 4  ;;  %v6053_v3 = vunpack.i.l.bf16 %v6052_v12  ;;  %2098 = vrot.lane.b32.xlu1 %v2083_v63, %s6417_s28 }
 0x17f   :  { %v1373_v21 = vsel %vm1203_vm4, %v6753_v46, %v6048_v1  ;;  %v9235_v58 = vrot.slane %v7305_v0, 1  ;;  %v9236_v5 = vrot.slane %v7292_v16, 3  ;;  %v5607_v1 = vpack.c.bf16 %v595_v38, %v594_v51 }
 0x180   :  { %9328 = vst [vmem:[#allocation38_spill] sm:$0xff] %v7367_v59  ;;  %v6057_v48 = vpop.permute.xlu0 %6056  ;;  %v7378_v22 = vsel %vm1437_vm6, %v1439_v7, %v1441_v8  ;;  %v7382_v11 = vsel %vm1437_vm6, %v1441_v8, %v7367_v59  ;;  %v7387_v36 = vadd.f32 %v7284_v33, %v7114_v32  ;;  %v6054_v15 = vunpack.i.h.bf16 %v6052_v12  ;;  %v6062_v63 = vpop.permute.xlu1 %6061 }
 0x181   :  { %9329 = vst [vmem:[#allocation39_spill] sm:$0xff] %v7382_v11  ;;  %v6058_v19 = vunpack.i.l.bf16 %v6057_v48  ;;  %4988 = vmatmul.mubr.f32.vlgmr.msra.gmra.mrb[0].mxu1 %v7378_v22  ;;  %v2005_v7 = vsel %vm696_vm2, %v6872_v34, %v9244_v57  ;;  %v1208_v8 = vsel %vm1203_vm4, %v6773_v62, %v6049_v13  ;;  %v6059_v29 = vunpack.i.h.bf16 %v6057_v48  ;;  %v596_v34 = vld [vmem:[%s9193_s3 + $0x20] sm:$0xff]  ;;  %v597_v62 = vld [vmem:[%s9193_s3 + $0x28] sm:$0xff] }
 0x182   :  { %v2045_v32 = vsel %vm865_vm1, %v6890_v52, %v9243_v20  ;;  %2020 = vrot.lane.b32.xlu0 %v2005_v7, %s6416_s27  ;;  %4990 = vmatprep.mubr.f32.mxu1 %v7382_v11  ;;  %v1381_v33 = vsel %vm1236_vm5, %v1373_v21, %v6053_v3  ;;  %v6064_v51 = vunpack.i.h.bf16 %v6062_v63  ;;  %v6063_v38 = vunpack.i.l.bf16 %v6062_v63 }
 0x183   :  { %v1389_v12 = vsel %vm94_vm0, %v1381_v33, %v6058_v19  ;;  %v9241_v52 = vrot.slane %v7305_v0, 3  ;;  %5606 = vmatpush3.bf16.msra.mxu1 %v7210_v27  ;;  %2060 = vrot.lane.b32.xlu1 %v2045_v32, %s6415_s26  ;;  %v2007_v3 = vsel %vm696_vm2, %v6969_v54, %v9235_v58  ;;  %v2085_v21 = vsel %vm1034_vm3, %v6912_v24, %v9236_v5  ;;  %v598_v33 = vld [vmem:[%s9193_s3 + $0x30] sm:$0xff]  ;;  %v599_v54 = vld [vmem:[%s9193_s3 + $0x38] sm:$0xff] }
 0x184   :  { %v6067_v13 = vpop.permute.xlu0 %6066  ;;  %v1445_v48 = vrot.slane %v1389_v12, 4  ;;  %v9242_v19 = vrot.slane %v7305_v0, 2  ;;  %5608 = vmatprep.subr.bf16.mxu1 %v5607_v1  ;;  %v1241_v27 = vsel %vm1236_vm5, %v1208_v8, %v6054_v15  ;;  %v5611_v32 = vpack.c.bf16 %v597_v62, %v596_v34  ;;  %v6072_v58 = vpop.permute.xlu1 %6071 }
 0x185   :  { %v6069_v7 = vunpack.i.h.bf16 %v6067_v13  ;;  %v6068_v63 = vunpack.i.l.bf16 %v6067_v13  ;;  %v1210_v24 = vsel %vm1203_vm4, %v6795_v18, %v6064_v51  ;;  %v1209_v12 = vsel %vm1203_vm4, %v6766_v60, %v6063_v38 }
 0x186   :  { %2100 = vrot.lane.b32.xlu0 %v2085_v21, %s6417_s28  ;;  %v1446_v15 = vsel %vm1437_vm6, %v7367_v59, %v1445_v48  ;;  %v7437_v8 = vsel %vm94_vm0, %v1241_v27, %v6059_v29  ;;  %v6074_v34 = vunpack.i.h.bf16 %v6072_v58  ;;  %v6073_v62 = vunpack.i.l.bf16 %v6072_v58 }
 0x187   :  { %v1243_v13 = vsel %vm1236_vm5, %v1210_v24, %v6069_v7  ;;  %v1242_v5 = vsel %vm1236_vm5, %v1209_v12, %v6068_v63  ;;  %4991 = vmatmul.mubr.f32.gmra.mrb[2].mxu1 %v1446_v15  ;;  %2022 = vrot.lane.b32.xlu1 %v2007_v3, %s6416_s27  ;;  %v2047_v60 = vsel %vm865_vm1, %v6981_v23, %v9242_v19  ;;  %v9239_v51 = vrot.slane %v7307_v9, 2 }
 0x188   :  { %v6077_v18 = vpop.permute.xlu0 %6076  ;;  %v9240_v29 = vrot.slane %v7307_v9, 1  ;;  %5610 = vmatpush3.bf16.msra.mxu1 %v5607_v1  ;;  %v5615_v38 = vpack.c.bf16 %v599_v54, %v598_v33  ;;  %v7449_v48 = vsel %vm94_vm0, %v1242_v5, %v6073_v62  ;;  %v7452_v7 = vsel %vm94_vm0, %v1243_v13, %v6074_v34  ;;  %v6082_v3 = vpop.permute.xlu1 %6081  ;;  %v600_v5 = vld [vmem:[%s9193_s3 + $0x40] sm:$0xff]  ;;  %v601_v33 = vld [vmem:[%s9193_s3 + $0x48] sm:$0xff] }
 0x189   :  { %v6079_v58 = vunpack.i.h.bf16 %v6077_v18  ;;  %v6078_v21 = vunpack.i.l.bf16 %v6077_v18  ;;  %5612 = vmatprep.subr.bf16.mxu1 %v5611_v32  ;;  %v2087_v23 = vsel %vm1034_vm3, %v6991_v37, %v9241_v52  ;;  %v1447_v1 = vrot.slane %v7437_v8, 4 }
 0x18a   :  { %2062 = vrot.lane.b32.xlu0 %v2047_v60, %s6415_s26  ;;  %v1448_v63 = vrot.slane %v7449_v48, 4  ;;  %v1450_v27 = vrot.slane %v7452_v7, 4  ;;  %v6084_v54 = vunpack.i.h.bf16 %v6082_v3  ;;  %v6083_v24 = vunpack.i.l.bf16 %v6082_v3 }
 0x18b   :  { %v1374_v37 = vsel %vm1203_vm4, %v6815_v42, %v6079_v58  ;;  %v1211_v12 = vsel %vm1203_vm4, %v6793_v17, %v6078_v21  ;;  %2102 = vrot.lane.b32.xlu1 %v2087_v23, %s6417_s28  ;;  %v9237_v13 = vrot.slane %v7312_v53, 1  ;;  %v9238_v18 = vrot.slane %v7307_v9, 3  ;;  %v9331_v58 = vld [vmem:[#allocation20_spill] sm:$0xff] }
 0x18c   :  { %v6087_v15 = vpop.permute.xlu0 %6086  ;;  %v1449_v34 = vsel %vm1437_vm6, %v1447_v1, %v1448_v63  ;;  %v7475_v62 = vsel %vm1437_vm6, %v1448_v63, %v1450_v27  ;;  %5614 = vmatpush3.bf16.msra.mxu1 %v5611_v32  ;;  %v2009_v17 = vsel %vm696_vm2, %v9331_v58, %v9240_v29  ;;  %v5619_v21 = vpack.c.bf16 %v601_v33, %v600_v5  ;;  %v6092_v23 = vpop.permute.xlu1 %6091  ;;  %v9336_v58 = vld [vmem:[#allocation24_spill] sm:$0xff]  ;;  %v9338_v29 = vld [vmem:[#allocation5_spill] sm:$0xff] }
 0x18d   :  { %9330 = vst [vmem:[#allocation40_spill] sm:$0xff] %v7475_v62  ;;  %v6089_v60 = vunpack.i.h.bf16 %v6087_v15  ;;  %v6088_v3 = vunpack.i.l.bf16 %v6087_v15  ;;  %4993 = vmatprep.mubr.f32.mxu1 %v1449_v34  ;;  %5616 = vmatprep.subr.bf16.mxu1 %v5615_v38  ;;  %v1244_v1 = vsel %vm1236_vm5, %v1211_v12, %v6083_v24  ;;  %v1382_v63 = vsel %vm1236_vm5, %v1374_v37, %v6084_v54  ;;  %v9333_v34 = vld [vmem:[#allocation21_spill] sm:$0xff]  ;;  %v602_v24 = vld [vmem:[%s9193_s3 + $0x50] sm:$0xff]  ;;  %v603_v54 = vld [vmem:[%s9193_s3 + $0x58] sm:$0xff] }
 0x18e   :  { %4994 = vmatmul.mubr.f32.gmra.mrb[4].mxu1 %v7475_v62  ;;  %2024 = vrot.lane.b32.xlu0 %v2009_v17, %s6416_s27  ;;  %v7488_v32 = vmax.f32 %v7387_v36, 0.0  ;;  %v2049_v5 = vsel %vm865_vm1, %v9333_v34, %v9239_v51  ;;  %v9334_v37 = vld [vmem:[#allocation28_spill] sm:$0xff]  ;;  %v2089_v17 = vsel %vm1034_vm3, %v9336_v58, %v9238_v18  ;;  %v9250_v34 = vrot.slane %v7341_v2, 1 }
 0x18f   :  { %v7491_v15 = vsel %vm94_vm0, %v1244_v1, %v6088_v3  ;;  %v1390_v33 = vsel %vm94_vm0, %v1382_v63, %v6089_v60  ;;  %2064 = vrot.lane.b32.xlu1 %v2049_v5, %s6415_s26  ;;  %v2011_v12 = vsel %vm696_vm2, %v9334_v37, %v9237_v13  ;;  %v9246_v1 = vrot.slane %v7312_v53, 3  ;;  %v604_v13 = vld [vmem:[%s9193_s3 + $0x60] sm:$0xff] }
 0x190   :  { %9332 = vst [vmem:[#allocation20_spill] sm:$0xff] %v7488_v32  ;;  %v6107_v36 = vpop.permute.xlu0 %6106  ;;  %v7510_v3 = vrot.slane %v7491_v15, 4  ;;  %v1454_v60 = vrot.slane %v1390_v33, 4  ;;  %5618 = vmatpush3.bf16.msra.mxu1 %v5615_v38  ;;  %v9247_v63 = vrot.slane %v7312_v53, 2  ;;  %v6097_v5 = vpop.permute.xlu1 %6096  ;;  %v5623_v58 = vpack.c.bf16 %v603_v54, %v602_v24  ;;  %v606_v24 = vld [vmem:[%s9193_s3 + $0x70] sm:$0xff]  ;;  %v607_v54 = vld [vmem:[%s9193_s3 + $0x78] sm:$0xff] }
 0x191   :  { %5620 = vmatprep.subr.bf16.mxu1 %v5619_v21  ;;  %v6094_v18 = vunpack.i.h.bf16 %v6092_v23  ;;  %v6093_v51 = vunpack.i.l.bf16 %v6092_v23  ;;  %v6098_v23 = vunpack.i.l.bf16 %v6097_v5  ;;  %v6109_v52 = vunpack.i.h.bf16 %v6107_v36 }
 0x192   :  { %9335 = vst [vmem:[#allocation21_spill] sm:$0xff] %v7510_v3  ;;  %2104 = vrot.lane.b32.xlu0 %v2089_v17, %s6417_s28  ;;  %v7522_v37 = vsel %vm1437_vm6, %v1450_v27, %v7510_v3  ;;  %v1455_v38 = vsel %vm1437_vm6, %v7510_v3, %v1454_v60  ;;  %v605_v27 = vld [vmem:[%s9193_s3 + $0x68] sm:$0xff]  ;;  %v6099_v60 = vunpack.i.h.bf16 %v6097_v5  ;;  %v6108_v19 = vunpack.i.l.bf16 %v6107_v36  ;;  %v9341_v36 = vld [vmem:[#allocation7_spill] sm:$0xff] }
 0x193   :  { %9337 = vst [vmem:[#allocation28_spill] sm:$0xff] %v7522_v37  ;;  %4996 = vmatprep.mubr.f32.mxu1 %v7522_v37  ;;  %2026 = vrot.lane.b32.xlu1 %v2011_v12, %s6416_s27  ;;  %v2091_v57 = vsel %vm1034_vm3, %v7126_v56, %v9246_v1  ;;  %v2051_v40 = vsel %vm865_vm1, %v7112_v14, %v9247_v63  ;;  %v9339_v14 = vld [vmem:[#allocation6_spill] sm:$0xff] }
 0x194   :  { %v6112_v20 = vpop.permute.xlu0 %6111  ;;  %4997 = vmatmul.mubr.f32.gmra.mrb[6].mxu1 %v1455_v38  ;;  %v2013_v5 = vsel %vm696_vm2, %v7147_v6, %v9250_v34  ;;  %v6102_v12 = vpop.permute.xlu1 %6101  ;;  %v5627_v56 = vpack.c.bf16 %v605_v27, %v604_v13  ;;  %v5631_v1 = vpack.c.bf16 %v607_v54, %v606_v24  ;;  %v1213_v33 = vsel %vm1203_vm4, %v9338_v29, %v6094_v18  ;;  %v9340_v34 = vld [vmem:[#allocation8_spill] sm:$0xff] }
 0x195   :  { %5622 = vmatpush3.bf16.msra.mxu1 %v5619_v21  ;;  %v6114_v38 = vunpack.i.h.bf16 %v6112_v20  ;;  %v6113_v17 = vunpack.i.l.bf16 %v6112_v20  ;;  %v1212_v63 = vsel %vm1203_vm4, %v9339_v14, %v6093_v51  ;;  %v6104_v3 = vunpack.i.h.bf16 %v6102_v12 }
 0x196   :  { %2066 = vrot.lane.b32.xlu0 %v2051_v40, %s6415_s26  ;;  %5624 = vmatprep.subr.bf16.mxu1 %v5623_v58  ;;  %v6103_v37 = vunpack.i.l.bf16 %v6102_v12  ;;  %v1245_v6 = vsel %vm1236_vm5, %v1212_v63, %v6098_v23  ;;  %v1246_v21 = vsel %vm1236_vm5, %v1213_v33, %v6099_v60  ;;  %v1215_v20 = vsel %vm1203_vm4, %v9340_v34, %v6109_v52  ;;  %v625_v34 = vld [vmem:[%s9193_s3 + $0x108] sm:$0xff] }
 0x197   :  { %v1214_v40 = vsel %vm1203_vm4, %v9341_v36, %v6108_v19  ;;  %2106 = vrot.lane.b32.xlu1 %v2091_v57, %s6417_s28  ;;  %v7569_v29 = vsel %vm94_vm0, %v1246_v21, %v6104_v3  ;;  %v1248_v33 = vsel %vm1236_vm5, %v1215_v20, %v6114_v38  ;;  %v624_v3 = vld [vmem:[%s9193_s3 + $0x100] sm:$0xff]  ;;  %v9342_v24 = vrot.slane %v7341_v2, 2  ;;  %v9345_v20 = vld [vmem:[#allocation9_spill] sm:$0xff] }
 0x198   :  { %v6117_v13 = vpop.permute.xlu0 %6116  ;;  %v7572_v27 = vsel %vm94_vm0, %v1245_v6, %v6103_v37  ;;  %v1247_v63 = vsel %vm1236_vm5, %v1214_v40, %v6113_v17  ;;  %v6122_v52 = vpop.permute.xlu1 %6121  ;;  %v1457_v57 = vrot.slane %v7569_v29, 4  ;;  %v9344_v14 = vrot.slane %v7341_v2, 3 }
 0x199   :  { %v6119_v18 = vunpack.i.h.bf16 %v6117_v13  ;;  %v6118_v51 = vunpack.i.l.bf16 %v6117_v13  ;;  %5626 = vmatpush3.bf16.msra.mxu1 %v5623_v58  ;;  %v1456_v19 = vrot.slane %v7572_v27, 4  ;;  %v6123_v37 = vunpack.i.l.bf16 %v6122_v52 }
 0x19a   :  { %2028 = vrot.lane.b32.xlu0 %v2013_v5, %s6416_s27  ;;  %5628 = vmatprep.subr.bf16.mxu1 %v5627_v56  ;;  %v2053_v54 = vsel %vm865_vm1, %v7164_v47, %v9342_v24  ;;  %v6124_v60 = vunpack.i.h.bf16 %v6122_v52  ;;  %v2093_v6 = vsel %vm1034_vm3, %v7186_v44, %v9344_v14  ;;  %v9251_v47 = vrot.slane %v7488_v32, 3 }
 0x19b   :  { %v7586_v58 = vsel %vm94_vm0, %v1247_v63, %v6118_v51  ;;  %v7589_v17 = vsel %vm94_vm0, %v1248_v33, %v6119_v18  ;;  %2068 = vrot.lane.b32.xlu1 %v2053_v54, %s6415_s26  ;;  %v1458_v23 = vsel %vm1437_vm6, %v1456_v19, %v1457_v57  ;;  %v7606_v21 = vpack.c.bf16 %v625_v34, %v624_v3  ;;  %v9349_v19 = vld [vmem:[#allocation11_spill] sm:$0xff] }
 0x19c   :  { %v6127_v5 = vpop.permute.xlu0 %6126  ;;  %v1459_v36 = vrot.slane %v7586_v58, 4  ;;  %v7599_v12 = vrot.slane %v7589_v17, 4  ;;  %4999 = vmatprep.mubr.f32.mxu1 %v1458_v23  ;;  %v1375_v40 = vsel %vm1203_vm4, %v9345_v20, %v6123_v37  ;;  %v6132_v13 = vpop.permute.xlu1 %6131  ;;  %v9348_v33 = vrot.slane %v7488_v32, 1 }
 0x19d   :  { %v6128_v38 = vunpack.i.l.bf16 %v6127_v5  ;;  %5630 = vmatpush3.bf16.msra.mxu1 %v5627_v56  ;;  %v6129_v18 = vunpack.i.h.bf16 %v6127_v5  ;;  %v6133_v44 = vunpack.i.l.bf16 %v6132_v13  ;;  %v1216_v3 = vsel %vm1203_vm4, %v9349_v19, %v6124_v60 }
 0x19e   :  { %9343 = vst [vmem:[#allocation24_spill] sm:$0xff] %v7599_v12  ;;  %2108 = vrot.lane.b32.xlu0 %v2093_v6, %s6417_s28  ;;  %v7612_v51 = vsel %vm1437_vm6, %v1457_v57, %v1459_v36  ;;  %v7616_v63 = vsel %vm1437_vm6, %v1459_v36, %v7599_v12  ;;  %5632 = vmatprep.subr.bf16.mxu1 %v5631_v1  ;;  %v9350_v34 = vrot.slane %v7488_v32, 2  ;;  %v6134_v24 = vunpack.i.h.bf16 %v6132_v13  ;;  %v9351_v6 = vld [vmem:[#allocation13_spill] sm:$0xff]  ;;  %v9352_v13 = vld [vmem:[#allocation10_spill] sm:$0xff] }
 0x19f   :  { %9346 = vst [vmem:[#allocation5_spill] sm:$0xff] %v7612_v51  ;;  %9347 = vst [vmem:[#allocation6_spill] sm:$0xff] %v7616_v63  ;;  %v1383_v56 = vsel %vm1236_vm5, %v1375_v40, %v6128_v38  ;;  %v2015_v52 = vsel %vm696_vm2, %v7240_v43, %v9348_v33  ;;  %5000 = vmatmul.mubr.f32.gmra.mrb[8].mxu1 %v7612_v51  ;;  %v1249_v5 = vsel %vm1236_vm5, %v1216_v3, %v6129_v18  ;;  %v9382_v51 = vld [vmem:[#allocation22_spill] sm:$0xff] }
 0x1a0   :  { %2030 = vrot.lane.b32.xlu1 %v2015_v52, %s6416_s27  ;;  %v6137_v57 = vpop.permute.xlu0 %6136  ;;  %5002 = vmatprep.mubr.f32.mxu1 %v7616_v63  ;;  %v2055_v37 = vsel %vm865_vm1, %v7248_v35, %v9350_v34  ;;  %v1391_v43 = vsel %vm94_vm0, %v1383_v56, %v6133_v44  ;;  %v6142_v36 = vpop.permute.xlu1 %6141  ;;  %v2095_v60 = vsel %vm1034_vm3, %v7254_v25, %v9251_v47  ;;  %v9367_v47 = vld [vmem:[#allocation16_spill] sm:$0xff]  ;;  %v9370_v63 = vrot.slane %v7292_v16, 3 }
 0x1a1   :  { %v6139_v54 = vunpack.i.h.bf16 %v6137_v57  ;;  %v6138_v23 = vunpack.i.l.bf16 %v6137_v57  ;;  %5634 = vmatpush3.bf16.msra.mxu1 %v5631_v1  ;;  %v1463_v38 = vrot.slane %v1391_v43, 4  ;;  %v6144_v35 = vunpack.i.h.bf16 %v6142_v36 }
 0x1a2   :  { %2070 = vrot.lane.b32.xlu0 %v2055_v37, %s6415_s26  ;;  %5636 = vmatprep.subr.bf16.mxu1 %v7606_v21  ;;  %v6143_v14 = vunpack.i.l.bf16 %v6142_v36  ;;  %v7648_v33 = vsel %vm94_vm0, %v1249_v5, %v6134_v24  ;;  %v9353_v57 = vrot.slane %v7256_v31, 1  ;;  %v9354_v24 = vrot.slane %v7256_v31, 2 }
 0x1a3   :  { %v1218_v40 = vsel %vm1203_vm4, %v9351_v6, %v6139_v54  ;;  %v1217_v1 = vsel %vm1203_vm4, %v9352_v13, %v6138_v23  ;;  %v1464_v44 = vsel %vm1437_vm6, %v7599_v12, %v1463_v38  ;;  %v1465_v5 = vrot.slane %v7648_v33, 4 }
 0x1a4   :  { %2110 = vrot.lane.b32.xlu1 %v2095_v60, %s6417_s28  ;;  %v6147_v18 = vpop.permute.xlu0 %6146  ;;  %5003 = vmatmul.mubr.f32.gmra.mrb[10].mxu1 %v1464_v44  ;;  %v6152_v52 = vpop.permute.xlu1 %6151  ;;  %v1250_v19 = vsel %vm1236_vm5, %v1217_v1, %v6143_v14  ;;  %v1251_v3 = vsel %vm1236_vm5, %v1218_v40, %v6144_v35  ;;  %v9355_v14 = vld [vmem:[#allocation14_spill] sm:$0xff]  ;;  %v9356_v40 = vld [vmem:[#allocation12_spill] sm:$0xff] }
 0x1a5   :  { %v6149_v25 = vunpack.i.h.bf16 %v6147_v18  ;;  %v6148_v56 = vunpack.i.l.bf16 %v6147_v18  ;;  %v6154_v34 = vunpack.i.h.bf16 %v6152_v52  ;;  %v6153_v37 = vunpack.i.l.bf16 %v6152_v52 }
 0x1a6   :  { %2401 = vrot.lane.b32.xlu0 %v9353_v57, %s6416_s27  ;;  %v9357_v18 = vrot.slane %v7256_v31, 3  ;;  %v9359_v57 = vrot.slane %v7267_v45, 1 }
 0x1a7   :  { %v7656_v54 = vsel %vm94_vm0, %v1250_v19, %v6148_v56  ;;  %v7659_v23 = vsel %vm94_vm0, %v1251_v3, %v6149_v25  ;;  %v1376_v6 = vsel %vm1203_vm4, %v9355_v14, %v6154_v34  ;;  %v1219_v13 = vsel %vm1203_vm4, %v9356_v40, %v6153_v37 }
 0x1a8   :  { %2425 = vrot.lane.b32.xlu1 %v9354_v24, %s6415_s26  ;;  %v6157_v43 = vpop.permute.xlu0 %6156  ;;  %v1466_v36 = vrot.slane %v7656_v54, 4  ;;  %v1468_v60 = vrot.slane %v7659_v23, 4  ;;  %v6162_v1 = vpop.permute.xlu1 %6161 }
 0x1a9   :  { %v6159_v38 = vunpack.i.h.bf16 %v6157_v43  ;;  %v6158_v35 = vunpack.i.l.bf16 %v6157_v43  ;;  %v6164_v56 = vunpack.i.h.bf16 %v6162_v1  ;;  %v6163_v52 = vunpack.i.l.bf16 %v6162_v1 }
 0x1aa   :  { %2449 = vrot.lane.b32.xlu0 %v9357_v18, %s6417_s28  ;;  %v1467_v44 = vsel %vm1437_vm6, %v1465_v5, %v1466_v36  ;;  %v7676_v25 = vsel %vm1437_vm6, %v1466_v36, %v1468_v60  ;;  %v9360_v5 = vrot.slane %v7267_v45, 2 }
 0x1ab   :  { %9358 = vst [vmem:[#allocation8_spill] sm:$0xff] %v7676_v25  ;;  %v1384_v19 = vsel %vm1236_vm5, %v1376_v6, %v6159_v38  ;;  %v1252_v3 = vsel %vm1236_vm5, %v1219_v13, %v6158_v35  ;;  %5005 = vmatprep.mubr.f32.mxu1 %v1467_v44  ;;  %v9362_v35 = vrot.slane %v7267_v45, 3 }
 0x1ac   :  { %2403 = vrot.lane.b32.xlu1 %v9359_v57, %s6416_s27  ;;  %v6167_v34 = vpop.permute.xlu0 %6166  ;;  %5006 = vmatmul.mubr.f32.gmra.mrb[12].mxu1 %v7676_v25  ;;  %v7685_v37 = vsel %vm94_vm0, %v1252_v3, %v6163_v52  ;;  %v1392_v24 = vsel %vm94_vm0, %v1384_v19, %v6164_v56  ;;  %v6182_v43 = vpop.permute.xlu1 %6181  ;;  %v9364_v57 = vrot.slane %v7292_v16, 1  ;;  %v9369_v25 = vld [vmem:[#allocation17_spill] sm:$0xff] }
 0x1ad   :  { %v7692_v36 = vrot.slane %v7685_v37, 4  ;;  %v1472_v38 = vrot.slane %v1392_v24, 4  ;;  %v6169_v1 = vunpack.i.h.bf16 %v6167_v34  ;;  %v6168_v18 = vunpack.i.l.bf16 %v6167_v34  ;;  %v9366_v34 = vld [vmem:[#allocation15_spill] sm:$0xff] }
 0x1ae   :  { %2427 = vrot.lane.b32.xlu0 %v9360_v5, %s6415_s26  ;;  %v6184_v44 = vunpack.i.h.bf16 %v6182_v43  ;;  %v6183_v56 = vunpack.i.l.bf16 %v6182_v43  ;;  %v9365_v5 = vrot.slane %v7292_v16, 2 }
 0x1af   :  { %9361 = vst [vmem:[#allocation7_spill] sm:$0xff] %v7692_v36  ;;  %v7699_v40 = vsel %vm1437_vm6, %v1468_v60, %v7692_v36  ;;  %v1473_v13 = vsel %vm1437_vm6, %v7692_v36, %v1472_v38  ;;  %v1220_v43 = vsel %vm1203_vm4, %v9367_v47, %v6168_v18 }
 0x1b0   :  { %2451 = vrot.lane.b32.xlu1 %v9362_v35, %s6417_s28  ;;  %v6172_v6 = vpop.permute.xlu0 %6171  ;;  %9363 = vst [vmem:[#allocation9_spill] sm:$0xff] %v7699_v40  ;;  %5008 = vmatprep.mubr.f32.mxu1 %v7699_v40  ;;  %v6187_v52 = vpop.permute.xlu1 %6186  ;;  %v1221_v35 = vsel %vm1203_vm4, %v9366_v34, %v6169_v1 }
 0x1b1   :  { %v6174_v19 = vunpack.i.h.bf16 %v6172_v6  ;;  %v6173_v3 = vunpack.i.l.bf16 %v6172_v6  ;;  %5009 = vmatmul.mubr.f32.gmra.mrb[14].mxu1 %v1473_v13  ;;  %v6189_v24 = vunpack.i.h.bf16 %v6187_v52  ;;  %v6188_v60 = vunpack.i.l.bf16 %v6187_v52  ;;  %v9368_v13 = vld [vmem:[#allocation18_spill] sm:$0xff] }
 0x1b2   :  { %2405 = vrot.lane.b32.xlu0 %v9364_v57, %s6416_s27  ;;  %v1223_v40 = vsel %vm1203_vm4, %v9368_v13, %v6184_v44  ;;  %v1222_v57 = vsel %vm1203_vm4, %v9369_v25, %v6183_v56  ;;  %v9371_v56 = vrot.slane %v7305_v0, 1 }
 0x1b3   :  { %v1253_v52 = vsel %vm1236_vm5, %v1220_v43, %v6173_v3  ;;  %v1254_v12 = vsel %vm1236_vm5, %v1221_v35, %v6174_v19  ;;  %v1255_v44 = vsel %vm1236_vm5, %v1222_v57, %v6188_v60  ;;  %v1256_v25 = vsel %vm1236_vm5, %v1223_v40, %v6189_v24  ;;  %v9374_v57 = vld [vmem:[#allocation19_spill] sm:$0xff] }
 0x1b4   :  { %2429 = vrot.lane.b32.xlu1 %v9365_v5, %s6415_s26  ;;  %v6177_v38 = vpop.permute.xlu0 %6176  ;;  %v6192_v5 = vpop.permute.xlu1 %6191  ;;  %v9372_v40 = vrot.slane %v7305_v0, 2 }
 0x1b5   :  { %v6179_v36 = vunpack.i.h.bf16 %v6177_v38  ;;  %v6178_v6 = vunpack.i.l.bf16 %v6177_v38  ;;  %v6194_v1 = vunpack.i.h.bf16 %v6192_v5  ;;  %v6193_v34 = vunpack.i.l.bf16 %v6192_v5 }
 0x1b6   :  { %2453 = vrot.lane.b32.xlu0 %v9370_v63, %s6417_s28  ;;  %v9375_v5 = vrot.slane %v7305_v0, 3 }
 0x1b7   :  { %v7724_v47 = vsel %vm94_vm0, %v1253_v52, %v6178_v6  ;;  %v7727_v18 = vsel %vm94_vm0, %v1254_v12, %v6179_v36  ;;  %v7737_v38 = vsel %vm94_vm0, %v1255_v44, %v6193_v34  ;;  %v7740_v35 = vsel %vm94_vm0, %v1256_v25, %v6194_v1 }
 0x1b8   :  { %2407 = vrot.lane.b32.xlu1 %v9371_v56, %s6416_s27  ;;  %v6197_v19 = vpop.permute.xlu0 %6196  ;;  %v1474_v3 = vrot.slane %v7724_v47, 4  ;;  %v1475_v63 = vrot.slane %v7727_v18, 4  ;;  %v6202_v36 = vpop.permute.xlu1 %6201  ;;  %v1477_v43 = vrot.slane %v7737_v38, 4  ;;  %v7748_v6 = vrot.slane %v7740_v35, 4 }
 0x1b9   :  { %v6198_v12 = vunpack.i.l.bf16 %v6197_v19  ;;  %v6199_v60 = vunpack.i.h.bf16 %v6197_v19  ;;  %v6203_v13 = vunpack.i.l.bf16 %v6202_v36  ;;  %v6204_v44 = vunpack.i.h.bf16 %v6202_v36  ;;  %v9378_v19 = vld [vmem:[#allocation23_spill] sm:$0xff] }
 0x1ba   :  { %2431 = vrot.lane.b32.xlu0 %v9372_v40, %s6415_s26  ;;  %v1476_v24 = vsel %vm1437_vm6, %v1474_v3, %v1475_v63  ;;  %9373 = vst [vmem:[#allocation11_spill] sm:$0xff] %v7748_v6  ;;  %v7756_v34 = vsel %vm1437_vm6, %v1475_v63, %v1477_v43  ;;  %v7761_v56 = vsel %vm1437_vm6, %v1477_v43, %v7748_v6  ;;  %v9379_v63 = vrot.slane %v7307_v9, 1 }
 0x1bb   :  { %v1377_v52 = vsel %vm1203_vm4, %v9374_v57, %v6198_v12  ;;  %5011 = vmatprep.mubr.f32.mxu1 %v1476_v24  ;;  %9376 = vst [vmem:[#allocation13_spill] sm:$0xff] %v7756_v34  ;;  %9377 = vst [vmem:[#allocation10_spill] sm:$0xff] %v7761_v56  ;;  %v1224_v3 = vsel %vm1203_vm4, %v9378_v19, %v6199_v60  ;;  %v9380_v43 = vrot.slane %v7307_v9, 2 }
 0x1bc   :  { %2455 = vrot.lane.b32.xlu1 %v9375_v5, %s6417_s28  ;;  %v6207_v1 = vpop.permute.xlu0 %6206  ;;  %5012 = vmatmul.mubr.f32.gmra.mrb[16].mxu1 %v7756_v34  ;;  %v6212_v12 = vpop.permute.xlu1 %6211  ;;  %v1385_v24 = vsel %vm1236_vm5, %v1377_v52, %v6203_v13  ;;  %v9381_v52 = vld [vmem:[#allocation26_spill] sm:$0xff] }
 0x1bd   :  { %v6208_v25 = vunpack.i.l.bf16 %v6207_v1  ;;  %v6209_v40 = vunpack.i.h.bf16 %v6207_v1  ;;  %5014 = vmatprep.mubr.f32.mxu1 %v7761_v56  ;;  %v6214_v36 = vunpack.i.h.bf16 %v6212_v12  ;;  %v6213_v5 = vunpack.i.l.bf16 %v6212_v12 }
 0x1be   :  { %2409 = vrot.lane.b32.xlu0 %v9379_v63, %s6416_s27  ;;  %v1257_v1 = vsel %vm1236_vm5, %v1224_v3, %v6204_v44 }
 0x1bf   :  { %v1393_v34 = vsel %vm94_vm0, %v1385_v24, %v6208_v25  ;;  %v1226_v56 = vsel %vm1203_vm4, %v9381_v52, %v6214_v36  ;;  %v1225_v63 = vsel %vm1203_vm4, %v9382_v51, %v6213_v5  ;;  %v7780_v12 = vsel %vm94_vm0, %v1257_v1, %v6209_v40 }
 0x1c0   :  { %2433 = vrot.lane.b32.xlu1 %v9380_v43, %s6415_s26  ;;  %v6217_v0 = vpop.permute.xlu0 %6216  ;;  %v1481_v60 = vrot.slane %v1393_v34, 4  ;;  %v6222_v25 = vpop.permute.xlu1 %6221  ;;  %v9383_v24 = vrot.slane %v7307_v9, 3  ;;  %v9384_v51 = vrot.slane %v7312_v53, 1 }
 0x1c1   :  { %v6219_v19 = vunpack.i.h.bf16 %v6217_v0  ;;  %v6218_v13 = vunpack.i.l.bf16 %v6217_v0  ;;  %v6224_v44 = vunpack.i.h.bf16 %v6222_v25  ;;  %v6223_v3 = vunpack.i.l.bf16 %v6222_v25 }
 0x1c2   :  { %2457 = vrot.lane.b32.xlu0 %v9383_v24, %s6417_s28  ;;  %v1482_v34 = vsel %vm1437_vm6, %v7748_v6, %v1481_v60 }
 0x1c3   :  { %v1259_v0 = vsel %vm1236_vm5, %v1226_v56, %v6219_v19  ;;  %v1258_v36 = vsel %vm1236_vm5, %v1225_v63, %v6218_v13  ;;  %5015 = vmatmul.mubr.f32.gmra.mrb[18].mxu1 %v1482_v34  ;;  %v9385_v56 = vrot.slane %v7312_v53, 2  ;;  %v1483_v19 = vrot.slane %v7780_v12, 4  ;;  %v9386_v34 = vld [vmem:[#allocation27_spill] sm:$0xff] }
 0x1c4   :  { %2411 = vrot.lane.b32.xlu1 %v9384_v51, %s6416_s27  ;;  %v6227_v40 = vpop.permute.xlu0 %6226  ;;  %v7793_v1 = vsel %vm94_vm0, %v1258_v36, %v6223_v3  ;;  %v7796_v52 = vsel %vm94_vm0, %v1259_v0, %v6224_v44  ;;  %v6232_v60 = vpop.permute.xlu1 %6231  ;;  %v9387_v36 = vld [vmem:[#allocation25_spill] sm:$0xff]  ;;  %v9388_v0 = vrot.slane %v7312_v53, 3 }
 0x1c5   :  { %v6229_v5 = vunpack.i.h.bf16 %v6227_v40  ;;  %v6228_v43 = vunpack.i.l.bf16 %v6227_v40  ;;  %v1484_v13 = vrot.slane %v7793_v1, 4  ;;  %v1486_v63 = vrot.slane %v7796_v52, 4 }
 0x1c6   :  { %2435 = vrot.lane.b32.xlu0 %v9385_v56, %s6415_s26  ;;  %v6234_v25 = vunpack.i.h.bf16 %v6232_v60  ;;  %v6233_v24 = vunpack.i.l.bf16 %v6232_v60 }
 0x1c7   :  { %v1378_v3 = vsel %vm1203_vm4, %v9386_v34, %v6229_v5  ;;  %v1227_v44 = vsel %vm1203_vm4, %v9387_v36, %v6228_v43  ;;  %v1485_v40 = vsel %vm1437_vm6, %v1483_v19, %v1484_v13  ;;  %v7813_v56 = vsel %vm1437_vm6, %v1484_v13, %v1486_v63 }
 0x1c8   :  { %2459 = vrot.lane.b32.xlu1 %v9388_v0, %s6417_s28  ;;  %v6237_v51 = vpop.permute.xlu0 %6236  ;;  %9389 = vst [vmem:[#allocation14_spill] sm:$0xff] %v7813_v56  ;;  %5017 = vmatprep.mubr.f32.mxu1 %v1485_v40  ;;  %v6242_v60 = vpop.permute.xlu1 %6241  ;;  %v1260_v16 = vsel %vm1236_vm5, %v1227_v44, %v6233_v24  ;;  %v1386_v5 = vsel %vm1236_vm5, %v1378_v3, %v6234_v25  ;;  %v9390_v43 = vrot.slane %v7341_v2, 1  ;;  %v9391_v13 = vrot.slane %v7341_v2, 2 }
 0x1c9   :  { %v6239_v6 = vunpack.i.h.bf16 %v6237_v51  ;;  %v6238_v9 = vunpack.i.l.bf16 %v6237_v51  ;;  %5018 = vmatmul.mubr.f32.gmra.mrb[20].mxu1 %v7813_v56  ;;  %v9393_v44 = vrot.slane %v7341_v2, 3  ;;  %v6243_v51 = vunpack.i.l.bf16 %v6242_v60 }
 0x1ca   :  { %2413 = vrot.lane.b32.xlu0 %v9390_v43, %s6416_s27 }
 0x1cb   :  { %v7822_v36 = vsel %vm94_vm0, %v1260_v16, %v6238_v9  ;;  %v1394_v19 = vsel %vm94_vm0, %v1386_v5, %v6239_v6  ;;  %v6244_v6 = vunpack.i.h.bf16 %v6242_v60 }
 0x1cc   :  { %2437 = vrot.lane.b32.xlu1 %v9391_v13, %s6415_s26  ;;  %v6257_v0 = vpop.permute.xlu0 %6256  ;;  %v7829_v24 = vrot.slane %v7822_v36, 4  ;;  %v1490_v25 = vrot.slane %v1394_v19, 4  ;;  %v6247_v3 = vpop.permute.xlu1 %6246  ;;  %v9395_v13 = vrot.slane %v7488_v32, 1 }
 0x1cd   :  { %v6249_v40 = vunpack.i.h.bf16 %v6247_v3  ;;  %v6248_v5 = vunpack.i.l.bf16 %v6247_v3  ;;  %v6259_v43 = vunpack.i.h.bf16 %v6257_v0  ;;  %v6258_v19 = vunpack.i.l.bf16 %v6257_v0 }
 0x1ce   :  { %9392 = vst [vmem:[#allocation12_spill] sm:$0xff] %v7829_v24  ;;  %2461 = vrot.lane.b32.xlu0 %v9393_v44, %s6417_s28  ;;  %v7836_v16 = vsel %vm1437_vm6, %v1486_v63, %v7829_v24  ;;  %v1491_v9 = vsel %vm1437_vm6, %v7829_v24, %v1490_v25  ;;  %v9396_v25 = vrot.slane %v7488_v32, 2  ;;  %v1229_v60 = vsel %vm1203_vm4, %v7102_v4, %v6244_v6  ;;  %v9397_v24 = vld [vmem:[#allocation29_spill] sm:$0xff] }
 0x1cf   :  { %9394 = vst [vmem:[#allocation15_spill] sm:$0xff] %v7836_v16  ;;  %5020 = vmatprep.mubr.f32.mxu1 %v7836_v16  ;;  %v1228_v3 = vsel %vm1203_vm4, %v9397_v24, %v6243_v51 }
 0x1d0   :  { %2415 = vrot.lane.b32.xlu1 %v9395_v13, %s6416_s27  ;;  %v6262_v44 = vpop.permute.xlu0 %6261  ;;  %5021 = vmatmul.mubr.f32.gmra.mrb[22].mxu1 %v1491_v9  ;;  %v6252_v2 = vpop.permute.xlu1 %6251  ;;  %v1261_v53 = vsel %vm1236_vm5, %v1228_v3, %v6248_v5  ;;  %v1262_v13 = vsel %vm1236_vm5, %v1229_v60, %v6249_v40  ;;  %v1231_v9 = vsel %vm1203_vm4, %v7119_v49, %v6259_v43 }
 0x1d1   :  { %v6264_v63 = vunpack.i.h.bf16 %v6262_v44  ;;  %v6263_v56 = vunpack.i.l.bf16 %v6262_v44  ;;  %v6254_v0 = vunpack.i.h.bf16 %v6252_v2  ;;  %v6253_v16 = vunpack.i.l.bf16 %v6252_v2  ;;  %v9398_v44 = vld [vmem:[#allocation30_spill] sm:$0xff] }
 0x1d2   :  { %2439 = vrot.lane.b32.xlu0 %v9396_v25, %s6415_s26  ;;  %v1230_v62 = vsel %vm1203_vm4, %v9398_v44, %v6258_v19  ;;  %v9399_v25 = vrot.slane %v7488_v32, 3 }
 0x1d3   :  { %v7861_v6 = vsel %vm94_vm0, %v1261_v53, %v6253_v16  ;;  %v7864_v2 = vsel %vm94_vm0, %v1262_v13, %v6254_v0  ;;  %v1263_v40 = vsel %vm1236_vm5, %v1230_v62, %v6263_v56  ;;  %v1264_v49 = vsel %vm1236_vm5, %v1231_v9, %v6264_v63  ;;  %v9400_v9 = vld [vmem:[#allocation31_spill] sm:$0xff] }
 0x1d4   :  { %2463 = vrot.lane.b32.xlu1 %v9399_v25, %s6417_s28  ;;  %v6267_v4 = vpop.permute.xlu0 %6266  ;;  %v6272_v5 = vpop.permute.xlu1 %6271  ;;  %v1492_v43 = vrot.slane %v7861_v6, 4  ;;  %v1493_v19 = vrot.slane %v7864_v2, 4 }
 0x1d5   :  { %v6269_v24 = vunpack.i.h.bf16 %v6267_v4  ;;  %v6268_v51 = vunpack.i.l.bf16 %v6267_v4  ;;  %v6273_v60 = vunpack.i.l.bf16 %v6272_v5  ;;  %v6274_v16 = vunpack.i.h.bf16 %v6272_v5 }
 0x1d6   :  { %v1494_v0 = vsel %vm1437_vm6, %v1492_v43, %v1493_v19 }
 0x1d7   :  { %v7871_v3 = vsel %vm94_vm0, %v1263_v40, %v6268_v51  ;;  %v7874_v53 = vsel %vm94_vm0, %v1264_v49, %v6269_v24  ;;  %5023 = vmatprep.mubr.f32.mxu1 %v1494_v0  ;;  %v1379_v44 = vsel %vm1203_vm4, %v9400_v9, %v6273_v60  ;;  %v1232_v5 = vsel %vm1203_vm4, %v7172_v26, %v6274_v16 }
 0x1d8   :  { %v6277_v13 = vpop.permute.xlu0 %6276  ;;  %v1495_v62 = vrot.slane %v7871_v3, 4  ;;  %v7879_v56 = vrot.slane %v7874_v53, 4  ;;  %v6282_v25 = vpop.permute.xlu1 %6281 }
 0x1d9   :  { %v6278_v63 = vunpack.i.l.bf16 %v6277_v13  ;;  %v6279_v4 = vunpack.i.h.bf16 %v6277_v13  ;;  %v6283_v40 = vunpack.i.l.bf16 %v6282_v25  ;;  %v6284_v60 = vunpack.i.h.bf16 %v6282_v25 }
 0x1da   :  { %v7884_v51 = vsel %vm1437_vm6, %v1493_v19, %v1495_v62  ;;  %v7888_v24 = vsel %vm1437_vm6, %v1495_v62, %v7879_v56 }
 0x1db   :  { %v1387_v49 = vsel %vm1236_vm5, %v1379_v44, %v6278_v63  ;;  %5024 = vmatmul.mubr.f32.gmra.mrb[24].mxu1 %v7884_v51  ;;  %v1265_v32 = vsel %vm1236_vm5, %v1232_v5, %v6279_v4 }
 0x1dc   :  { %v6287_v43 = vpop.permute.xlu0 %6286  ;;  %5026 = vmatprep.mubr.f32.mxu1 %v7888_v24  ;;  %v1395_v19 = vsel %vm94_vm0, %v1387_v49, %v6283_v40  ;;  %v6292_v62 = vpop.permute.xlu1 %6291  ;;  %v7904_v40 = vsel %vm94_vm0, %v1265_v32, %v6284_v60 }
 0x1dd   :  { %v6289_v0 = vunpack.i.h.bf16 %v6287_v43  ;;  %v6288_v13 = vunpack.i.l.bf16 %v6287_v43  ;;  %v1499_v59 = vrot.slane %v1395_v19, 4  ;;  %v6294_v11 = vunpack.i.h.bf16 %v6292_v62 }
 0x1de   :  { %v6293_v45 = vunpack.i.l.bf16 %v6292_v62 }
 0x1df   :  { %v1234_v63 = vsel %vm1203_vm4, %v7205_v10, %v6289_v0  ;;  %v1233_v26 = vsel %vm1203_vm4, %v7170_v39, %v6288_v13  ;;  %v1500_v44 = vsel %vm1437_vm6, %v7879_v56, %v1499_v59  ;;  %v1501_v13 = vrot.slane %v7904_v40, 4 }
 0x1e0   :  { %v6297_v16 = vpop.permute.xlu0 %6296  ;;  %5027 = vmatmul.mubr.f32.gmra.mrb[26].mxu1 %v1500_v44  ;;  %v6302_v4 = vpop.permute.xlu1 %6301  ;;  %v1266_v49 = vsel %vm1236_vm5, %v1233_v26, %v6293_v45  ;;  %v1267_v5 = vsel %vm1236_vm5, %v1234_v63, %v6294_v11 }
 0x1e1   :  { %v6299_v25 = vunpack.i.h.bf16 %v6297_v16  ;;  %v6298_v43 = vunpack.i.l.bf16 %v6297_v16  ;;  %v6304_v19 = vunpack.i.h.bf16 %v6302_v4  ;;  %v6303_v10 = vunpack.i.l.bf16 %v6302_v4 }
 0x1e3   :  { %v7909_v0 = vsel %vm94_vm0, %v1266_v49, %v6298_v43  ;;  %v7912_v39 = vsel %vm94_vm0, %v1267_v5, %v6299_v25  ;;  %v1380_v45 = vsel %vm1203_vm4, %v7226_v55, %v6304_v19  ;;  %v1235_v11 = vsel %vm1203_vm4, %v7203_v41, %v6303_v10 }
 0x1e4   :  { %v6307_v59 = vpop.permute.xlu0 %6306  ;;  %v1502_v62 = vrot.slane %v7909_v0, 4  ;;  %v1504_v32 = vrot.slane %v7912_v39, 4  ;;  %v6312_v63 = vpop.permute.xlu1 %6311 }
 0x1e5   :  { %v6309_v60 = vunpack.i.h.bf16 %v6307_v59  ;;  %v6308_v16 = vunpack.i.l.bf16 %v6307_v59  ;;  %v6314_v25 = vunpack.i.h.bf16 %v6312_v63  ;;  %v6313_v43 = vunpack.i.l.bf16 %v6312_v63  ;;  %v631_v63 = vld [vmem:[%s9193_s3 + $0x138] sm:$0xff] }
 0x1e6   :  { %v1503_v26 = vsel %vm1437_vm6, %v1501_v13, %v1502_v62  ;;  %v7923_v44 = vsel %vm1437_vm6, %v1502_v62, %v1504_v32  ;;  %v626_v62 = vld [vmem:[%s9193_s3 + $0x110] sm:$0xff] }
 0x1e7   :  { %v1388_v4 = vsel %vm1236_vm5, %v1380_v45, %v6309_v60  ;;  %v1268_v49 = vsel %vm1236_vm5, %v1235_v11, %v6308_v16  ;;  %5029 = vmatprep.mubr.f32.mxu1 %v1503_v26  ;;  %v627_v60 = vld [vmem:[%s9193_s3 + $0x118] sm:$0xff]  ;;  %v629_v45 = vld [vmem:[%s9193_s3 + $0x128] sm:$0xff] }
 0x1e8   :  { %5030 = vmatmul.mubr.f32.gmra.mrb[28].mxu1 %v7923_v44  ;;  %v7929_v5 = vsel %vm94_vm0, %v1268_v49, %v6313_v43  ;;  %v1396_v41 = vsel %vm94_vm0, %v1388_v4, %v6314_v25  ;;  %v5639_v16 = vpack.c.bf16 %v627_v60, %v626_v62  ;;  %v633_v25 = vld [vmem:[%s9193_s3 + $0x148] sm:$0xff]  ;;  %v635_v4 = vld [vmem:[%s9193_s3 + $0x158] sm:$0xff] }
 0x1e9   :  { %v7933_v19 = vrot.slane %v7929_v5, 4  ;;  %v1508_v10 = vrot.slane %v1396_v41, 4  ;;  %v636_v41 = vld [vmem:[%s9193_s3 + $0x160] sm:$0xff]  ;;  %v639_v62 = vld [vmem:[%s9193_s3 + $0x178] sm:$0xff] }
 0x1eb   :  { %v7937_v59 = vsel %vm1437_vm6, %v1504_v32, %v7933_v19  ;;  %v1509_v13 = vsel %vm1437_vm6, %v7933_v19, %v1508_v10  ;;  %v628_v32 = vld [vmem:[%s9193_s3 + $0x120] sm:$0xff]  ;;  %v637_v10 = vld [vmem:[%s9193_s3 + $0x168] sm:$0xff] }
 0x1ec   :  { %5032 = vmatprep.mubr.f32.mxu1 %v7937_v59  ;;  %v5643_v11 = vpack.c.bf16 %v629_v45, %v628_v32  ;;  %v641_v32 = vld [vmem:[%s9193_s3 + $0x188] sm:$0xff] }
 0x1ed   :  { %5033 = vmatmul.mubr.f32.gmra.mrb[30].mxu1 %v1509_v13  ;;  %v5659_v13 = vpack.c.bf16 %v637_v10, %v636_v41  ;;  %v645_v41 = vld [vmem:[%s9193_s3 + $0x1a8] sm:$0xff] }
 0x1ee   :  { %5067 = vmatprep.mubr.f32.mxu1 %v7315_v28  ;;  %v630_v28 = vld [vmem:[%s9193_s3 + $0x130] sm:$0xff] }
 0x1ef   :  { %v5647_v26 = vpack.c.bf16 %v631_v63, %v630_v28 }
 0x1f1   :  { %5068 = vmatmul.mubr.f32.vlgmr.msra.gmra.mrb[0].mxu1 %v7318_v61 }
 0x1f2   :  { %5638 = vmatpush3.bf16.msra.mxu1 %v7606_v21  ;;  %5070 = vmatprep.mubr.f32.mxu1 %v7352_v30  ;;  %v632_v21 = vld [vmem:[%s9193_s3 + $0x140] sm:$0xff] }
 0x1f3   :  { %5640 = vmatprep.subr.bf16.mxu1 %v5639_v16  ;;  %v5651_v43 = vpack.c.bf16 %v633_v25, %v632_v21  ;;  %v643_v25 = vld [vmem:[%s9193_s3 + $0x198] sm:$0xff] }
 0x1f5   :  { %5071 = vmatmul.mubr.f32.gmra.mrb[2].mxu1 %v7355_v50 }
 0x1f6   :  { %5073 = vmatprep.mubr.f32.mxu1 %v7437_v8  ;;  %5642 = vmatpush3.bf16.msra.mxu1 %v5639_v16  ;;  %v634_v8 = vld [vmem:[%s9193_s3 + $0x150] sm:$0xff]  ;;  %v640_v16 = vld [vmem:[%s9193_s3 + $0x180] sm:$0xff] }
 0x1f7   :  { %5644 = vmatprep.subr.bf16.mxu1 %v5643_v11  ;;  %v5655_v49 = vpack.c.bf16 %v635_v4, %v634_v8  ;;  %v5667_v45 = vpack.c.bf16 %v641_v32, %v640_v16  ;;  %v648_v16 = vld [vmem:[%s9193_s3 + $0x1c0] sm:$0xff]  ;;  %v649_v32 = vld [vmem:[%s9193_s3 + $0x1c8] sm:$0xff] }
 0x1f9   :  { %5074 = vmatmul.mubr.f32.gmra.mrb[4].mxu1 %v7449_v48 }
 0x1fa   :  { %5076 = vmatprep.mubr.f32.mxu1 %v7452_v7  ;;  %5646 = vmatpush3.bf16.msra.mxu1 %v5643_v11  ;;  %v2057_v11 = vpop.permute.xlu1 %2056 }
 0x1fb   :  { %5648 = vmatprep.subr.bf16.mxu1 %v5647_v26 }
 0x1fd   :  { %5077 = vmatmul.mubr.f32.gmra.mrb[6].mxu1 %v7491_v15 }
 0x1fe   :  { %5079 = vmatprep.mubr.f32.mxu1 %v7572_v27  ;;  %5650 = vmatpush3.bf16.msra.mxu1 %v5647_v26  ;;  %v638_v27 = vld [vmem:[%s9193_s3 + $0x170] sm:$0xff] }
 0x1ff   :  { %5652 = vmatprep.subr.bf16.mxu1 %v5651_v43  ;;  %v5663_v60 = vpack.c.bf16 %v639_v62, %v638_v27  ;;  %v646_v27 = vld [vmem:[%s9193_s3 + $0x1b0] sm:$0xff]  ;;  %v647_v62 = vld [vmem:[%s9193_s3 + $0x1b8] sm:$0xff] }
 0x201   :  { %5080 = vmatmul.mubr.f32.gmra.mrb[8].mxu1 %v7569_v29 }
 0x202   :  { %5082 = vmatprep.mubr.f32.mxu1 %v7586_v58  ;;  %5654 = vmatpush3.bf16.msra.mxu1 %v5651_v43 }
 0x203   :  { %5656 = vmatprep.subr.bf16.mxu1 %v5655_v49 }
 0x205   :  { %5083 = vmatmul.mubr.f32.gmra.mrb[10].mxu1 %v7589_v17 }
 0x206   :  { %5085 = vmatprep.mubr.f32.mxu1 %v7648_v33  ;;  %5658 = vmatpush3.bf16.msra.mxu1 %v5655_v49  ;;  %v2017_v33 = vpop.permute.xlu0 %2016  ;;  %v644_v49 = vld [vmem:[%s9193_s3 + $0x1a0] sm:$0xff] }
 0x207   :  { %5660 = vmatprep.subr.bf16.mxu1 %v5659_v13  ;;  %v2120_v8 = vsel %vm1203_vm4, %v6753_v46, %v2017_v33 }
 0x209   :  { %5086 = vmatmul.mubr.f32.gmra.mrb[12].mxu1 %v7656_v54 }
 0x20a   :  { %5088 = vmatprep.mubr.f32.mxu1 %v7659_v23  ;;  %5662 = vmatpush3.bf16.msra.mxu1 %v5659_v13  ;;  %v2097_v28 = vpop.permute.xlu0 %2096  ;;  %v5675_v13 = vpack.c.bf16 %v645_v41, %v644_v49 }
 0x20b   :  { %5664 = vmatprep.subr.bf16.mxu1 %v5663_v60 }
 0x20d   :  { %5089 = vmatmul.mubr.f32.gmra.mrb[14].mxu1 %v7685_v37 }
 0x20e   :  { %5091 = vmatprep.mubr.f32.mxu1 %v7724_v47  ;;  %5666 = vmatpush3.bf16.msra.mxu1 %v5663_v60  ;;  %v2019_v47 = vpop.permute.xlu1 %2018  ;;  %v2059_v63 = vpop.permute.xlu0 %2058 }
 0x20f   :  { %5668 = vmatprep.subr.bf16.mxu1 %v5667_v45  ;;  %v2121_v60 = vsel %vm1203_vm4, %v6815_v42, %v2019_v47  ;;  %v651_v47 = vld [vmem:[%s9193_s3 + $0x1d8] sm:$0xff] }
 0x211   :  { %5092 = vmatmul.mubr.f32.gmra.mrb[16].mxu1 %v7727_v18 }
 0x212   :  { %5094 = vmatprep.mubr.f32.mxu1 %v7737_v38  ;;  %v2099_v26 = vpop.permute.xlu1 %2098 }
 0x215   :  { %5095 = vmatmul.mubr.f32.gmra.mrb[18].mxu1 %v7740_v35 }
 0x216   :  { %5097 = vmatprep.mubr.f32.mxu1 %v7780_v12  ;;  %v2021_v12 = vpop.permute.xlu0 %2020  ;;  %v2061_v21 = vpop.permute.xlu1 %2060 }
 0x219   :  { %5098 = vmatmul.mubr.f32.gmra.mrb[20].mxu1 %v7793_v1 }
 0x21a   :  { %5100 = vmatprep.mubr.f32.mxu1 %v7796_v52  ;;  %v2101_v43 = vpop.permute.xlu0 %2100  ;;  %v2023_v4 = vpop.permute.xlu1 %2022 }
 0x21d   :  { %5101 = vmatmul.mubr.f32.gmra.mrb[22].mxu1 %v7822_v36 }
 0x21e   :  { %5103 = vmatprep.mubr.f32.mxu1 %v7861_v6  ;;  %v642_v6 = vld [vmem:[%s9193_s3 + $0x190] sm:$0xff]  ;;  %v2063_v10 = vpop.permute.xlu0 %2062 }
 0x221   :  { %5104 = vmatmul.mubr.f32.gmra.mrb[24].mxu1 %v7864_v2 }
 0x222   :  { %5106 = vmatprep.mubr.f32.mxu1 %v7871_v3  ;;  %v2025_v33 = vpop.permute.xlu0 %2024 }
 0x225   :  { %5107 = vmatmul.mubr.f32.gmra.mrb[26].mxu1 %v7874_v53 }
 0x226   :  { %5109 = vmatprep.mubr.f32.mxu1 %v7904_v40  ;;  %v5671_v40 = vpack.c.bf16 %v643_v25, %v642_v6  ;;  %v653_v6 = vld [vmem:[%s9193_s3 + $0x1e8] sm:$0xff] }
 0x229   :  { %5110 = vmatmul.mubr.f32.gmra.mrb[28].mxu1 %v7909_v0 }
 0x22a   :  { %5112 = vmatprep.mubr.f32.mxu1 %v7912_v39 }
 0x22d   :  { %5113 = vmatmul.mubr.f32.gmra.mrb[30].mxu1 %v7929_v5 }
 0x22e   :  { %5147 = vmatprep.mubr.f32.mxu1 %v7318_v61  ;;  %v2128_v61 = vsel %vm1236_vm5, %v2120_v8, %v2057_v11  ;;  %v655_v8 = vld [vmem:[%s9193_s3 + $0x1f8] sm:$0xff] }
 0x22f   :  { %v8042_v46 = vsel %vm94_vm0, %v2128_v61, %v2097_v28  ;;  %v650_v28 = vld [vmem:[%s9193_s3 + $0x1d0] sm:$0xff] }
 0x231   :  { %5148 = vmatmul.mubr.f32.vlgmr.msra.gmra.mrb[0].mxu1 %v7352_v30  ;;  %v2103_v30 = vpop.permute.xlu1 %2102 }
 0x232   :  { %5670 = vmatpush3.bf16.msra.mxu1 %v5667_v45  ;;  %5150 = vmatprep.mubr.f32.mxu1 %v7355_v50  ;;  %v5679_v50 = vpack.c.bf16 %v647_v62, %v646_v27  ;;  %v2129_v45 = vsel %vm1236_vm5, %v2121_v60, %v2059_v63  ;;  %v2122_v63 = vsel %vm1203_vm4, %v9345_v20, %v2021_v12  ;;  %v654_v12 = vld [vmem:[%s9193_s3 + $0x1f0] sm:$0xff] }
 0x233   :  { %5672 = vmatprep.subr.bf16.mxu1 %v5671_v40  ;;  %v8064_v42 = vsel %vm94_vm0, %v2129_v45, %v2099_v26  ;;  %v652_v26 = vld [vmem:[%s9193_s3 + $0x1e0] sm:$0xff] }
 0x234   :  { %v9401_v45 = vld [vmem:[#allocation32_spill] sm:$0xff] }
 0x235   :  { %5151 = vmatmul.mubr.f32.gmra.mrb[2].mxu1 %v8042_v46  ;;  %v2065_v11 = vpop.permute.xlu1 %2064 }
 0x236   :  { %5153 = vmatprep.mubr.f32.mxu1 %v7449_v48  ;;  %5674 = vmatpush3.bf16.msra.mxu1 %v5671_v40  ;;  %v5683_v48 = vpack.c.bf16 %v649_v32, %v648_v16  ;;  %v5691_v40 = vpack.c.bf16 %v653_v6, %v652_v26  ;;  %v9405_v6 = vld [vmem:[#allocation33_spill] sm:$0xff] }
 0x237   :  { %5676 = vmatprep.subr.bf16.mxu1 %v5675_v13 }
 0x239   :  { %5154 = vmatmul.mubr.f32.gmra.mrb[4].mxu1 %v7452_v7  ;;  %v2105_v7 = vpop.permute.xlu0 %2104  ;;  %v2027_v25 = vpop.permute.xlu1 %2026 }
 0x23a   :  { %5156 = vmatprep.mubr.f32.mxu1 %v7491_v15  ;;  %5678 = vmatpush3.bf16.msra.mxu1 %v5675_v13  ;;  %v5687_v15 = vpack.c.bf16 %v651_v47, %v650_v28  ;;  %v2125_v13 = vsel %vm1203_vm4, %v9386_v34, %v2027_v25 }
 0x23b   :  { %5680 = vmatprep.subr.bf16.mxu1 %v5679_v50 }
 0x23d   :  { %5157 = vmatmul.mubr.f32.gmra.mrb[6].mxu1 %v8064_v42 }
 0x23e   :  { %5159 = vmatprep.mubr.f32.mxu1 %v7569_v29  ;;  %5682 = vmatpush3.bf16.msra.mxu1 %v5679_v50  ;;  %v2130_v29 = vsel %vm1236_vm5, %v2122_v63, %v2061_v21  ;;  %v2123_v21 = vsel %vm1203_vm4, %v9355_v14, %v2023_v4  ;;  %v2124_v14 = vsel %vm1203_vm4, %v9374_v57, %v2025_v33  ;;  %v9403_v33 = vld [vmem:[#allocation38_spill] sm:$0xff] }
 0x23f   :  { %5684 = vmatprep.subr.bf16.mxu1 %v5683_v48  ;;  %v8086_v20 = vsel %vm94_vm0, %v2130_v29, %v2101_v43  ;;  %v2107_v43 = vpop.permute.xlu1 %2106  ;;  %v2131_v49 = vsel %vm1236_vm5, %v2123_v21, %v2063_v10  ;;  %v9406_v29 = vld [vmem:[#allocation28_spill] sm:$0xff] }
 0x240   :  { %v8102_v61 = vsel %vm94_vm0, %v2131_v49, %v2103_v30  ;;  %v2521_v21 = vrot.slane %v8086_v20, 4  ;;  %v9408_v49 = vld [vmem:[#allocation5_spill] sm:$0xff] }
 0x241   :  { %5160 = vmatmul.mubr.f32.gmra.mrb[8].mxu1 %v7586_v58  ;;  %v2067_v58 = vpop.permute.xlu0 %2066 }
 0x242   :  { %5162 = vmatprep.mubr.f32.mxu1 %v7589_v17  ;;  %5686 = vmatpush3.bf16.msra.mxu1 %v5683_v48  ;;  %v5695_v17 = vpack.c.bf16 %v655_v8, %v654_v12  ;;  %v2133_v57 = vsel %vm1236_vm5, %v2125_v13, %v2067_v58 }
 0x243   :  { %5688 = vmatprep.subr.bf16.mxu1 %v5687_v15 }
 0x245   :  { %5163 = vmatmul.mubr.f32.gmra.mrb[10].mxu1 %v8086_v20  ;;  %v2029_v41 = vpop.permute.xlu0 %2028 }
 0x246   :  { %5165 = vmatprep.mubr.f32.mxu1 %v7656_v54  ;;  %5690 = vmatpush3.bf16.msra.mxu1 %v5687_v15  ;;  %v2069_v54 = vpop.permute.xlu1 %2068  ;;  %v9404_v15 = vld [vmem:[#allocation40_spill] sm:$0xff] }
 0x247   :  { %5692 = vmatprep.subr.bf16.mxu1 %v5691_v40 }
 0x249   :  { %5166 = vmatmul.mubr.f32.gmra.mrb[12].mxu1 %v7659_v23  ;;  %v2109_v4 = vpop.permute.xlu0 %2108  ;;  %v2132_v23 = vsel %vm1236_vm5, %v2124_v14, %v2065_v11 }
 0x24a   :  { %5168 = vmatprep.mubr.f32.mxu1 %v7685_v37  ;;  %5694 = vmatpush3.bf16.msra.mxu1 %v5691_v40  ;;  %v2031_v37 = vpop.permute.xlu1 %2030  ;;  %v8112_v10 = vsel %vm94_vm0, %v2132_v23, %v2105_v7  ;;  %v9407_v40 = vld [vmem:[#allocation21_spill] sm:$0xff]  ;;  %v9410_v23 = vld [vmem:[#allocation6_spill] sm:$0xff] }
 0x24b   :  { %5696 = vmatprep.subr.bf16.mxu1 %v5695_v17 }
 0x24d   :  { %5169 = vmatmul.mubr.f32.gmra.mrb[14].mxu1 %v8102_v61 }
 0x24e   :  { %5171 = vmatprep.mubr.f32.mxu1 %v7727_v18  ;;  %5698 = vmatpush3.bf16.msra.mxu1 %v5695_v17  ;;  %v2071_v18 = vpop.permute.xlu0 %2070 }
 0x251   :  { %5172 = vmatmul.mubr.f32.gmra.mrb[16].mxu1 %v7737_v38  ;;  %v2111_v38 = vpop.permute.xlu1 %2110 }
 0x252   :  { %5174 = vmatprep.mubr.f32.mxu1 %v7740_v35  ;;  %v8122_v35 = vsel %vm94_vm0, %v2133_v57, %v2107_v43  ;;  %v2402_v27 = vpop.permute.xlu0 %2401 }
 0x255   :  { %5175 = vmatmul.mubr.f32.gmra.mrb[18].mxu1 %v8112_v10  ;;  %v2426_v62 = vpop.permute.xlu1 %2425 }
 0x256   :  { %5177 = vmatprep.mubr.f32.mxu1 %v7793_v1  ;;  %v2126_v1 = vsel %vm1203_vm4, %v9400_v9, %v2029_v41 }
 0x257   :  { %v2134_v34 = vsel %vm1236_vm5, %v2126_v1, %v2069_v54  ;;  %v9409_v54 = vld [vmem:[#allocation34_spill] sm:$0xff]  ;;  %v9412_v1 = vld [vmem:[#allocation8_spill] sm:$0xff] }
 0x259   :  { %5178 = vmatmul.mubr.f32.gmra.mrb[20].mxu1 %v7796_v52  ;;  %v2450_v52 = vpop.permute.xlu0 %2449  ;;  %v2404_v30 = vpop.permute.xlu1 %2403 }
 0x25a   :  { %5180 = vmatprep.mubr.f32.mxu1 %v7822_v36  ;;  %v8132_v36 = vsel %vm94_vm0, %v2134_v34, %v2109_v4  ;;  %v9413_v34 = vld [vmem:[#allocation35_spill] sm:$0xff] }
 0x25d   :  { %5181 = vmatmul.mubr.f32.gmra.mrb[22].mxu1 %v8122_v35  ;;  %v2452_v60 = vpop.permute.xlu1 %2451 }
 0x25e   :  { %5183 = vmatprep.mubr.f32.mxu1 %v7864_v2  ;;  %v2127_v2 = vsel %vm1203_vm4, %v7226_v55, %v2031_v37  ;;  %v2513_v55 = vrot.slane %v8042_v46, 4  ;;  %v9411_v37 = vld [vmem:[#allocation24_spill] sm:$0xff] }
 0x25f   :  { %v2135_v9 = vsel %vm1236_vm5, %v2127_v2, %v2071_v18  ;;  %v2522_v18 = vsel %vm1437_vm6, %v9411_v37, %v2521_v21  ;;  %v9414_v2 = vld [vmem:[#allocation9_spill] sm:$0xff] }
 0x260   :  { %v8145_v16 = vsel %vm94_vm0, %v2135_v9, %v2111_v38  ;;  %v2514_v48 = vsel %vm1437_vm6, %v9403_v33, %v2513_v55  ;;  %v9415_v9 = vld [vmem:[#allocation7_spill] sm:$0xff]  ;;  %v9418_v33 = vld [vmem:[#allocation10_spill] sm:$0xff] }
 0x261   :  { %5184 = vmatmul.mubr.f32.gmra.mrb[24].mxu1 %v7871_v3  ;;  %v2473_v3 = vsel %vm1203_vm4, %v7256_v31, %v2402_v27  ;;  %v2430_v28 = vpop.permute.xlu1 %2429  ;;  %v2525_v27 = vrot.slane %v8102_v61, 4 }
 0x262   :  { %5186 = vmatprep.mubr.f32.mxu1 %v7874_v53  ;;  %v2428_v53 = vpop.permute.xlu0 %2427  ;;  %v2481_v50 = vsel %vm1236_vm5, %v2473_v3, %v2426_v62 }
 0x263   :  { %v2526_v3 = vsel %vm1437_vm6, %v9415_v9, %v2525_v27  ;;  %v2916_v9 = vld [vmem:[%s9195_s5 + $0xd8] sm:$0xff] }
 0x265   :  { %5187 = vmatmul.mubr.f32.gmra.mrb[26].mxu1 %v8132_v36  ;;  %v2408_v26 = vpop.permute.xlu1 %2407 }
 0x266   :  { %5189 = vmatprep.mubr.f32.mxu1 %v7909_v0  ;;  %v2489_v0 = vsel %vm94_vm0, %v2481_v50, %v2450_v52  ;;  %v2406_v31 = vpop.permute.xlu0 %2405  ;;  %v2476_v14 = vsel %vm1203_vm4, %v9409_v54, %v2408_v26  ;;  %v9421_v26 = vld [vmem:[#allocation37_spill] sm:$0xff] }
 0x267   :  { %v2515_v32 = vrot.slane %v2489_v0, 4  ;;  %v2475_v25 = vsel %vm1203_vm4, %v9405_v6, %v2406_v31  ;;  %v9416_v31 = vld [vmem:[#allocation13_spill] sm:$0xff] }
 0x268   :  { %v2483_v58 = vsel %vm1236_vm5, %v2475_v25, %v2430_v28 }
 0x269   :  { %5190 = vmatmul.mubr.f32.gmra.mrb[28].mxu1 %v7912_v39  ;;  %v2474_v39 = vsel %vm1203_vm4, %v9401_v45, %v2404_v30  ;;  %v2516_v46 = vsel %vm1437_vm6, %v2513_v55, %v2515_v32  ;;  %v2456_v43 = vpop.permute.xlu1 %2455  ;;  %v2529_v55 = vrot.slane %v8112_v10, 4 }
 0x26a   :  { %5192 = vmatprep.mubr.f32.mxu1 %v7929_v5  ;;  %v9402_v5 = vld [vmem:[#allocation39_spill] sm:$0xff]  ;;  %v2482_v11 = vsel %vm1236_vm5, %v2474_v39, %v2428_v53  ;;  %v2454_v7 = vpop.permute.xlu0 %2453  ;;  %v9417_v39 = vld [vmem:[#allocation36_spill] sm:$0xff] }
 0x26b   :  { %v2490_v47 = vsel %vm94_vm0, %v2482_v11, %v2452_v60 }
 0x26c   :  { %v2519_v63 = vrot.slane %v2490_v47, 4 }
 0x26d   :  { %5193 = vmatmul.mubr.f32.gmra.mrb[30].mxu1 %v8145_v16  ;;  %v2434_v57 = vpop.permute.xlu1 %2433 }
 0x26e   :  { %5227 = vmatprep.mubr.f32.mxu1 %v7378_v22  ;;  %v2517_v22 = vrot.slane %v8064_v42, 4  ;;  %v2432_v8 = vpop.permute.xlu0 %2431  ;;  %v2491_v42 = vsel %vm94_vm0, %v2483_v58, %v2454_v7  ;;  %v2533_v7 = vrot.slane %v8122_v35, 4 }
 0x26f   :  { %v2523_v41 = vrot.slane %v2491_v42, 4  ;;  %v2484_v13 = vsel %vm1236_vm5, %v2476_v14, %v2432_v8  ;;  %v2537_v42 = vrot.slane %v8132_v36, 4 }
 0x270   :  { %v2518_v12 = vsel %vm1437_vm6, %v9407_v40, %v2517_v22  ;;  %v2520_v17 = vsel %vm1437_vm6, %v2517_v22, %v2519_v63  ;;  %v2492_v38 = vsel %vm94_vm0, %v2484_v13, %v2456_v43  ;;  %v9423_v40 = vld [vmem:[#allocation12_spill] sm:$0xff] }
 0x271   :  { %5228 = vmatmul.mubr.f32.vlgmr.msra.gmra.mrb[0].mxu1 %v9402_v5  ;;  %v2524_v20 = vsel %vm1437_vm6, %v2521_v21, %v2523_v41  ;;  %v2527_v52 = vrot.slane %v2492_v38, 4  ;;  %v2412_v53 = vpop.permute.xlu1 %2411  ;;  %v2538_v54 = vsel %vm1437_vm6, %v7879_v56, %v2537_v42 }
 0x272   :  { %5230 = vmatprep.mubr.f32.mxu1 %v2514_v48  ;;  %v2410_v4 = vpop.permute.xlu0 %2409  ;;  %v2478_v5 = vsel %vm1203_vm4, %v9417_v39, %v2412_v53  ;;  %v9419_v48 = vld [vmem:[#allocation11_spill] sm:$0xff]  ;;  %v2917_v53 = vld [vmem:[%s9195_s5 + $0xe0] sm:$0xff] }
 0x273   :  { %v2477_v30 = vsel %vm1203_vm4, %v9413_v34, %v2410_v4  ;;  %v2528_v60 = vsel %vm1437_vm6, %v2525_v27, %v2527_v52  ;;  %v2530_v11 = vsel %vm1437_vm6, %v9419_v48, %v2529_v55  ;;  %v2911_v27 = vld [vmem:[%s9195_s5 + $0xb0] sm:$0xff]  ;;  %v2914_v34 = vld [vmem:[%s9195_s5 + $0xc8] sm:$0xff]  ;;  %v2920_v48 = vld [vmem:[%s9195_s5 + $0xf8] sm:$0xff] }
 0x274   :  { %v2485_v50 = vsel %vm1236_vm5, %v2477_v30, %v2434_v57  ;;  %v2909_v57 = vld [vmem:[%s9195_s5 + $0xa0] sm:$0xff] }
 0x275   :  { %5231 = vmatmul.mubr.f32.gmra.mrb[2].mxu1 %v2516_v46  ;;  %v2460_v45 = vpop.permute.xlu1 %2459 }
 0x276   :  { %5233 = vmatprep.mubr.f32.mxu1 %v9404_v15  ;;  %v2458_v62 = vpop.permute.xlu0 %2457  ;;  %v9420_v15 = vld [vmem:[#allocation14_spill] sm:$0xff] }
 0x277   :  { %v2493_v61 = vsel %vm94_vm0, %v2485_v50, %v2458_v62  ;;  %v2913_v62 = vld [vmem:[%s9195_s5 + $0xc0] sm:$0xff]  ;;  %v2918_v50 = vld [vmem:[%s9195_s5 + $0xe8] sm:$0xff] }
 0x278   :  { %v2531_v32 = vrot.slane %v2493_v61, 4  ;;  %v5715_v30 = vpack.c.bf16 %v2914_v34, %v2913_v62  ;;  %v8270_v61 = vld [vmem:[%s9194_s4] ss:$0 sm:$0xff] }
 0x279   :  { %5234 = vmatmul.mubr.f32.gmra.mrb[4].mxu1 %v9406_v29  ;;  %v2438_v22 = vpop.permute.xlu1 %2437  ;;  %v9422_v29 = vld [vmem:[#allocation15_spill] sm:$0xff] }
 0x27a   :  { %5236 = vmatprep.mubr.f32.mxu1 %v2518_v12  ;;  %v2436_v0 = vpop.permute.xlu0 %2435  ;;  %v2532_v47 = vsel %vm1437_vm6, %v2529_v55, %v2531_v32  ;;  %v2534_v12 = vsel %vm1437_vm6, %v9423_v40, %v2533_v7 }
 0x27b   :  { %v2486_v28 = vsel %vm1236_vm5, %v2478_v5, %v2436_v0 }
 0x27c   :  { %v2494_v10 = vsel %vm94_vm0, %v2486_v28, %v2460_v45 }
 0x27d   :  { %5237 = vmatmul.mubr.f32.gmra.mrb[6].mxu1 %v2520_v17  ;;  %v2535_v63 = vrot.slane %v2494_v10, 4  ;;  %v2416_v8 = vpop.permute.xlu1 %2415 }
 0x27e   :  { %5239 = vmatprep.mubr.f32.mxu1 %v9408_v49  ;;  %v2414_v46 = vpop.permute.xlu0 %2413  ;;  %v9424_v49 = vld [vmem:[#allocation20_spill] sm:$0xff] }
 0x27f   :  { %v2479_v6 = vsel %vm1203_vm4, %v9421_v26, %v2414_v46  ;;  %v2536_v35 = vsel %vm1437_vm6, %v2533_v7, %v2535_v63  ;;  %v2480_v41 = vsel %vm1203_vm4, %v9424_v49, %v2416_v8 }
 0x280   :  { %v2487_v58 = vsel %vm1236_vm5, %v2479_v6, %v2438_v22 }
 0x281   :  { %5240 = vmatmul.mubr.f32.gmra.mrb[8].mxu1 %v9410_v23  ;;  %v2464_v14 = vpop.permute.xlu1 %2463 }
 0x282   :  { %5242 = vmatprep.mubr.f32.mxu1 %v2522_v18  ;;  %v2462_v25 = vpop.permute.xlu0 %2461  ;;  %v2905_v18 = vld [vmem:[%s9195_s5 + $0x80] sm:$0xff] }
 0x283   :  { %v2495_v17 = vsel %vm94_vm0, %v2487_v58, %v2462_v25 }
 0x284   :  { %v2539_v43 = vrot.slane %v2495_v17, 4 }
 0x285   :  { %5243 = vmatmul.mubr.f32.gmra.mrb[10].mxu1 %v2524_v20  ;;  %v2910_v20 = vld [vmem:[%s9195_s5 + $0xa8] sm:$0xff] }
 0x286   :  { %5245 = vmatprep.mubr.f32.mxu1 %v9412_v1  ;;  %v2440_v21 = vpop.permute.xlu0 %2439  ;;  %v2540_v23 = vsel %vm1437_vm6, %v2537_v42, %v2539_v43  ;;  %v5707_v38 = vpack.c.bf16 %v2910_v20, %v2909_v57  ;;  %v2912_v1 = vld [vmem:[%s9195_s5 + $0xb8] sm:$0xff] }
 0x287   :  { %v2488_v4 = vsel %vm1236_vm5, %v2480_v41, %v2440_v21  ;;  %v5711_v52 = vpack.c.bf16 %v2912_v1, %v2911_v27  ;;  %v2890_v27 = vld [vmem:[%s9195_s5 + $0x8] sm:$0xff] }
 0x288   :  { %v2496_v36 = vsel %vm94_vm0, %v2488_v4, %v2464_v14 }
 0x289   :  { %5246 = vmatmul.mubr.f32.gmra.mrb[12].mxu1 %v9414_v2  ;;  %v2543_v37 = vrot.slane %v2496_v36, 4  ;;  %v2915_v2 = vld [vmem:[%s9195_s5 + $0xd0] sm:$0xff] }
 0x28a   :  { %5248 = vmatprep.mubr.f32.mxu1 %v2526_v3  ;;  %v5719_v3 = vpack.c.bf16 %v2916_v9, %v2915_v2 }
 0x28d   :  { %5249 = vmatmul.mubr.f32.gmra.mrb[14].mxu1 %v2528_v60  ;;  %v5723_v60 = vpack.c.bf16 %v2918_v50, %v2917_v53 }
 0x28e   :  { %5251 = vmatprep.mubr.f32.mxu1 %v9416_v31 }
 0x291   :  { %5252 = vmatmul.mubr.f32.gmra.mrb[16].mxu1 %v9418_v33  ;;  %v2919_v33 = vld [vmem:[%s9195_s5 + $0xf0] sm:$0xff] }
 0x292   :  { %5254 = vmatprep.mubr.f32.mxu1 %v2530_v11  ;;  %v5727_v46 = vpack.c.bf16 %v2920_v48, %v2919_v33 }
 0x295   :  { %5255 = vmatmul.mubr.f32.gmra.mrb[18].mxu1 %v2532_v47 }
 0x296   :  { %5257 = vmatprep.mubr.f32.mxu1 %v9420_v15 }
 0x299   :  { %5258 = vmatmul.mubr.f32.gmra.mrb[20].mxu1 %v9422_v29 }
 0x29a   :  { %5260 = vmatprep.mubr.f32.mxu1 %v2534_v12 }
 0x29d   :  { %5261 = vmatmul.mubr.f32.gmra.mrb[22].mxu1 %v2536_v35 }
 0x29e   :  { %5263 = vmatprep.mubr.f32.mxu1 %v7884_v51  ;;  %v2541_v51 = vrot.slane %v8145_v16, 4  ;;  %v2906_v16 = vld [vmem:[%s9195_s5 + $0x88] sm:$0xff] }
 0x29f   :  { %v5699_v13 = vpack.c.bf16 %v2906_v16, %v2905_v18 }
 0x2a0   :  { %v2544_v56 = vsel %vm1437_vm6, %v2541_v51, %v2543_v37 }
 0x2a1   :  { %5264 = vmatmul.mubr.f32.gmra.mrb[24].mxu1 %v7888_v24  ;;  %v2542_v24 = vsel %vm1437_vm6, %v7933_v19, %v2541_v51  ;;  %5700 = vmatprep.subr.bf16.mxu0 %v5699_v13  ;;  %v2908_v19 = vld [vmem:[%s9195_s5 + $0x98] sm:$0xff] }
 0x2a2   :  { %5266 = vmatprep.mubr.f32.mxu1 %v2538_v54  ;;  %5827 = vmatprep.subr.bf16.mxu1 %v5699_v13 }
 0x2a3   :  { %5702 = vmatpush3.bf16.msra.mxu0 %v5699_v13  ;;  %5835 = vmatpush3.bf16.msra.mxu1 %v5699_v13 }
 0x2a5   :  { %5267 = vmatmul.mubr.f32.gmra.mrb[26].mxu1 %v2540_v23 }
 0x2a6   :  { %5269 = vmatprep.mubr.f32.mxu1 %v7923_v44  ;;  %v2907_v44 = vld [vmem:[%s9195_s5 + $0x90] sm:$0xff] }
 0x2a9   :  { %5270 = vmatmul.mubr.f32.gmra.mrb[28].mxu1 %v7937_v59  ;;  %v5703_v59 = vpack.c.bf16 %v2908_v19, %v2907_v44 }
 0x2aa   :  { %5272 = vmatprep.mubr.f32.mxu1 %v2542_v24 }
 0x2ab   :  { %5704 = vmatprep.subr.bf16.mxu0 %v5703_v59  ;;  %5828 = vmatprep.subr.bf16.mxu1 %v5703_v59 }
 0x2ac   :  { %5706 = vmatpush3.bf16.msra.mxu0 %v5703_v59  ;;  %5836 = vmatpush3.bf16.msra.mxu1 %v5703_v59 }
 0x2ad   :  { %5273 = vmatmul.mubr.f32.gmra.mrb[30].mxu1 %v2544_v56  ;;  %5708 = vmatprep.subr.bf16.mxu0 %v5707_v38 }
 0x2ae   :  { %5829 = vmatprep.subr.bf16.mxu1 %v5707_v38 }
 0x2b0   :  { %5710 = vmatpush3.bf16.msra.mxu0 %v5707_v38  ;;  %5837 = vmatpush3.bf16.msra.mxu1 %v5707_v38  ;;  %v2889_v38 = vld [vmem:[%s9195_s5] sm:$0xff] }
 0x2b1   :  { %5712 = vmatprep.subr.bf16.mxu0 %v5711_v52  ;;  %5830 = vmatprep.subr.bf16.mxu1 %v5711_v52  ;;  %v8354_v2 = vpack.c.bf16 %v2890_v27, %v2889_v38 }
 0x2b4   :  { %5714 = vmatpush3.bf16.msra.mxu0 %v5711_v52  ;;  %5838 = vmatpush3.bf16.msra.mxu1 %v5711_v52 }
 0x2b5   :  { %5716 = vmatprep.subr.bf16.mxu0 %v5715_v30  ;;  %5831 = vmatprep.subr.bf16.mxu1 %v5715_v30 }
 0x2b8   :  { %5718 = vmatpush3.bf16.msra.mxu0 %v5715_v30  ;;  %5839 = vmatpush3.bf16.msra.mxu1 %v5715_v30 }
 0x2b9   :  { %5720 = vmatprep.subr.bf16.mxu0 %v5719_v3  ;;  %5832 = vmatprep.subr.bf16.mxu1 %v5719_v3 }
 0x2bc   :  { %5722 = vmatpush3.bf16.msra.mxu0 %v5719_v3  ;;  %5840 = vmatpush3.bf16.msra.mxu1 %v5719_v3 }
 0x2bd   :  { %5724 = vmatprep.subr.bf16.mxu0 %v5723_v60  ;;  %5833 = vmatprep.subr.bf16.mxu1 %v5723_v60 }
 0x2c0   :  { %5726 = vmatpush3.bf16.msra.mxu0 %v5723_v60  ;;  %5841 = vmatpush3.bf16.msra.mxu1 %v5723_v60 }
 0x2c1   :  { %5728 = vmatprep.subr.bf16.mxu0 %v5727_v46  ;;  %5834 = vmatprep.subr.bf16.mxu1 %v5727_v46 }
 0x2c4   :  { %5730 = vmatpush3.bf16.msra.mxu0 %v5727_v46  ;;  %5842 = vmatpush3.bf16.msra.mxu1 %v5727_v46 }
 0x2c5   :  { %5732 = vmatprep.subr.bf16.mxu0 %v8354_v2 }
 0x344   :  { %v5229_v0 = vpop.f32.mrb[0].mxu1 }
 0x345   :  { %v8273_v55 = vadd.f32 %v5229_v0, %v8270_v61  ;;  %v2627_v31 = vpop.f32.mrb[1].mxu1 }
 0x346   :  { %v8276_v32 = vadd.f32 %v8270_v61, %v2627_v31 }
 0x347   :  { %v2858_v45 = vmax.f32 %v8273_v55, 0.0 }
 0x348   :  { %v2857_v39 = vmax.f32 %v8276_v32, 0.0  ;;  %v5232_v5 = vpop.f32.mrb[2].mxu1 }
 0x349   :  { %v8287_v11 = vadd.f32 %v5232_v5, %v8270_v61  ;;  %v2637_v28 = vpop.f32.mrb[3].mxu1  ;;  %v2986_v7 = vrot.slane %v2858_v45, 1 }
 0x34a   :  { %v8290_v47 = vadd.f32 %v8270_v61, %v2637_v28  ;;  %v2985_v22 = vrot.slane %v2857_v39, 1 }
 0x34b   :  { %v2860_v10 = vmax.f32 %v8287_v11, 0.0  ;;  %v2891_v11 = vld [vmem:[%s9195_s5 + $0x10] sm:$0xff] }
 0x34c   :  { %v2859_v15 = vmax.f32 %v8290_v47, 0.0  ;;  %v5235_v63 = vpop.f32.mrb[4].mxu1  ;;  %v2987_v8 = vsel %vm696_vm2, %v2985_v22, %v2986_v7  ;;  %v2892_v47 = vld [vmem:[%s9195_s5 + $0x18] sm:$0xff] }
 0x34d   :  { %v2990_v26 = vrot.slane %v2860_v10, 1  ;;  %v8301_v6 = vadd.f32 %v5235_v63, %v8270_v61  ;;  %v2647_v25 = vpop.f32.mrb[5].mxu1 }
 0x34e   :  { %v2988_v29 = vrot.slane %v2859_v15, 1  ;;  %v8306_v40 = vadd.f32 %v8270_v61, %v2647_v25 }
 0x34f   :  { %v2862_v12 = vmax.f32 %v8301_v6, 0.0  ;;  %v2897_v6 = vld [vmem:[%s9195_s5 + $0x40] sm:$0xff] }
 0x350   :  { %v2989_v58 = vsel %vm696_vm2, %v2986_v7, %v2988_v29  ;;  %v2991_v35 = vsel %vm696_vm2, %v2988_v29, %v2990_v26  ;;  %v2861_v17 = vmax.f32 %v8306_v40, 0.0  ;;  %v5238_v42 = vpop.f32.mrb[6].mxu1 }
 0x351   :  { %v8314_v21 = vadd.f32 %v5238_v42, %v8270_v61  ;;  %v2657_v43 = vpop.f32.mrb[7].mxu1  ;;  %v6320_v49 = vpack.i.bf16 %v2990_v26, %v2991_v35  ;;  %v6315_v41 = vpack.i.bf16 %v2989_v58, %v2987_v8  ;;  %v2993_v14 = vrot.slane %v2862_v12, 1 }
 0x352   :  { %v8317_v54 = vadd.f32 %v8270_v61, %v2657_v43  ;;  %v2992_v4 = vrot.slane %v2861_v17, 1 }
 0x353   :  { %v2864_v23 = vmax.f32 %v8314_v21, 0.0  ;;  %6321 = vrot.lane.b32.xlu1 %v6320_v49, %s6415_s26  ;;  %6316 = vrot.lane.b32.xlu0 %v6315_v41, %s6415_s26 }
 0x354   :  { %v2863_v36 = vmax.f32 %v8317_v54, 0.0  ;;  %v5241_v51 = vpop.f32.mrb[8].mxu1  ;;  %v2994_v13 = vsel %vm696_vm2, %v2992_v4, %v2993_v14 }
 0x355   :  { %v2997_v37 = vrot.slane %v2864_v23, 1  ;;  %v8330_v24 = vadd.f32 %v5241_v51, %v8270_v61  ;;  %v2667_v56 = vpop.f32.mrb[9].mxu1 }
 0x356   :  { %v2995_v18 = vrot.slane %v2863_v36, 1  ;;  %v8335_v16 = vadd.f32 %v8270_v61, %v2667_v56 }
 0x357   :  { %v2866_v59 = vmax.f32 %v8330_v24, 0.0 }
 0x358   :  { %v2996_v44 = vsel %vm696_vm2, %v2993_v14, %v2995_v18  ;;  %v2998_v19 = vsel %vm696_vm2, %v2995_v18, %v2997_v37  ;;  %v9294_v57 = vmax.f32 %v8335_v16, 0.0  ;;  %v5244_v20 = vpop.f32.mrb[10].mxu1 }
 0x359   :  { %v8349_v1 = vadd.f32 %v5244_v20, %v8270_v61  ;;  %v2677_v62 = vpop.f32.mrb[11].mxu1  ;;  %v6330_v52 = vpack.i.bf16 %v2997_v37, %v2998_v19  ;;  %v6325_v34 = vpack.i.bf16 %v2996_v44, %v2994_v13  ;;  %v3000_v3 = vrot.slane %v2866_v59, 1 }
 0x35a   :  { %v8352_v30 = vadd.f32 %v8270_v61, %v2677_v62  ;;  %v2999_v53 = vrot.slane %v9294_v57, 1 }
 0x35b   :  { %v2868_v9 = vmax.f32 %v8349_v1, 0.0  ;;  %6331 = vrot.lane.b32.xlu1 %v6330_v52, %s6415_s26  ;;  %6326 = vrot.lane.b32.xlu0 %v6325_v34, %s6415_s26  ;;  %v2899_v1 = vld [vmem:[%s9195_s5 + $0x50] sm:$0xff] }
 0x35c   :  { %v2867_v50 = vmax.f32 %v8352_v30, 0.0  ;;  %v5247_v60 = vpop.f32.mrb[12].mxu1  ;;  %v3001_v46 = vsel %vm696_vm2, %v2999_v53, %v3000_v3  ;;  %v2900_v30 = vld [vmem:[%s9195_s5 + $0x58] sm:$0xff] }
 0x35d   :  { %v3004_v0 = vrot.slane %v2868_v9, 1  ;;  %v8368_v31 = vadd.f32 %v5247_v60, %v8270_v61  ;;  %v2687_v5 = vpop.f32.mrb[13].mxu1 }
 0x35e   :  { %v3002_v33 = vrot.slane %v2867_v50, 1  ;;  %v8373_v48 = vadd.f32 %v8270_v61, %v2687_v5 }
 0x35f   :  { %v9291_v28 = vmax.f32 %v8368_v31, 0.0 }
 0x360   :  { %v3003_v7 = vsel %vm696_vm2, %v3000_v3, %v3002_v33  ;;  %v3005_v22 = vsel %vm696_vm2, %v3002_v33, %v3004_v0  ;;  %v9290_v63 = vmax.f32 %v8373_v48, 0.0  ;;  %v5250_v26 = vpop.f32.mrb[14].mxu1 }
 0x361   :  { %v8381_v25 = vadd.f32 %v5250_v26, %v8270_v61  ;;  %v2697_v29 = vpop.f32.mrb[15].mxu1  ;;  %v6340_v8 = vpack.i.bf16 %v3004_v0, %v3005_v22  ;;  %v6335_v58 = vpack.i.bf16 %v3003_v7, %v3001_v46  ;;  %v3007_v42 = vrot.slane %v9291_v28, 1 }
 0x362   :  { %v8384_v35 = vadd.f32 %v8270_v61, %v2697_v29  ;;  %v3006_v43 = vrot.slane %v9290_v63, 1 }
 0x363   :  { %v9293_v49 = vmax.f32 %v8381_v25, 0.0  ;;  %6341 = vrot.lane.b32.xlu1 %v6340_v8, %s6415_s26  ;;  %6336 = vrot.lane.b32.xlu0 %v6335_v58, %s6415_s26 }
 0x364   :  { %v9292_v41 = vmax.f32 %v8384_v35, 0.0  ;;  %v5253_v14 = vpop.f32.mrb[16].mxu1  ;;  %v3008_v13 = vsel %vm696_vm2, %v3006_v43, %v3007_v42 }
 0x365   :  { %v3011_v4 = vrot.slane %v9293_v49, 1  ;;  %v8397_v51 = vadd.f32 %v5253_v14, %v8270_v61  ;;  %v2707_v37 = vpop.f32.mrb[17].mxu1 }
 0x366   :  { %v3009_v56 = vrot.slane %v9292_v41, 1  ;;  %v8402_v18 = vadd.f32 %v8270_v61, %v2707_v37 }
 0x367   :  { %v9282_v20 = vmax.f32 %v8397_v51, 0.0 }
 0x368   :  { %v3010_v44 = vsel %vm696_vm2, %v3007_v42, %v3009_v56  ;;  %v3012_v19 = vsel %vm696_vm2, %v3009_v56, %v3011_v4  ;;  %v9280_v38 = vmax.f32 %v8402_v18, 0.0  ;;  %v5256_v27 = vpop.f32.mrb[18].mxu1 }
 0x369   :  { %v8410_v62 = vadd.f32 %v5256_v27, %v8270_v61  ;;  %v2717_v52 = vpop.f32.mrb[19].mxu1  ;;  %v6350_v34 = vpack.i.bf16 %v3011_v4, %v3012_v19  ;;  %v6345_v3 = vpack.i.bf16 %v3010_v44, %v3008_v13  ;;  %v3014_v0 = vrot.slane %v9282_v20, 1 }
 0x36a   :  { %v8413_v53 = vadd.f32 %v8270_v61, %v2717_v52  ;;  %v3013_v5 = vrot.slane %v9280_v38, 1 }
 0x36b   :  { %v9285_v60 = vmax.f32 %v8410_v62, 0.0  ;;  %6351 = vrot.lane.b32.xlu1 %v6350_v34, %s6415_s26  ;;  %6346 = vrot.lane.b32.xlu0 %v6345_v3, %s6415_s26 }
 0x36c   :  { %v9283_v33 = vmax.f32 %v8413_v53, 0.0  ;;  %v5259_v46 = vpop.f32.mrb[20].mxu1  ;;  %v3015_v42 = vsel %vm696_vm2, %v3013_v5, %v3014_v0 }
 0x36d   :  { %v3018_v7 = vrot.slane %v9285_v60, 1  ;;  %v8426_v22 = vadd.f32 %v5259_v46, %v8270_v61  ;;  %v2727_v26 = vpop.f32.mrb[21].mxu1 }
 0x36e   :  { %v3016_v29 = vrot.slane %v9283_v33, 1  ;;  %v8431_v8 = vadd.f32 %v8270_v61, %v2727_v26 }
 0x36f   :  { %v9275_v58 = vmax.f32 %v8426_v22, 0.0 }
 0x370   :  { %v3017_v43 = vsel %vm696_vm2, %v3014_v0, %v3016_v29  ;;  %v3019_v14 = vsel %vm696_vm2, %v3016_v29, %v3018_v7  ;;  %v9274_v4 = vmax.f32 %v8431_v8, 0.0  ;;  %v5262_v37 = vpop.f32.mrb[22].mxu1 }
 0x371   :  { %v8439_v56 = vadd.f32 %v5262_v37, %v8270_v61  ;;  %v2737_v13 = vpop.f32.mrb[23].mxu1  ;;  %v6360_v44 = vpack.i.bf16 %v3018_v7, %v3019_v14  ;;  %v6355_v19 = vpack.i.bf16 %v3017_v43, %v3015_v42  ;;  %v3021_v52 = vrot.slane %v9275_v58, 1 }
 0x372   :  { %v8442_v27 = vadd.f32 %v8270_v61, %v2737_v13  ;;  %v3020_v34 = vrot.slane %v9274_v4, 1 }
 0x373   :  { %v9277_v3 = vmax.f32 %v8439_v56, 0.0  ;;  %6361 = vrot.lane.b32.xlu1 %v6360_v44, %s6415_s26  ;;  %6356 = vrot.lane.b32.xlu0 %v6355_v19, %s6415_s26 }
 0x374   :  { %v9276_v0 = vmax.f32 %v8442_v27, 0.0  ;;  %v5265_v5 = vpop.f32.mrb[24].mxu1  ;;  %v3022_v43 = vsel %vm696_vm2, %v3020_v34, %v3021_v52 }
 0x375   :  { %v3025_v46 = vrot.slane %v9277_v3, 1  ;;  %v8455_v7 = vadd.f32 %v5265_v5, %v8270_v61  ;;  %v2747_v26 = vpop.f32.mrb[25].mxu1 }
 0x376   :  { %v3023_v29 = vrot.slane %v9276_v0, 1  ;;  %v8460_v42 = vadd.f32 %v8270_v61, %v2747_v26 }
 0x377   :  { %v9279_v13 = vmax.f32 %v8455_v7, 0.0 }
 0x378   :  { %v3024_v14 = vsel %vm696_vm2, %v3021_v52, %v3023_v29  ;;  %v3026_v37 = vsel %vm696_vm2, %v3023_v29, %v3025_v46  ;;  %v9278_v44 = vmax.f32 %v8460_v42, 0.0  ;;  %v5268_v19 = vpop.f32.mrb[26].mxu1 }
 0x379   :  { %v8468_v5 = vadd.f32 %v5268_v19, %v8270_v61  ;;  %v2757_v4 = vpop.f32.mrb[27].mxu1  ;;  %v6370_v58 = vpack.i.bf16 %v3025_v46, %v3026_v37  ;;  %v6365_v0 = vpack.i.bf16 %v3024_v14, %v3022_v43  ;;  %v3028_v52 = vrot.slane %v9279_v13, 1 }
 0x37a   :  { %v8471_v26 = vadd.f32 %v8270_v61, %v2757_v4  ;;  %v3027_v34 = vrot.slane %v9278_v44, 1 }
 0x37b   :  { %6371 = vrot.lane.b32.xlu1 %v6370_v58, %s6415_s26  ;;  %6366 = vrot.lane.b32.xlu0 %v6365_v0, %s6415_s26  ;;  %v9284_v29 = vmax.f32 %v8468_v5, 0.0 }
 0x37c   :  { %v9281_v19 = vmax.f32 %v8471_v26, 0.0  ;;  %v5271_v3 = vpop.f32.mrb[28].mxu1  ;;  %v3029_v14 = vsel %vm696_vm2, %v3027_v34, %v3028_v52 }
 0x37d   :  { %v8482_v46 = vadd.f32 %v5271_v3, %v8270_v61  ;;  %v2767_v4 = vpop.f32.mrb[29].mxu1  ;;  %v3032_v37 = vrot.slane %v9284_v29, 1 }
 0x37e   :  { %v3030_v58 = vrot.slane %v9281_v19, 1  ;;  %v8487_v0 = vadd.f32 %v8270_v61, %v2767_v4 }
 0x37f   :  { %v9286_v43 = vmax.f32 %v8482_v46, 0.0 }
 0x380   :  { %v3031_v44 = vsel %vm696_vm2, %v3028_v52, %v3030_v58  ;;  %v9288_v13 = vmax.f32 %v8487_v0, 0.0  ;;  %v5274_v3 = vpop.f32.mrb[30].mxu1  ;;  %v3033_v52 = vsel %vm696_vm2, %v3030_v58, %v3032_v37 }
 0x381   :  { %v3035_v38 = vrot.slane %v9286_v43, 1  ;;  %v8498_v19 = vadd.f32 %v5274_v3, %v8270_v61  ;;  %v2777_v4 = vpop.f32.mrb[31].mxu1  ;;  %v6375_v20 = vpack.i.bf16 %v3031_v44, %v3029_v14 }
 0x382   :  { %v3034_v33 = vrot.slane %v9288_v13, 1  ;;  %v8503_v34 = vadd.f32 %v8270_v61, %v2777_v4 }
 0x383   :  { %v9287_v29 = vmax.f32 %v8498_v19, 0.0  ;;  %6376 = vrot.lane.b32.xlu0 %v6375_v20, %s6415_s26 }
 0x384   :  { %v3036_v60 = vsel %vm696_vm2, %v3034_v33, %v3035_v38  ;;  %v9289_v43 = vmax.f32 %v8503_v34, 0.0 }
 0x385   :  { %v3039_v3 = vrot.slane %v9287_v29, 1  ;;  %v6380_v44 = vpack.i.bf16 %v3036_v60, %v3033_v52 }
 0x386   :  { %v3037_v14 = vrot.slane %v9289_v43, 1 }
 0x387   :  { %6381 = vrot.lane.b32.xlu1 %v6380_v44, %s6415_s26 }
 0x388   :  { %v3038_v61 = vsel %vm696_vm2, %v3035_v38, %v3037_v14  ;;  %v3040_v4 = vsel %vm696_vm2, %v3037_v14, %v3039_v3 }
 0x389   :  { %v6385_v20 = vpack.i.bf16 %v3040_v4, %v3038_v61  ;;  %v5735_v4 = vpack.c.bf16 %v2892_v47, %v2891_v11 }
 0x38b   :  { %3149 = vrot.lane.b32.xlu1 %v3032_v37, %s6415_s26  ;;  %6386 = vrot.lane.b32.xlu0 %v6385_v20, %s6415_s26  ;;  %v2893_v20 = vld [vmem:[%s9195_s5 + $0x20] sm:$0xff] }
 0x38f   :  { %3151 = vrot.lane.b32.xlu0 %v3039_v3, %s6415_s26 }
 0x3c5   :  { %v6322_v33 = vpop.permute.xlu1 %6321  ;;  %v6317_v58 = vpop.permute.xlu0 %6316 }
 0x3c6   :  { %v6324_v29 = vunpack.i.h.bf16 %v6322_v33  ;;  %v6323_v60 = vunpack.i.l.bf16 %v6322_v33  ;;  %v6319_v52 = vunpack.i.h.bf16 %v6317_v58  ;;  %v6318_v13 = vunpack.i.l.bf16 %v6317_v58  ;;  %v2894_v33 = vld [vmem:[%s9195_s5 + $0x28] sm:$0xff] }
 0x3c8   :  { %v3161_v44 = vsel %vm1236_vm5, %v2860_v10, %v6324_v29  ;;  %v8526_v38 = vsel %vm1236_vm5, %v2859_v15, %v6323_v60  ;;  %v8531_v37 = vsel %vm1236_vm5, %v2858_v45, %v6319_v52  ;;  %v8536_v3 = vsel %vm1236_vm5, %v2857_v39, %v6318_v13 }
 0x3c9   :  { %v3201_v10 = vrot.slane %v8536_v3, 2  ;;  %v3202_v55 = vrot.slane %v8531_v37, 2  ;;  %v3204_v45 = vrot.slane %v8526_v38, 2  ;;  %v3206_v15 = vrot.slane %v3161_v44, 2 }
 0x3ca   :  { %v3651_v32 = vrot.slane %v8536_v3, 4  ;;  %v3652_v39 = vrot.slane %v8531_v37, 4  ;;  %v3654_v13 = vrot.slane %v8526_v38, 4  ;;  %v3656_v29 = vrot.slane %v3161_v44, 4 }
 0x3cb   :  { %v3203_v14 = vsel %vm865_vm1, %v3201_v10, %v3202_v55  ;;  %v3205_v61 = vsel %vm865_vm1, %v3202_v55, %v3204_v45  ;;  %v3941_v11 = vrot.slane %v8536_v3, 6  ;;  %v3207_v55 = vsel %vm865_vm1, %v3204_v45, %v3206_v15  ;;  %v2896_v45 = vld [vmem:[%s9195_s5 + $0x38] sm:$0xff] }
 0x3cc   :  { %5307 = vmatprep.mubr.f32.mxu0 %v3203_v14  ;;  %v8559_v58 = vsel %vm1437_vm6, %v3651_v32, %v3652_v39  ;;  %v8562_v60 = vsel %vm1437_vm6, %v3652_v39, %v3654_v13  ;;  %v8565_v52 = vsel %vm1437_vm6, %v3654_v13, %v3656_v29  ;;  %v3942_v14 = vrot.slane %v8531_v37, 6  ;;  %v2895_v13 = vld [vmem:[%s9195_s5 + $0x30] sm:$0xff] }
 0x3cd   :  { %5308 = vmatmul.mubr.f32.vlgmr.msra.gmra.mrb[48].mxu0 %v3205_v61  ;;  %v6332_v47 = vpop.permute.xlu1 %6331  ;;  %v6327_v10 = vpop.permute.xlu0 %6326  ;;  %v3944_v43 = vrot.slane %v8526_v38, 6  ;;  %v3946_v63 = vrot.slane %v3161_v44, 6  ;;  %v5739_v15 = vpack.c.bf16 %v2894_v33, %v2893_v20  ;;  %v5743_v54 = vpack.c.bf16 %v2896_v45, %v2895_v13 }
 0x3ce   :  { %v6334_v32 = vunpack.i.h.bf16 %v6332_v47  ;;  %v6333_v28 = vunpack.i.l.bf16 %v6332_v47  ;;  %v6329_v41 = vunpack.i.h.bf16 %v6327_v10  ;;  %v6328_v39 = vunpack.i.l.bf16 %v6327_v10  ;;  %5310 = vmatprep.mubr.f32.mxu0 %v3207_v55  ;;  %5734 = vmatpush3.bf16.msra.mxu0 %v8354_v2 }
 0x3cf   :  { %5736 = vmatprep.subr.bf16.mxu0 %v5735_v4  ;;  %v8579_v29 = vsel %vm3940_vm7, %v3941_v11, %v3942_v14  ;;  %v8582_v44 = vsel %vm3940_vm7, %v3942_v14, %v3944_v43  ;;  %v8585_v61 = vsel %vm3940_vm7, %v3944_v43, %v3946_v63 }
 0x3d0   :  { %9425 = vst [vmem:[#allocation16_spill] sm:$0xff] %v8579_v29  ;;  %9426 = vst [vmem:[#allocation18_spill] sm:$0xff] %v8582_v44  ;;  %v3162_v2 = vsel %vm1236_vm5, %v2864_v23, %v6334_v32  ;;  %v8593_v47 = vsel %vm1236_vm5, %v2863_v36, %v6333_v28  ;;  %v8598_v20 = vsel %vm1236_vm5, %v2862_v12, %v6329_v41  ;;  %v2898_v12 = vld [vmem:[%s9195_s5 + $0x48] sm:$0xff]  ;;  %v9457_v44 = vmax.f32 %v8455_v7, 0.0  ;;  %v2928_v7 = vld [vmem:[%s9195_s5 + $0x138] sm:$0xff] }
 0x3d1   :  { %9427 = vst [vmem:[#allocation17_spill] sm:$0xff] %v8585_v61  ;;  %v8603_v33 = vsel %vm1236_vm5, %v2861_v17, %v6328_v39  ;;  %v3209_v21 = vrot.slane %v8598_v20, 2  ;;  %v3211_v23 = vrot.slane %v8593_v47, 2  ;;  %v3659_v17 = vrot.slane %v8598_v20, 4 }
 0x3d2   :  { %v3208_v63 = vrot.slane %v8603_v33, 2  ;;  %5738 = vmatpush3.bf16.msra.mxu0 %v5735_v4  ;;  %v3658_v40 = vrot.slane %v8603_v33, 4  ;;  %v3661_v36 = vrot.slane %v8593_v47, 4  ;;  %v3663_v28 = vrot.slane %v3162_v2, 4 }
 0x3d3   :  { %v3212_v43 = vsel %vm865_vm1, %v3209_v21, %v3211_v23  ;;  %v3213_v4 = vrot.slane %v3162_v2, 2  ;;  %5740 = vmatprep.subr.bf16.mxu0 %v5739_v15  ;;  %v3948_v11 = vrot.slane %v8603_v33, 6  ;;  %v3949_v32 = vrot.slane %v8598_v20, 6 }
 0x3d4   :  { %v3210_v41 = vsel %vm865_vm1, %v3208_v63, %v3209_v21  ;;  %v8621_v10 = vsel %vm1437_vm6, %v3658_v40, %v3659_v17  ;;  %v8624_v55 = vsel %vm1437_vm6, %v3659_v17, %v3661_v36  ;;  %v8627_v14 = vsel %vm1437_vm6, %v3661_v36, %v3663_v28 }
 0x3d5   :  { %5311 = vmatmul.mubr.f32.gmra.mrb[50].mxu0 %v3210_v41  ;;  %v6342_v39 = vpop.permute.xlu1 %6341  ;;  %v6337_v13 = vpop.permute.xlu0 %6336  ;;  %v5747_v45 = vpack.c.bf16 %v2898_v12, %v2897_v6  ;;  %v3951_v63 = vrot.slane %v8593_v47, 6  ;;  %v3953_v21 = vrot.slane %v3162_v2, 6  ;;  %v3214_v17 = vsel %vm865_vm1, %v3211_v23, %v3213_v4 }
 0x3d6   :  { %5313 = vmatprep.mubr.f32.mxu0 %v3212_v43  ;;  %v6344_v49 = vunpack.i.h.bf16 %v6342_v39  ;;  %v6343_v41 = vunpack.i.l.bf16 %v6342_v39  ;;  %v6339_v57 = vunpack.i.h.bf16 %v6337_v13  ;;  %v6338_v40 = vunpack.i.l.bf16 %v6337_v13  ;;  %5742 = vmatpush3.bf16.msra.mxu0 %v5739_v15 }
 0x3d7   :  { %5744 = vmatprep.subr.bf16.mxu0 %v5743_v54  ;;  %v8633_v36 = vsel %vm3940_vm7, %v3948_v11, %v3949_v32  ;;  %v8636_v28 = vsel %vm3940_vm7, %v3949_v32, %v3951_v63  ;;  %v8639_v43 = vsel %vm3940_vm7, %v3951_v63, %v3953_v21  ;;  %v9431_v6 = vmax.f32 %v8335_v16, 0.0  ;;  %v2902_v63 = vld [vmem:[%s9195_s5 + $0x68] sm:$0xff] }
 0x3d8   :  { %9428 = vst [vmem:[#allocation19_spill] sm:$0xff] %v8633_v36  ;;  %9429 = vst [vmem:[#allocation23_spill] sm:$0xff] %v8636_v28  ;;  %v3163_v2 = vsel %vm1236_vm5, %v2868_v9, %v6344_v49  ;;  %v8647_v15 = vsel %vm1236_vm5, %v2867_v50, %v6343_v41  ;;  %v8652_v23 = vsel %vm1236_vm5, %v2866_v59, %v6339_v57 }
 0x3d9   :  { %9430 = vst [vmem:[#allocation26_spill] sm:$0xff] %v8639_v43  ;;  %v8657_v12 = vsel %vm1236_vm5, %v9431_v6, %v6338_v40  ;;  %5314 = vmatmul.mubr.f32.gmra.mrb[52].mxu0 %v3214_v17  ;;  %v3216_v24 = vrot.slane %v8652_v23, 2  ;;  %v3218_v59 = vrot.slane %v8647_v15, 2  ;;  %v3220_v57 = vrot.slane %v3163_v2, 2 }
 0x3da   :  { %v3215_v9 = vrot.slane %v8657_v12, 2  ;;  %5746 = vmatpush3.bf16.msra.mxu0 %v5743_v54  ;;  %v3665_v16 = vrot.slane %v8657_v12, 4  ;;  %v3666_v50 = vrot.slane %v8652_v23, 4  ;;  %v3668_v49 = vrot.slane %v8647_v15, 4  ;;  %v2901_v54 = vld [vmem:[%s9195_s5 + $0x60] sm:$0xff] }
 0x3db   :  { %v3670_v4 = vrot.slane %v3163_v2, 4  ;;  %v3219_v32 = vsel %vm865_vm1, %v3216_v24, %v3218_v59  ;;  %5748 = vmatprep.subr.bf16.mxu0 %v5747_v45  ;;  %v5751_v39 = vpack.c.bf16 %v2900_v30, %v2899_v1  ;;  %v3955_v13 = vrot.slane %v8657_v12, 6 }
 0x3dc   :  { %v3217_v11 = vsel %vm865_vm1, %v3215_v9, %v3216_v24  ;;  %v8681_v21 = vsel %vm1437_vm6, %v3665_v16, %v3666_v50  ;;  %v8684_v41 = vsel %vm1437_vm6, %v3666_v50, %v3668_v49  ;;  %v3956_v17 = vrot.slane %v8652_v23, 6  ;;  %v2903_v50 = vld [vmem:[%s9195_s5 + $0x70] sm:$0xff] }
 0x3dd   :  { %5316 = vmatprep.mubr.f32.mxu0 %v3217_v11  ;;  %v8687_v40 = vsel %vm1437_vm6, %v3668_v49, %v3670_v4  ;;  %v6352_v6 = vpop.permute.xlu1 %6351  ;;  %v6347_v1 = vpop.permute.xlu0 %6346  ;;  %v3221_v30 = vsel %vm865_vm1, %v3218_v59, %v3220_v57  ;;  %v3958_v9 = vrot.slane %v8647_v15, 6  ;;  %v3960_v24 = vrot.slane %v3163_v2, 6  ;;  %v2904_v49 = vld [vmem:[%s9195_s5 + $0x78] sm:$0xff] }
 0x3de   :  { %5317 = vmatmul.mubr.f32.gmra.mrb[54].mxu0 %v3219_v32  ;;  %v6354_v11 = vunpack.i.h.bf16 %v6352_v6  ;;  %v6353_v43 = vunpack.i.l.bf16 %v6352_v6  ;;  %v6349_v16 = vunpack.i.h.bf16 %v6347_v1  ;;  %v6348_v28 = vunpack.i.l.bf16 %v6347_v1 }
 0x3df   :  { %5319 = vmatprep.mubr.f32.mxu0 %v3221_v30  ;;  %5750 = vmatpush3.bf16.msra.mxu0 %v5747_v45  ;;  %v5755_v4 = vpack.c.bf16 %v2902_v63, %v2901_v54  ;;  %v8699_v59 = vsel %vm3940_vm7, %v3955_v13, %v3956_v17  ;;  %v8702_v2 = vsel %vm3940_vm7, %v3956_v17, %v3958_v9  ;;  %v9435_v45 = vmax.f32 %v8381_v25, 0.0 }
 0x3e0   :  { %5752 = vmatprep.subr.bf16.mxu0 %v5751_v39  ;;  %9432 = vst [vmem:[#allocation22_spill] sm:$0xff] %v8699_v59  ;;  %9433 = vst [vmem:[#allocation27_spill] sm:$0xff] %v8702_v2  ;;  %v8705_v57 = vsel %vm3940_vm7, %v3958_v9, %v3960_v24  ;;  %v9436_v6 = vmax.f32 %v8384_v35, 0.0  ;;  %v9437_v54 = vmax.f32 %v8368_v31, 0.0  ;;  %v9438_v63 = vmax.f32 %v8373_v48, 0.0  ;;  %v2921_v31 = vld [vmem:[%s9195_s5 + $0x100] sm:$0xff] }
 0x3e1   :  { %9434 = vst [vmem:[#allocation25_spill] sm:$0xff] %v8705_v57  ;;  %v3164_v32 = vsel %vm1236_vm5, %v9435_v45, %v6354_v11  ;;  %v5759_v35 = vpack.c.bf16 %v2904_v49, %v2903_v50 }
 0x3e2   :  { %v8713_v1 = vsel %vm1236_vm5, %v9436_v6, %v6353_v43  ;;  %v8718_v13 = vsel %vm1236_vm5, %v9437_v54, %v6349_v16  ;;  %v8723_v17 = vsel %vm1236_vm5, %v9438_v63, %v6348_v28  ;;  %v2922_v43 = vld [vmem:[%s9195_s5 + $0x108] sm:$0xff]  ;;  %v3677_v11 = vrot.slane %v3164_v32, 4 }
 0x3e3   :  { %v3222_v30 = vrot.slane %v8723_v17, 2  ;;  %v3223_v25 = vrot.slane %v8718_v13, 2  ;;  %v3225_v9 = vrot.slane %v8713_v1, 2  ;;  %5754 = vmatpush3.bf16.msra.mxu0 %v5751_v39  ;;  %v3672_v48 = vrot.slane %v8723_v17, 4 }
 0x3e4   :  { %v3673_v28 = vrot.slane %v8718_v13, 4  ;;  %v3675_v24 = vrot.slane %v8713_v1, 4  ;;  %v3227_v39 = vrot.slane %v3164_v32, 2  ;;  %5756 = vmatprep.subr.bf16.mxu0 %v5755_v4  ;;  %v3962_v49 = vrot.slane %v8723_v17, 6 }
 0x3e5   :  { %v3224_v16 = vsel %vm865_vm1, %v3222_v30, %v3223_v25  ;;  %v3226_v50 = vsel %vm865_vm1, %v3223_v25, %v3225_v9  ;;  %v3963_v63 = vrot.slane %v8718_v13, 6  ;;  %v6362_v30 = vpop.permute.xlu1 %6361  ;;  %v6357_v57 = vpop.permute.xlu0 %6356  ;;  %v8750_v25 = vpack.c.bf16 %v2922_v43, %v2921_v31 }
 0x3e6   :  { %5320 = vmatmul.mubr.f32.gmra.mrb[56].mxu0 %v3224_v16  ;;  %v8741_v45 = vsel %vm1437_vm6, %v3672_v48, %v3673_v28  ;;  %v8744_v6 = vsel %vm1437_vm6, %v3673_v28, %v3675_v24  ;;  %v8747_v54 = vsel %vm1437_vm6, %v3675_v24, %v3677_v11  ;;  %v3965_v2 = vrot.slane %v8713_v1, 6 }
 0x3e7   :  { %5322 = vmatprep.mubr.f32.mxu0 %v3226_v50  ;;  %v3967_v59 = vrot.slane %v3164_v32, 6  ;;  %v6364_v16 = vunpack.i.h.bf16 %v6362_v30  ;;  %v6363_v36 = vunpack.i.l.bf16 %v6362_v30  ;;  %v6359_v48 = vunpack.i.h.bf16 %v6357_v57  ;;  %5758 = vmatpush3.bf16.msra.mxu0 %v5755_v4 }
 0x3e8   :  { %v6358_v61 = vunpack.i.l.bf16 %v6357_v57  ;;  %v3228_v28 = vsel %vm865_vm1, %v3225_v9, %v3227_v39  ;;  %5760 = vmatprep.subr.bf16.mxu0 %v5759_v35  ;;  %v8755_v24 = vsel %vm3940_vm7, %v3962_v49, %v3963_v63  ;;  %v8758_v11 = vsel %vm3940_vm7, %v3963_v63, %v3965_v2 }
 0x3e9   :  { %9439 = vst [vmem:[#allocation29_spill] sm:$0xff] %v8755_v24  ;;  %9440 = vst [vmem:[#allocation30_spill] sm:$0xff] %v8758_v11  ;;  %v8761_v31 = vsel %vm3940_vm7, %v3965_v2, %v3967_v59  ;;  %v9442_v43 = vmax.f32 %v8410_v62, 0.0  ;;  %v9443_v50 = vmax.f32 %v8413_v53, 0.0  ;;  %v9444_v57 = vmax.f32 %v8397_v51, 0.0 }
 0x3ea   :  { %9441 = vst [vmem:[#allocation31_spill] sm:$0xff] %v8761_v31  ;;  %v9445_v39 = vmax.f32 %v8402_v18, 0.0  ;;  %5323 = vmatmul.mubr.f32.gmra.mrb[58].mxu0 %v3228_v28 }
 0x3eb   :  { %v3165_v32 = vsel %vm1236_vm5, %v9442_v43, %v6364_v16  ;;  %v8769_v4 = vsel %vm1236_vm5, %v9443_v50, %v6363_v36  ;;  %v8774_v9 = vsel %vm1236_vm5, %v9444_v57, %v6359_v48  ;;  %5762 = vmatpush3.bf16.msra.mxu0 %v5759_v35 }
 0x3ec   :  { %v8779_v49 = vsel %vm1236_vm5, %v9445_v39, %v6358_v61  ;;  %v3230_v59 = vrot.slane %v8774_v9, 2  ;;  %v3232_v53 = vrot.slane %v8769_v4, 2  ;;  %v3234_v2 = vrot.slane %v3165_v32, 2  ;;  %5764 = vmatprep.subr.bf16.mxu0 %v8750_v25 }
 0x3ed   :  { %v3229_v62 = vrot.slane %v8779_v49, 2  ;;  %v3679_v36 = vrot.slane %v8779_v49, 4  ;;  %v3680_v51 = vrot.slane %v8774_v9, 4  ;;  %v3682_v63 = vrot.slane %v8769_v4, 4  ;;  %v6372_v50 = vpop.permute.xlu1 %6371  ;;  %v6367_v57 = vpop.permute.xlu0 %6366 }
 0x3ee   :  { %v3684_v30 = vrot.slane %v3165_v32, 4  ;;  %v3233_v61 = vsel %vm865_vm1, %v3230_v59, %v3232_v53  ;;  %v3969_v16 = vrot.slane %v8779_v49, 6  ;;  %v3970_v43 = vrot.slane %v8774_v9, 6 }
 0x3ef   :  { %v3231_v18 = vsel %vm865_vm1, %v3229_v62, %v3230_v59  ;;  %v8792_v48 = vsel %vm1437_vm6, %v3679_v36, %v3680_v51  ;;  %v8795_v35 = vsel %vm1437_vm6, %v3680_v51, %v3682_v63  ;;  %v3235_v39 = vsel %vm865_vm1, %v3232_v53, %v3234_v2 }
 0x3f0   :  { %5325 = vmatprep.mubr.f32.mxu0 %v3231_v18  ;;  %v8798_v28 = vsel %vm1437_vm6, %v3682_v63, %v3684_v30  ;;  %v3972_v62 = vrot.slane %v8769_v4, 6  ;;  %v3974_v59 = vrot.slane %v3165_v32, 6  ;;  %v6374_v18 = vunpack.i.h.bf16 %v6372_v50 }
 0x3f1   :  { %5326 = vmatmul.mubr.f32.gmra.mrb[60].mxu0 %v3233_v61  ;;  %v6373_v31 = vunpack.i.l.bf16 %v6372_v50  ;;  %v6369_v36 = vunpack.i.h.bf16 %v6367_v57  ;;  %v6368_v11 = vunpack.i.l.bf16 %v6367_v57  ;;  %v8804_v51 = vsel %vm3940_vm7, %v3969_v16, %v3970_v43 }
 0x3f2   :  { %5328 = vmatprep.mubr.f32.mxu0 %v3235_v39  ;;  %9446 = vst [vmem:[#allocation32_spill] sm:$0xff] %v8804_v51  ;;  %v8807_v63 = vsel %vm3940_vm7, %v3970_v43, %v3972_v62  ;;  %v8810_v30 = vsel %vm3940_vm7, %v3972_v62, %v3974_v59  ;;  %v9449_v61 = vmax.f32 %v8439_v56, 0.0  ;;  %v9450_v32 = vmax.f32 %v8442_v27, 0.0 }
 0x3f3   :  { %9447 = vst [vmem:[#allocation39_spill] sm:$0xff] %v8807_v63  ;;  %9448 = vst [vmem:[#allocation38_spill] sm:$0xff] %v8810_v30  ;;  %v9451_v50 = vmax.f32 %v8426_v22, 0.0  ;;  %v9452_v43 = vmax.f32 %v8431_v8, 0.0 }
 0x3f4   :  { %v3166_v53 = vsel %vm1236_vm5, %v9449_v61, %v6374_v18  ;;  %v8818_v2 = vsel %vm1236_vm5, %v9450_v32, %v6373_v31 }
 0x3f5   :  { %v8823_v16 = vsel %vm1236_vm5, %v9451_v50, %v6369_v36  ;;  %v8828_v57 = vsel %vm1236_vm5, %v9452_v43, %v6368_v11  ;;  %v3239_v62 = vrot.slane %v8818_v2, 2  ;;  %v3689_v22 = vrot.slane %v8818_v2, 4  ;;  %v6377_v30 = vpop.permute.xlu0 %6376 }
 0x3f6   :  { %v3236_v39 = vrot.slane %v8828_v57, 2  ;;  %v3237_v56 = vrot.slane %v8823_v16, 2  ;;  %v3686_v27 = vrot.slane %v8828_v57, 4  ;;  %v3687_v31 = vrot.slane %v8823_v16, 4 }
 0x3f7   :  { %v3691_v59 = vrot.slane %v3166_v53, 4  ;;  %v3241_v36 = vrot.slane %v3166_v53, 2  ;;  %v3976_v11 = vrot.slane %v8828_v57, 6  ;;  %v3977_v43 = vrot.slane %v8823_v16, 6 }
 0x3f8   :  { %v3238_v18 = vsel %vm865_vm1, %v3236_v39, %v3237_v56  ;;  %v3240_v8 = vsel %vm865_vm1, %v3237_v56, %v3239_v62  ;;  %v8840_v61 = vsel %vm1437_vm6, %v3686_v27, %v3687_v31  ;;  %v8843_v32 = vsel %vm1437_vm6, %v3687_v31, %v3689_v22  ;;  %v2923_v39 = vld [vmem:[%s9195_s5 + $0x110] sm:$0xff]  ;;  %v2924_v56 = vld [vmem:[%s9195_s5 + $0x118] sm:$0xff] }
 0x3f9   :  { %5329 = vmatmul.mubr.f32.gmra.mrb[62].mxu0 %v3238_v18  ;;  %v8846_v50 = vsel %vm1437_vm6, %v3689_v22, %v3691_v59  ;;  %v3979_v27 = vrot.slane %v8818_v2, 6  ;;  %v3981_v18 = vrot.slane %v3166_v53, 6  ;;  %v6379_v31 = vunpack.i.h.bf16 %v6377_v30 }
 0x3fa   :  { %9453 = vst [vmem:[#allocation40_spill] sm:$0xff] %v8846_v50  ;;  %5331 = vmatprep.mubr.f32.mxu0 %v3240_v8  ;;  %v6378_v63 = vunpack.i.l.bf16 %v6377_v30  ;;  %v8857_v22 = vsel %vm3940_vm7, %v3976_v11, %v3977_v43  ;;  %v3242_v59 = vsel %vm865_vm1, %v3239_v62, %v3241_v36  ;;  %v2925_v8 = vld [vmem:[%s9195_s5 + $0x120] sm:$0xff]  ;;  %v9458_v30 = vmax.f32 %v8460_v42, 0.0  ;;  %v2926_v36 = vld [vmem:[%s9195_s5 + $0x128] sm:$0xff]  ;;  %v6382_v42 = vpop.permute.xlu1 %6381 }
 0x3fb   :  { %9454 = vst [vmem:[#allocation33_spill] sm:$0xff] %v8857_v22  ;;  %v8864_v51 = vsel %vm3940_vm7, %v3977_v43, %v3979_v27  ;;  %v8867_v24 = vsel %vm3940_vm7, %v3979_v27, %v3981_v18  ;;  %v8872_v53 = vsel %vm1236_vm5, %v9457_v44, %v6379_v31  ;;  %v5767_v62 = vpack.c.bf16 %v2924_v56, %v2923_v39  ;;  %v2927_v43 = vld [vmem:[%s9195_s5 + $0x130] sm:$0xff] }
 0x3fc   :  { %9455 = vst [vmem:[#allocation28_spill] sm:$0xff] %v8864_v51  ;;  %9456 = vst [vmem:[#allocation21_spill] sm:$0xff] %v8867_v24  ;;  %v8877_v11 = vsel %vm1236_vm5, %v9458_v30, %v6378_v63  ;;  %v3244_v63 = vrot.slane %v8872_v53, 2  ;;  %v3694_v56 = vrot.slane %v8872_v53, 4  ;;  %v6384_v27 = vunpack.i.h.bf16 %v6382_v42 }
 0x3fd   :  { %5332 = vmatmul.mubr.f32.gmra.mrb[64].mxu0 %v3242_v59  ;;  %v3243_v44 = vrot.slane %v8877_v11, 2  ;;  %v3693_v39 = vrot.slane %v8877_v11, 4  ;;  %v6383_v18 = vunpack.i.l.bf16 %v6382_v42  ;;  %v3983_v31 = vrot.slane %v8877_v11, 6 }
 0x3fe   :  { %5375 = vmatprep.mubr.f32.mxu0 %v8536_v3  ;;  %v3984_v59 = vrot.slane %v8872_v53, 6  ;;  %v5771_v24 = vpack.c.bf16 %v2926_v36, %v2925_v8  ;;  %v8896_v51 = vpack.c.bf16 %v2928_v7, %v2927_v43  ;;  %v9460_v22 = vmax.f32 %v8487_v0, 0.0  ;;  %v3150_v36 = vpop.permute.xlu1 %3149  ;;  %v6387_v0 = vpop.permute.xlu0 %6386 }
 0x3ff   :  { %v3245_v30 = vsel %vm865_vm1, %v3243_v44, %v3244_v63  ;;  %v8899_v3 = vsel %vm1437_vm6, %v3693_v39, %v3694_v56  ;;  %v9461_v50 = vmax.f32 %v8471_v26, 0.0  ;;  %v9463_v7 = vmax.f32 %v8468_v5, 0.0 }
 0x400   :  { %9459 = vst [vmem:[#allocation5_spill] sm:$0xff] %v8899_v3  ;;  %v8904_v29 = vsel %vm1236_vm5, %v9460_v22, %v6384_v27  ;;  %5334 = vmatprep.mubr.f32.mxu1 %v3245_v30  ;;  %v8913_v8 = vsel %vm3940_vm7, %v3983_v31, %v3984_v59  ;;  %v6389_v44 = vunpack.i.h.bf16 %v6387_v0  ;;  %v6388_v39 = vunpack.i.l.bf16 %v6387_v0 }
 0x401   :  { %v8909_v42 = vsel %vm1236_vm5, %v9461_v50, %v6383_v18  ;;  %5376 = vmatmul.mubr.f32.vlgmr.msra.gmra.mrb[48].mxu0 %v8531_v37  ;;  %9462 = vst [vmem:[#allocation34_spill] sm:$0xff] %v8913_v8  ;;  %v3250_v43 = vrot.slane %v8904_v29, 2  ;;  %v3700_v50 = vrot.slane %v8904_v29, 4  ;;  %v3167_v37 = vsel %vm1236_vm5, %v9463_v7, %v3150_v36 }
 0x402   :  { %5766 = vmatpush3.bf16.msra.mxu0 %v8750_v25  ;;  %5378 = vmatprep.mubr.f32.mxu0 %v8526_v38  ;;  %v3246_v22 = vrot.slane %v8909_v42, 2  ;;  %v3696_v26 = vrot.slane %v8909_v42, 4  ;;  %v3986_v25 = vrot.slane %v8909_v42, 6  ;;  %v3248_v38 = vrot.slane %v3167_v37, 2 }
 0x403   :  { %5768 = vmatprep.subr.bf16.mxu0 %v5767_v62  ;;  %v3698_v27 = vrot.slane %v3167_v37, 4  ;;  %v3988_v18 = vrot.slane %v3167_v37, 6  ;;  %v9464_v30 = vmax.f32 %v8503_v34, 0.0  ;;  %v9465_v3 = vmax.f32 %v8482_v46, 0.0 }
 0x404   :  { %v3247_v31 = vsel %vm865_vm1, %v3244_v63, %v3246_v22  ;;  %v8938_v36 = vsel %vm1437_vm6, %v3694_v56, %v3696_v26  ;;  %v3990_v0 = vrot.slane %v8904_v29, 6  ;;  %v3152_v63 = vpop.permute.xlu0 %3151  ;;  %v3249_v34 = vsel %vm865_vm1, %v3246_v22, %v3248_v38 }
 0x405   :  { %v8929_v8 = vsel %vm1236_vm5, %v9464_v30, %v6389_v44  ;;  %v8934_v5 = vsel %vm1236_vm5, %v9465_v3, %v6388_v39  ;;  %5335 = vmatmul.mubr.f32.vlgmr.msra.gmra.mrb[32].mxu1 %v3247_v31  ;;  %5379 = vmatmul.mubr.f32.gmra.mrb[50].mxu0 %v8603_v33  ;;  %v8946_v3 = vsel %vm1437_vm6, %v3696_v26, %v3698_v27  ;;  %v9466_v33 = vmax.f32 %v8498_v19, 0.0  ;;  %v2929_v26 = vld [vmem:[%s9195_s5 + $0x140] sm:$0xff]  ;;  %v2930_v27 = vld [vmem:[%s9195_s5 + $0x148] sm:$0xff] }
 0x406   :  { %5381 = vmatprep.mubr.f32.mxu0 %v8598_v20  ;;  %5770 = vmatpush3.bf16.msra.mxu0 %v5767_v62  ;;  %v3251_v7 = vrot.slane %v8934_v5, 2  ;;  %v3253_v46 = vrot.slane %v8929_v8, 2  ;;  %v3701_v37 = vrot.slane %v8934_v5, 4  ;;  %v3703_v20 = vrot.slane %v8929_v8, 4 }
 0x407   :  { %v3168_v56 = vsel %vm1236_vm5, %v9466_v33, %v3152_v63  ;;  %5337 = vmatprep.mubr.f32.mxu1 %v3249_v34  ;;  %5772 = vmatprep.subr.bf16.mxu0 %v5771_v24  ;;  %v8954_v22 = vsel %vm3940_vm7, %v3984_v59, %v3986_v25  ;;  %v8977_v30 = vsel %vm3940_vm7, %v3986_v25, %v3988_v18  ;;  %v3993_v63 = vrot.slane %v8929_v8, 6  ;;  %v2932_v25 = vld [vmem:[%s9195_s5 + $0x158] sm:$0xff] }
 0x408   :  { %v3255_v62 = vrot.slane %v3168_v56, 2  ;;  %v3705_v44 = vrot.slane %v3168_v56, 4  ;;  %v3995_v39 = vrot.slane %v3168_v56, 6  ;;  %v3252_v38 = vsel %vm865_vm1, %v3250_v43, %v3251_v7 }
 0x409   :  { %5338 = vmatmul.mubr.f32.gmra.mrb[34].mxu1 %v3252_v38  ;;  %5382 = vmatmul.mubr.f32.gmra.mrb[52].mxu0 %v8593_v47  ;;  %v3254_v19 = vsel %vm865_vm1, %v3251_v7, %v3253_v46  ;;  %v8966_v59 = vsel %vm1437_vm6, %v3700_v50, %v3701_v37  ;;  %v8969_v31 = vsel %vm1437_vm6, %v3701_v37, %v3703_v20  ;;  %v3991_v43 = vrot.slane %v8934_v5, 6  ;;  %v9477_v37 = vld [vmem:[#allocation25_spill] sm:$0xff]  ;;  %v9482_v38 = vld [vmem:[#allocation39_spill] sm:$0xff] }
 0x40a   :  { %5340 = vmatprep.mubr.f32.mxu1 %v3254_v19  ;;  %5384 = vmatprep.mubr.f32.mxu0 %v8657_v12  ;;  %v8974_v47 = vsel %vm1437_vm6, %v3703_v20, %v3705_v44  ;;  %v3256_v34 = vsel %vm865_vm1, %v3253_v46, %v3255_v62  ;;  %v5779_v7 = vpack.c.bf16 %v2930_v27, %v2929_v26  ;;  %v9478_v20 = vld [vmem:[#allocation29_spill] sm:$0xff]  ;;  %v9479_v62 = vld [vmem:[#allocation30_spill] sm:$0xff]  ;;  %v9480_v44 = vld [vmem:[#allocation31_spill] sm:$0xff] }
 0x40b   :  { %5774 = vmatpush3.bf16.msra.mxu0 %v5771_v24  ;;  %v8981_v50 = vsel %vm3940_vm7, %v3990_v0, %v3991_v43  ;;  %v8986_v33 = vsel %vm3940_vm7, %v3991_v43, %v3993_v63  ;;  %v8989_v12 = vsel %vm3940_vm7, %v3993_v63, %v3995_v39  ;;  %v2931_v24 = vld [vmem:[%s9195_s5 + $0x150] sm:$0xff]  ;;  %v2934_v0 = vld [vmem:[%s9195_s5 + $0x168] sm:$0xff]  ;;  %v9481_v39 = vld [vmem:[#allocation32_spill] sm:$0xff] }
 0x40c   :  { %5776 = vmatprep.subr.bf16.mxu0 %v8896_v51  ;;  %v5783_v18 = vpack.c.bf16 %v2932_v25, %v2931_v24  ;;  %v9483_v19 = vld [vmem:[#allocation38_spill] sm:$0xff]  ;;  %v9484_v26 = vld [vmem:[#allocation33_spill] sm:$0xff]  ;;  %v9485_v27 = vld [vmem:[#allocation28_spill] sm:$0xff] }
 0x40d   :  { %5341 = vmatmul.mubr.f32.gmra.mrb[36].mxu1 %v3256_v34  ;;  %5385 = vmatmul.mubr.f32.gmra.mrb[54].mxu0 %v8652_v23  ;;  %v2933_v23 = vld [vmem:[%s9195_s5 + $0x160] sm:$0xff] }
 0x40e   :  { %5387 = vmatprep.mubr.f32.mxu0 %v8647_v15  ;;  %v5787_v46 = vpack.c.bf16 %v2934_v0, %v2933_v23  ;;  %v2935_v15 = vld [vmem:[%s9195_s5 + $0x170] sm:$0xff] }
 0x40f   :  { %5778 = vmatpush3.bf16.msra.mxu0 %v8896_v51 }
 0x410   :  { %5780 = vmatprep.subr.bf16.mxu0 %v5779_v7 }
 0x411   :  { %5388 = vmatmul.mubr.f32.gmra.mrb[56].mxu0 %v8723_v17  ;;  %v2936_v17 = vld [vmem:[%s9195_s5 + $0x178] sm:$0xff] }
 0x412   :  { %5390 = vmatprep.mubr.f32.mxu0 %v8718_v13  ;;  %v5791_v51 = vpack.c.bf16 %v2936_v17, %v2935_v15  ;;  %v2937_v13 = vld [vmem:[%s9195_s5 + $0x180] sm:$0xff] }
 0x413   :  { %5782 = vmatpush3.bf16.msra.mxu0 %v5779_v7 }
 0x414   :  { %5784 = vmatprep.subr.bf16.mxu0 %v5783_v18 }
 0x415   :  { %5391 = vmatmul.mubr.f32.gmra.mrb[58].mxu0 %v8713_v1  ;;  %v2938_v1 = vld [vmem:[%s9195_s5 + $0x188] sm:$0xff] }
 0x416   :  { %5393 = vmatprep.mubr.f32.mxu0 %v8779_v49  ;;  %v5795_v56 = vpack.c.bf16 %v2938_v1, %v2937_v13 }
 0x417   :  { %5786 = vmatpush3.bf16.msra.mxu0 %v5783_v18 }
 0x418   :  { %5788 = vmatprep.subr.bf16.mxu0 %v5787_v46 }
 0x419   :  { %5394 = vmatmul.mubr.f32.gmra.mrb[60].mxu0 %v8774_v9  ;;  %v2940_v9 = vld [vmem:[%s9195_s5 + $0x198] sm:$0xff] }
 0x41a   :  { %5396 = vmatprep.mubr.f32.mxu0 %v8769_v4  ;;  %v2939_v4 = vld [vmem:[%s9195_s5 + $0x190] sm:$0xff] }
 0x41b   :  { %5790 = vmatpush3.bf16.msra.mxu0 %v5787_v46  ;;  %v5799_v49 = vpack.c.bf16 %v2940_v9, %v2939_v4 }
 0x41c   :  { %5792 = vmatprep.subr.bf16.mxu0 %v5791_v51 }
 0x41d   :  { %5397 = vmatmul.mubr.f32.gmra.mrb[62].mxu0 %v8828_v57  ;;  %v2944_v57 = vld [vmem:[%s9195_s5 + $0x1b8] sm:$0xff] }
 0x41e   :  { %5399 = vmatprep.mubr.f32.mxu0 %v8823_v16 }
 0x41f   :  { %5794 = vmatpush3.bf16.msra.mxu0 %v5791_v51 }
 0x420   :  { %5796 = vmatprep.subr.bf16.mxu0 %v5795_v56 }
 0x421   :  { %5400 = vmatmul.mubr.f32.gmra.mrb[64].mxu0 %v8818_v2  ;;  %v2941_v2 = vld [vmem:[%s9195_s5 + $0x1a0] sm:$0xff] }
 0x422   :  { %5402 = vmatprep.mubr.f32.mxu0 %v8877_v11  ;;  %v2948_v11 = vld [vmem:[%s9195_s5 + $0x1d8] sm:$0xff] }
 0x425   :  { %5403 = vmatmul.mubr.f32.gmra.mrb[66].mxu0 %v8872_v53  ;;  %v2946_v53 = vld [vmem:[%s9195_s5 + $0x1c8] sm:$0xff] }
 0x426   :  { %5405 = vmatprep.mubr.f32.mxu0 %v8909_v42  ;;  %v2950_v42 = vld [vmem:[%s9195_s5 + $0x1e8] sm:$0xff] }
 0x429   :  { %5406 = vmatmul.mubr.f32.gmra.mrb[68].mxu0 %v8904_v29  ;;  %v2942_v29 = vld [vmem:[%s9195_s5 + $0x1a8] sm:$0xff] }
 0x42a   :  { %5408 = vmatprep.mubr.f32.mxu0 %v8934_v5  ;;  %v5803_v16 = vpack.c.bf16 %v2942_v29, %v2941_v2  ;;  %v9468_v5 = vld [vmem:[#allocation5_spill] sm:$0xff] }
 0x42d   :  { %5409 = vmatmul.mubr.f32.gmra.mrb[70].mxu0 %v8929_v8  ;;  %v2952_v8 = vld [vmem:[%s9195_s5 + $0x1f8] sm:$0xff] }
 0x42e   :  { %5443 = vmatprep.mubr.f32.mxu0 %v8559_v58  ;;  %v2943_v58 = vld [vmem:[%s9195_s5 + $0x1b0] sm:$0xff] }
 0x431   :  { %5444 = vmatmul.mubr.f32.vlgmr.msra.gmra.mrb[48].mxu0 %v8562_v60  ;;  %v5807_v60 = vpack.c.bf16 %v2944_v57, %v2943_v58 }
 0x432   :  { %5798 = vmatpush3.bf16.msra.mxu0 %v5795_v56  ;;  %5446 = vmatprep.mubr.f32.mxu0 %v8565_v52  ;;  %v2945_v52 = vld [vmem:[%s9195_s5 + $0x1c0] sm:$0xff] }
 0x433   :  { %5800 = vmatprep.subr.bf16.mxu0 %v5799_v49 }
 0x435   :  { %5447 = vmatmul.mubr.f32.gmra.mrb[50].mxu0 %v8621_v10  ;;  %v5811_v10 = vpack.c.bf16 %v2946_v53, %v2945_v52 }
 0x436   :  { %5449 = vmatprep.mubr.f32.mxu0 %v8624_v55  ;;  %5802 = vmatpush3.bf16.msra.mxu0 %v5799_v49  ;;  %v2947_v55 = vld [vmem:[%s9195_s5 + $0x1d0] sm:$0xff] }
 0x437   :  { %5804 = vmatprep.subr.bf16.mxu0 %v5803_v16 }
 0x439   :  { %5450 = vmatmul.mubr.f32.gmra.mrb[52].mxu0 %v8627_v14  ;;  %v5815_v14 = vpack.c.bf16 %v2948_v11, %v2947_v55 }
 0x43a   :  { %5452 = vmatprep.mubr.f32.mxu0 %v8681_v21  ;;  %5806 = vmatpush3.bf16.msra.mxu0 %v5803_v16  ;;  %v2949_v21 = vld [vmem:[%s9195_s5 + $0x1e0] sm:$0xff] }
 0x43b   :  { %5808 = vmatprep.subr.bf16.mxu0 %v5807_v60 }
 0x43d   :  { %5453 = vmatmul.mubr.f32.gmra.mrb[54].mxu0 %v8684_v41  ;;  %v5819_v41 = vpack.c.bf16 %v2950_v42, %v2949_v21 }
 0x43e   :  { %5455 = vmatprep.mubr.f32.mxu0 %v8687_v40  ;;  %5810 = vmatpush3.bf16.msra.mxu0 %v5807_v60  ;;  %v2951_v40 = vld [vmem:[%s9195_s5 + $0x1f0] sm:$0xff] }
 0x43f   :  { %5812 = vmatprep.subr.bf16.mxu0 %v5811_v10 }
 0x441   :  { %5456 = vmatmul.mubr.f32.gmra.mrb[56].mxu0 %v8741_v45  ;;  %v5823_v45 = vpack.c.bf16 %v2952_v8, %v2951_v40 }
 0x442   :  { %5458 = vmatprep.mubr.f32.mxu0 %v8744_v6  ;;  %5814 = vmatpush3.bf16.msra.mxu0 %v5811_v10  ;;  %v9467_v6 = vld [vmem:[#allocation40_spill] sm:$0xff] }
 0x443   :  { %5816 = vmatprep.subr.bf16.mxu0 %v5815_v14 }
 0x445   :  { %5459 = vmatmul.mubr.f32.gmra.mrb[58].mxu0 %v8747_v54  ;;  %v9469_v54 = vld [vmem:[#allocation16_spill] sm:$0xff] }
 0x446   :  { %5461 = vmatprep.mubr.f32.mxu0 %v8792_v48  ;;  %5818 = vmatpush3.bf16.msra.mxu0 %v5815_v14  ;;  %v9470_v48 = vld [vmem:[#allocation18_spill] sm:$0xff] }
 0x447   :  { %5820 = vmatprep.subr.bf16.mxu0 %v5819_v41 }
 0x449   :  { %5462 = vmatmul.mubr.f32.gmra.mrb[60].mxu0 %v8795_v35  ;;  %v9471_v35 = vld [vmem:[#allocation17_spill] sm:$0xff] }
 0x44a   :  { %5464 = vmatprep.mubr.f32.mxu0 %v8798_v28  ;;  %5822 = vmatpush3.bf16.msra.mxu0 %v5819_v41  ;;  %v9472_v28 = vld [vmem:[#allocation19_spill] sm:$0xff] }
 0x44b   :  { %5824 = vmatprep.subr.bf16.mxu0 %v5823_v45 }
 0x44d   :  { %5465 = vmatmul.mubr.f32.gmra.mrb[62].mxu0 %v8840_v61  ;;  %v9473_v61 = vld [vmem:[#allocation23_spill] sm:$0xff] }
 0x44e   :  { %5467 = vmatprep.mubr.f32.mxu0 %v8843_v32  ;;  %5826 = vmatpush3.bf16.msra.mxu0 %v5823_v45  ;;  %v9474_v32 = vld [vmem:[#allocation26_spill] sm:$0xff] }
 0x451   :  { %5468 = vmatmul.mubr.f32.gmra.mrb[64].mxu0 %v9467_v6 }
 0x452   :  { %5470 = vmatprep.mubr.f32.mxu0 %v9468_v5 }
 0x455   :  { %5471 = vmatmul.mubr.f32.gmra.mrb[66].mxu0 %v8938_v36  ;;  %v9475_v36 = vld [vmem:[#allocation22_spill] sm:$0xff] }
 0x456   :  { %5473 = vmatprep.mubr.f32.mxu0 %v8946_v3  ;;  %v9476_v3 = vld [vmem:[#allocation27_spill] sm:$0xff] }
 0x459   :  { %5474 = vmatmul.mubr.f32.gmra.mrb[68].mxu0 %v8966_v59  ;;  %v9486_v59 = vld [vmem:[#allocation21_spill] sm:$0xff] }
 0x45a   :  { %5476 = vmatprep.mubr.f32.mxu0 %v8969_v31  ;;  %v9487_v31 = vld [vmem:[#allocation34_spill] sm:$0xff] }
 0x45d   :  { %5477 = vmatmul.mubr.f32.gmra.mrb[70].mxu0 %v8974_v47 }
 0x45e   :  { %5511 = vmatprep.mubr.f32.mxu0 %v9469_v54 }
 0x461   :  { %5512 = vmatmul.mubr.f32.vlgmr.msra.gmra.mrb[48].mxu0 %v9470_v48 }
 0x462   :  { %5514 = vmatprep.mubr.f32.mxu0 %v9471_v35 }
 0x465   :  { %5515 = vmatmul.mubr.f32.gmra.mrb[50].mxu0 %v9472_v28 }
 0x466   :  { %5517 = vmatprep.mubr.f32.mxu0 %v9473_v61 }
 0x469   :  { %5518 = vmatmul.mubr.f32.gmra.mrb[52].mxu0 %v9474_v32 }
 0x46a   :  { %5520 = vmatprep.mubr.f32.mxu0 %v9475_v36 }
 0x46d   :  { %5521 = vmatmul.mubr.f32.gmra.mrb[54].mxu0 %v9476_v3 }
 0x46e   :  { %5523 = vmatprep.mubr.f32.mxu0 %v9477_v37 }
 0x471   :  { %5524 = vmatmul.mubr.f32.gmra.mrb[56].mxu0 %v9478_v20 }
 0x472   :  { %5526 = vmatprep.mubr.f32.mxu0 %v9479_v62 }
 0x475   :  { %5527 = vmatmul.mubr.f32.gmra.mrb[58].mxu0 %v9480_v44 }
 0x476   :  { %5529 = vmatprep.mubr.f32.mxu0 %v9481_v39 }
 0x479   :  { %5530 = vmatmul.mubr.f32.gmra.mrb[60].mxu0 %v9482_v38 }
 0x47a   :  { %5532 = vmatprep.mubr.f32.mxu0 %v9483_v19 }
 0x47d   :  { %5533 = vmatmul.mubr.f32.gmra.mrb[62].mxu0 %v9484_v26 }
 0x47e   :  { %5535 = vmatprep.mubr.f32.mxu0 %v9485_v27 }
 0x481   :  { %5536 = vmatmul.mubr.f32.gmra.mrb[64].mxu0 %v9486_v59 }
 0x482   :  { %5538 = vmatprep.mubr.f32.mxu0 %v9487_v31 }
 0x485   :  { %5539 = vmatmul.mubr.f32.gmra.mrb[66].mxu0 %v8954_v22  ;;  %v9138_v22 = vld [vmem:[%s9196_s6] ss:$0 sm:$0xff]  ;;  %s6418_s6 = smov [#allocation2]  }
 0x486   :  { %5541 = vmatprep.mubr.f32.mxu0 %v8977_v30  ;;  %s4388_s30 = sshll.u32 %s6418_s6, 4  ;;  %s4389_s30 = int_to_ptr.vmem [resolvable:$true] %s4388_s30 }
 0x487   :  { %s6391_s1 = scalar_lea.vmem %s4389_s30, 128  ;;  %p6396_p1 = scmp.lt.s32.totalorder %s4389_s30, %s4389_s30 }
 0x488   :  { %p6392_p0 = scmp.ne.s32.totalorder %s4389_s30, %s6391_s1  ;;  %p6397_p2 = scmp.lt.s32.totalorder %s6391_s1, %s6391_s1 }
 0x489   :  { %5542 = vmatmul.mubr.f32.gmra.mrb[68].mxu0 %v8981_v50 }
 0x48a   :  { %5544 = vmatprep.mubr.f32.mxu0 %v8986_v33  ;;  %p6398_p3 = por %p6397_p2, %p6396_p1 }
 0x48c   :  { %p6399_p4 = pnand %p6398_p3, %p6392_p0 }
 0x48d   :  { %5545 = vmatmul.mubr.f32.gmra.mrb[70].mxu0 %v8989_v12 }
 0x4d8   :  { %v9123_v43 = vpop.f32.mrb[32].mxu1 }
 0x4d9   :  { %v9125_v47 = vpop.f32.mrb[33].mxu1 }
 0x4dc   :  { %v9127_v63 = vpop.f32.mrb[34].mxu1 }
 0x4dd   :  { %v9129_v34 = vpop.f32.mrb[35].mxu1 }
 0x4e0   :  { %v9131_v7 = vpop.f32.mrb[36].mxu1 }
 0x4e1   :  { %v9133_v24 = vpop.f32.mrb[37].mxu1 }
 0x534   :  { %v5513_v30 = vpop.f32.mrb[48].mxu0 }
 0x535   :  { %v4238_v50 = vadd.f32 %v5513_v30, %v9138_v22  ;;  %v4087_v33 = vpop.f32.mrb[49].mxu0 }
 0x536   :  { %v4237_v12 = vadd.f32 %v9138_v22, %v4087_v33 }
 0x537   :  { %v4262_v25 = vmax.f32 %v4238_v50, 0.0 }
 0x538   :  { %v4261_v18 = vmax.f32 %v4237_v12, 0.0  ;;  %v5516_v23 = vpop.f32.mrb[50].mxu0 }
 0x539   :  { %v4097_v0 = vpop.f32.mrb[51].mxu0  ;;  %v4240_v17 = vadd.f32 %v5516_v23, %v9138_v22 }
 0x53a   :  { %v4285_v46 = vmax.f32 %v4261_v18, %v4262_v25  ;;  %v4239_v15 = vadd.f32 %v9138_v22, %v4097_v0 }
 0x53b   :  { %v4264_v29 = vmax.f32 %v4240_v17, 0.0 }
 0x53c   :  { %v4263_v51 = vmax.f32 %v4239_v15, 0.0  ;;  %v5519_v13 = vpop.f32.mrb[52].mxu0 }
 0x53d   :  { %v4242_v1 = vadd.f32 %v5519_v13, %v9138_v22  ;;  %v4107_v56 = vpop.f32.mrb[53].mxu0 }
 0x53e   :  { %v4287_v4 = vsel %vm4286_vm8, %v4263_v51, -inf  ;;  %v4241_v9 = vadd.f32 %v9138_v22, %v4107_v56 }
 0x53f   :  { %v4288_v49 = vmax.f32 %v4285_v46, %v4287_v4  ;;  %v4266_v2 = vmax.f32 %v4242_v1, 0.0 }
 0x540   :  { %v4265_v16 = vmax.f32 %v4241_v9, 0.0  ;;  %v5522_v58 = vpop.f32.mrb[54].mxu0 }
 0x541   :  { %v4289_v57 = vrot.slane %v4288_v49, 4  ;;  %v4244_v60 = vadd.f32 %v5522_v58, %v9138_v22  ;;  %v4117_v52 = vpop.f32.mrb[55].mxu0  ;;  %v4296_v11 = vsel %vm4286_vm8, %v4266_v2, -inf }
 0x542   :  { %v4295_v53 = vmax.f32 %v4264_v29, %v4265_v16  ;;  %v4243_v10 = vadd.f32 %v9138_v22, %v4117_v52 }
 0x543   :  { %v4290_v55 = vmax.f32 %v4288_v49, %v4289_v57  ;;  %v4268_v14 = vmax.f32 %v4244_v60, 0.0 }
 0x544   :  { %v4297_v21 = vmax.f32 %v4295_v53, %v4296_v11  ;;  %v4267_v42 = vmax.f32 %v4243_v10, 0.0  ;;  %v5525_v41 = vpop.f32.mrb[56].mxu0 }
 0x545   :  { %v4291_v40 = vrot.slane %v4290_v55, 2  ;;  %v4127_v8 = vpop.f32.mrb[57].mxu0  ;;  %v4246_v35 = vadd.f32 %v5525_v41, %v9138_v22 }
 0x546   :  { %v4298_v45 = vrot.slane %v4297_v21, 4  ;;  %v4304_v6 = vmax.f32 %v4267_v42, %v4268_v14  ;;  %v4245_v5 = vadd.f32 %v9138_v22, %v4127_v8 }
 0x547   :  { %v4292_v54 = vmax.f32 %v4290_v55, %v4291_v40  ;;  %v4270_v19 = vmax.f32 %v4246_v35, 0.0 }
 0x548   :  { %v4299_v48 = vmax.f32 %v4297_v21, %v4298_v45  ;;  %v4269_v28 = vmax.f32 %v4245_v5, 0.0  ;;  %v5528_v61 = vpop.f32.mrb[58].mxu0 }
 0x549   :  { %v4248_v32 = vadd.f32 %v5528_v61, %v9138_v22  ;;  %v4137_v36 = vpop.f32.mrb[59].mxu0  ;;  %v4293_v39 = vrot.slane %v4292_v54, 1 }
 0x54a   :  { %v4300_v3 = vrot.slane %v4299_v48, 2  ;;  %v4305_v37 = vsel %vm4286_vm8, %v4269_v28, -inf  ;;  %v4247_v20 = vadd.f32 %v9138_v22, %v4137_v36 }
 0x54b   :  { %v4306_v62 = vmax.f32 %v4304_v6, %v4305_v37  ;;  %v4272_v44 = vmax.f32 %v4248_v32, 0.0  ;;  %v4294_v0 = vmax.f32 %v4292_v54, %v4293_v39 }
 0x54c   :  { %v4301_v38 = vmax.f32 %v4299_v48, %v4300_v3  ;;  %v4271_v26 = vmax.f32 %v4247_v20, 0.0  ;;  %v5531_v27 = vpop.f32.mrb[60].mxu0 }
 0x54d   :  { %v4307_v59 = vrot.slane %v4306_v62, 4  ;;  %v4250_v31 = vadd.f32 %v5531_v27, %v9138_v22  ;;  %v4147_v30 = vpop.f32.mrb[61].mxu0  ;;  %v4314_v18 = vsel %vm4286_vm8, %v4272_v44, -inf }
 0x54e   :  { %v4302_v50 = vrot.slane %v4301_v38, 1  ;;  %v4313_v33 = vmax.f32 %v4270_v19, %v4271_v26  ;;  %v4249_v12 = vadd.f32 %v9138_v22, %v4147_v30 }
 0x54f   :  { %v4308_v25 = vmax.f32 %v4306_v62, %v4307_v59  ;;  %v4274_v23 = vmax.f32 %v4250_v31, 0.0 }
 0x550   :  { %v4303_v46 = vmax.f32 %v4301_v38, %v4302_v50  ;;  %v4315_v15 = vmax.f32 %v4313_v33, %v4314_v18  ;;  %v4273_v17 = vmax.f32 %v4249_v12, 0.0  ;;  %v5534_v51 = vpop.f32.mrb[62].mxu0 }
 0x551   :  { %v4309_v13 = vrot.slane %v4308_v25, 2  ;;  %v4157_v1 = vpop.f32.mrb[63].mxu0  ;;  %v4252_v16 = vadd.f32 %v5534_v51, %v9138_v22 }
 0x552   :  { %v4316_v56 = vrot.slane %v4315_v15, 4  ;;  %v4322_v4 = vmax.f32 %v4273_v17, %v4274_v23  ;;  %v4251_v9 = vadd.f32 %v9138_v22, %v4157_v1  ;;  %v4367_v49 = vsel %vm4366_vm9, %v4303_v46, %v4294_v0 }
 0x553   :  { %v4310_v2 = vmax.f32 %v4308_v25, %v4309_v13  ;;  %v4276_v40 = vmax.f32 %v4252_v16, 0.0 }
 0x554   :  { %v4317_v29 = vmax.f32 %v4315_v15, %v4316_v56  ;;  %v4275_v58 = vmax.f32 %v4251_v9, 0.0  ;;  %v5537_v57 = vpop.f32.mrb[64].mxu0 }
 0x555   :  { %v4311_v60 = vrot.slane %v4310_v2, 1  ;;  %v4254_v52 = vadd.f32 %v5537_v57, %v9138_v22  ;;  %v4167_v53 = vpop.f32.mrb[65].mxu0 }
 0x556   :  { %v4318_v10 = vrot.slane %v4317_v29, 2  ;;  %v4323_v55 = vsel %vm4286_vm8, %v4275_v58, -inf  ;;  %v4253_v11 = vadd.f32 %v9138_v22, %v4167_v53 }
 0x557   :  { %v4312_v14 = vmax.f32 %v4310_v2, %v4311_v60  ;;  %v4324_v21 = vmax.f32 %v4322_v4, %v4323_v55  ;;  %v4278_v42 = vmax.f32 %v4254_v52, 0.0 }
 0x558   :  { %v4319_v41 = vmax.f32 %v4317_v29, %v4318_v10  ;;  %v4277_v8 = vmax.f32 %v4253_v11, 0.0  ;;  %v5540_v45 = vpop.f32.mrb[66].mxu0 }
 0x559   :  { %v4325_v6 = vrot.slane %v4324_v21, 4  ;;  %v5843_v5 = vadd.f32 %v5540_v45, %v9123_v43  ;;  %v4177_v54 = vpop.f32.mrb[67].mxu0  ;;  %v4369_v48 = vsel %vm4368_vm10, %v4312_v14, %v4367_v49  ;;  %v4332_v36 = vsel %vm4286_vm8, %v4278_v42, -inf }
 0x55a   :  { %v4320_v35 = vrot.slane %v4319_v41, 1  ;;  %v4331_v28 = vmax.f32 %v4276_v40, %v4277_v8  ;;  %v5844_v61 = vadd.f32 %v4177_v54, %v9125_v47 }
 0x55b   :  { %v4326_v32 = vmax.f32 %v4324_v21, %v4325_v6  ;;  %v4256_v3 = vadd.f32 %v5843_v5, %v9138_v22 }
 0x55c   :  { %v4321_v37 = vmax.f32 %v4319_v41, %v4320_v35  ;;  %v4333_v20 = vmax.f32 %v4331_v28, %v4332_v36  ;;  %v4255_v62 = vadd.f32 %v5844_v61, %v9138_v22  ;;  %v5543_v44 = vpop.f32.mrb[68].mxu0 }
 0x55d   :  { %v4327_v39 = vrot.slane %v4326_v32, 2  ;;  %v4280_v38 = vmax.f32 %v4256_v3, 0.0  ;;  %v5845_v43 = vadd.f32 %v5543_v44, %v9127_v63  ;;  %v4187_v19 = vpop.f32.mrb[69].mxu0 }
 0x55e   :  { %v4334_v26 = vrot.slane %v4333_v20, 4  ;;  %v4279_v27 = vmax.f32 %v4255_v62, 0.0  ;;  %v5846_v47 = vadd.f32 %v4187_v19, %v9129_v34  ;;  %v4371_v59 = vsel %vm4370_vm11, %v4321_v37, %v4369_v48 }
 0x55f   :  { %v4328_v31 = vmax.f32 %v4326_v32, %v4327_v39  ;;  %v4258_v63 = vadd.f32 %v5845_v43, %v9138_v22 }
 0x560   :  { %v4335_v30 = vmax.f32 %v4333_v20, %v4334_v26  ;;  %v4340_v50 = vmax.f32 %v4279_v27, %v4280_v38  ;;  %v4257_v33 = vadd.f32 %v5846_v47, %v9138_v22  ;;  %v5546_v12 = vpop.f32.mrb[70].mxu0 }
 0x561   :  { %v4329_v25 = vrot.slane %v4328_v31, 1  ;;  %v5847_v18 = vadd.f32 %v5546_v12, %v9131_v7  ;;  %v4197_v23 = vpop.f32.mrb[71].mxu0  ;;  %v4282_v49 = vmax.f32 %v4258_v63, 0.0 }
 0x562   :  { %v4336_v0 = vrot.slane %v4335_v30, 2  ;;  %v4281_v46 = vmax.f32 %v4257_v33, 0.0  ;;  %v5848_v15 = vadd.f32 %v4197_v23, %v9133_v24 }
 0x563   :  { %v4330_v17 = vmax.f32 %v4328_v31, %v4329_v25  ;;  %v4260_v34 = vadd.f32 %v5847_v18, %v9138_v22 }
 0x564   :  { %v4337_v51 = vmax.f32 %v4335_v30, %v4336_v0  ;;  %v4341_v13 = vsel %vm4286_vm8, %v4281_v46, -inf  ;;  %v4259_v1 = vadd.f32 %v5848_v15, %v9138_v22 }
 0x565   :  { %v4342_v56 = vmax.f32 %v4340_v50, %v4341_v13  ;;  %v4284_v4 = vmax.f32 %v4260_v34, 0.0  ;;  %v4373_v9 = vsel %vm4372_vm12, %v4330_v17, %v4371_v59 }
 0x566   :  { %v4338_v7 = vrot.slane %v4337_v51, 1  ;;  %v4283_v2 = vmax.f32 %v4259_v1, 0.0 }
 0x567   :  { %v4343_v29 = vrot.slane %v4342_v56, 4  ;;  %v4350_v24 = vsel %vm4286_vm8, %v4284_v4, -inf }
 0x568   :  { %v4349_v16 = vmax.f32 %v4282_v49, %v4283_v2  ;;  %v4339_v58 = vmax.f32 %v4337_v51, %v4338_v7 }
 0x569   :  { %v4344_v57 = vmax.f32 %v4342_v56, %v4343_v29 }
 0x56a   :  { %v4351_v60 = vmax.f32 %v4349_v16, %v4350_v24  ;;  %v4375_v52 = vsel %vm4374_vm13, %v4339_v58, %v4373_v9 }
 0x56b   :  { %v4345_v53 = vrot.slane %v4344_v57, 2 }
 0x56c   :  { %v4352_v10 = vrot.slane %v4351_v60, 4 }
 0x56d   :  { %v4346_v55 = vmax.f32 %v4344_v57, %v4345_v53 }
 0x56e   :  { %v4353_v11 = vmax.f32 %v4351_v60, %v4352_v10 }
 0x56f   :  { %v4347_v22 = vrot.slane %v4346_v55, 1 }
 0x570   :  { %v4354_v14 = vrot.slane %v4353_v11, 2 }
 0x571   :  { %v4348_v21 = vmax.f32 %v4346_v55, %v4347_v22 }
 0x572   :  { %v4355_v42 = vmax.f32 %v4353_v11, %v4354_v14 }
 0x573   :  { %v4377_v41 = vsel %vm4376_vm14, %v4348_v21, %v4375_v52 }
 0x574   :  { %v4356_v40 = vrot.slane %v4355_v42, 1 }
 0x576   :  { %v4357_v8 = vmax.f32 %v4355_v42, %v4356_v40 }
 0x578   :  { %v4379_v45 = vsel %vm4378_vm15, %v4357_v8, %v4377_v41 }
 0x579   :  { %4381 = vst [vmem:[#allocation2] sm:$0xff] %v4379_v45 }
 0x57a   :  { %6402 = shalt.err (!%p6399_p4)
}
 0x57b   :  { %s6403_s9 = scalar_lea.hbm %s9197_s7, 128 }
 0x57c   :  { %p6404_p5 = scmp.ne.s32.totalorder %s9197_s7, %s6403_s9  ;;  %p6407_p6 = scmp.lt.u32.totalorder %s6403_s9, %s9197_s7 }
 0x57e   :  { %p6409_p7 = pnand %p6407_p6, %p6404_p5 }
 0x580   :  { %6412 = shalt.err (!%p6409_p7)
}
 0x581   :  { %4391 = dma.vmem_to_hbm [thread:$0]  %s4389_s30, 128, %s9197_s7, [#allocation3]  }
 0x582   :  { %6413 = dma.done.wait [#allocation3], 128  }
 0x583   :  { %6414 = vsyncadd [#allocation3], 4294967168 }
 0x584   :  { %4395 = vsyncpa [#allocation3], 1 }

</bundles_post_ra>
